<compile_context>
chip_gen: v7x
topology: tpu7x:2x2x1
jax: 0.10.0
libtpu: 0.0.40
codegen_flags: <defaults>
</compile_context>

<pallas_src>
import numpy as np
import jax
import jax.numpy as jnp
from jax.experimental import pallas as pl
from jax.experimental.pallas import tpu as pltpu


# ---------------------------------------------------------------------------
# Hyper-parameters (the "opt" object of the PyTorch module), kept SMALL.
# ---------------------------------------------------------------------------
N_CLASSES = 10
LATENT_DIM = 16
IMG_SHAPE = (1, 8, 8)                    # (C, H, W)
IMG_PROD = int(np.prod(IMG_SHAPE))       # 64
BATCH = 16                               # full bf16 sublane pack; amortizes weight DMA

LEAKY_SLOPE = 0.2
BN_EPS = 0.8                 # nn.BatchNorm1d(out_feat, 0.8): 2nd positional arg is eps

HIDDEN = (128, 256, 512, 1024)

# Small operands ride the normal VMEM path (< 0.5 MB total).
VMEM_OPERANDS = ("labels", "z", "emb",
                 "w1e", "w1z", "b1",
                 "w2", "b2", "g2", "be2",
                 "w3", "b3", "g3", "be3",
                 "b4", "g4", "be4",
                 "b5")
# Large weights get raw refs (pl.ANY) and a manual async copy overlapped with
# the early layers.
ANY_OPERANDS = ("w4", "w5")
ALL_OPERANDS = VMEM_OPERANDS + ANY_OPERANDS


# ---------------------------------------------------------------------------
# Shared math (used by both the Pallas kernel and the pure-JAX reference).
# `get(name)` returns the operand value at its point of use: inside the kernel
# it is a Ref read (and, for w4/w5, a DMA wait), in the reference a plain array.
# ---------------------------------------------------------------------------
def _leaky_relu(x):
    return jnp.where(x > 0, x, LEAKY_SLOPE * x)


def _batchnorm_train(x, gamma, beta):
    # Training-mode BatchNorm1d: biased batch statistics over the batch axis,
    # fused into a single per-feature scale/shift.
    mean = jnp.mean(x, axis=0, keepdims=True)
    var = jnp.mean((x - mean) * (x - mean), axis=0, keepdims=True)
    scale = gamma * jax.lax.rsqrt(var + BN_EPS)
    shift = beta - mean * scale
    return x * scale + shift


def _forward_math(get, batch):
    # Embedding lookup as a one-hot matmul (exact: picks bf16-rounded rows).
    labels = get("labels")                                        # (B, 1) int32
    iota = jax.lax.broadcasted_iota(jnp.int32, (batch, N_CLASSES), 1)
    onehot = (labels == iota).astype(jnp.bfloat16)                # (B, n_classes)
    emb = jnp.dot(onehot, get("emb"),
                  preferred_element_type=jnp.float32)             # (B, n_classes) f32

    # Block 1: Linear(latent+n_classes -> 128) -> LeakyReLU (no BN).
    # concat([emb, z], -1) @ W1 == emb @ W1[:n_classes] + z @ W1[n_classes:].
    z = get("z").astype(jnp.bfloat16)
    h = (jnp.dot(emb.astype(jnp.bfloat16), get("w1e"),
                 preferred_element_type=jnp.float32)
         + jnp.dot(z, get("w1z"), preferred_element_type=jnp.float32)
         + get("b1"))
    h = _leaky_relu(h)

    # Blocks 2-4: Linear -> BatchNorm1d(train stats, eps=0.8) -> LeakyReLU.
    for w, b, g, be in (("w2", "b2", "g2", "be2"),
                        ("w3", "b3", "g3", "be3"),
                        ("w4", "b4", "g4", "be4")):
        h = jnp.dot(h.astype(jnp.bfloat16), get(w),
                    preferred_element_type=jnp.float32) + get(b)
        h = _leaky_relu(_batchnorm_train(h, get(g), get(be)))

    # Output: Linear(1024 -> prod(img_shape)) -> Tanh.
    h = jnp.dot(h.astype(jnp.bfloat16), get("w5"),
                preferred_element_type=jnp.float32) + get("b5")
    return jnp.tanh(h)


# ---------------------------------------------------------------------------
# Pallas kernel: the full fused forward (no grid; everything VMEM-resident,
# with the two biggest weights streamed manually and overlapped with compute).
# ---------------------------------------------------------------------------
def generator_mlp_kernel(*refs):
    n_in = len(ALL_OPERANDS)
    in_refs = refs[:n_in]
    out_ref = refs[n_in]
    w4_buf, w5_buf, dma_sems = refs[n_in + 1:]

    refs_by_name = dict(zip(ALL_OPERANDS, in_refs))

    # Kick off the big-weight DMAs immediately; they overlap the embedding and
    # layer 1-3 matmuls / BatchNorms (w4 + w5 are ~66% of all HBM bytes).
    w4_cp = pltpu.make_async_copy(refs_by_name["w4"], w4_buf, dma_sems.at[0])
    w5_cp = pltpu.make_async_copy(refs_by_name["w5"], w5_buf, dma_sems.at[1])
    w4_cp.start()
    w5_cp.start()

    def get(name):
        if name == "w4":
            w4_cp.wait()
            return w4_buf[...]
        if name == "w5":
            w5_cp.wait()
            return w5_buf[...]
        return refs_by_name[name][...]        # point-of-use load

    batch = out_ref.shape[0]
    out_ref[...] = _forward_math(get, batch)


# ---------------------------------------------------------------------------
# Parameter construction (deterministic, synthetic).
#   Weights are bf16; biases / BN params stay f32.
# ---------------------------------------------------------------------------
def init_params(key):
    keys = jax.random.split(key, 20)
    p = {}
    p["emb"] = jax.random.normal(keys[0], (N_CLASSES, N_CLASSES),
                                 jnp.float32).astype(jnp.bfloat16)

    def linear(kw, kb, din, dout):
        scale = 1.0 / np.sqrt(din)
        w = jax.random.uniform(kw, (din, dout), jnp.float32, -scale, scale)
        b = jax.random.uniform(kb, (1, dout), jnp.float32, -scale, scale)
        return w.astype(jnp.bfloat16), b      # bf16 weights, f32 bias

    in_feat = LATENT_DIM + N_CLASSES
    w1, p["b1"] = linear(keys[1], keys[2], in_feat, HIDDEN[0])
    p["w1e"], p["w1z"] = w1[:N_CLASSES], w1[N_CLASSES:]   # split == concat-then-matmul
    p["w2"], p["b2"] = linear(keys[3], keys[4], HIDDEN[0], HIDDEN[1])
    p["w3"], p["b3"] = linear(keys[5], keys[6], HIDDEN[1], HIDDEN[2])
    p["w4"], p["b4"] = linear(keys[7], keys[8], HIDDEN[2], HIDDEN[3])
    p["w5"], p["b5"] = linear(keys[9], keys[10], HIDDEN[3], IMG_PROD)

    # BatchNorm affine params (near PyTorch default 1/0 but perturbed so the
    # affine transform is actually exercised).
    def bn(kg, kb, d):
        g = 1.0 + 0.1 * jax.random.normal(kg, (1, d), jnp.float32)
        b = 0.1 * jax.random.normal(kb, (1, d), jnp.float32)
        return g, b

    p["g2"], p["be2"] = bn(keys[11], keys[12], HIDDEN[1])
    p["g3"], p["be3"] = bn(keys[13], keys[14], HIDDEN[2])
    p["g4"], p["be4"] = bn(keys[15], keys[16], HIDDEN[3])
    return p


# ---------------------------------------------------------------------------
# Wrapper: one pallas_call for the whole forward; only the label reshape and
# the final NCHW view remain outside the kernel.
# ---------------------------------------------------------------------------
@jax.jit
def generator_forward(z, labels, params):
    batch = z.shape[0]
    operands = dict(params)
    operands["labels"] = labels.reshape(batch, 1).astype(jnp.int32)
    operands["z"] = z
    ordered = [operands[k] for k in ALL_OPERANDS]

    # Advisory cost estimate so XLA schedules the custom call sensibly.
    flops = 2 * batch * (N_CLASSES * N_CLASSES
                         + N_CLASSES * HIDDEN[0] + LATENT_DIM * HIDDEN[0]
                         + HIDDEN[0] * HIDDEN[1] + HIDDEN[1] * HIDDEN[2]
                         + HIDDEN[2] * HIDDEN[3] + HIDDEN[3] * IMG_PROD)
    transcendentals = batch * IMG_PROD + (HIDDEN[1] + HIDDEN[2] + HIDDEN[3])
    bytes_accessed = (sum(int(np.prod(a.shape)) * a.dtype.itemsize for a in ordered)
                      + batch * IMG_PROD * 4)
    cost = pl.CostEstimate(flops=flops, transcendentals=transcendentals,
                           bytes_accessed=bytes_accessed)

    vmem_spec = pl.BlockSpec(memory_space=pltpu.MemorySpace.VMEM)
    any_spec = pl.BlockSpec(memory_space=pl.ANY)

    flat = pl.pallas_call(
        generator_mlp_kernel,
        out_shape=jax.ShapeDtypeStruct((batch, IMG_PROD), jnp.float32),
        in_specs=[vmem_spec] * len(VMEM_OPERANDS) + [any_spec] * len(ANY_OPERANDS),
        out_specs=vmem_spec,
        scratch_shapes=[
            pltpu.VMEM(params["w4"].shape, params["w4"].dtype),   # w4 landing buffer
            pltpu.VMEM(params["w5"].shape, params["w5"].dtype),   # w5 landing buffer
            pltpu.SemaphoreType.DMA((2,)),
        ],
        compiler_params=pltpu.CompilerParams(vmem_limit_bytes=16 * 1024 * 1024),
        cost_estimate=cost,
    )(*ordered)

    # img.view(B, *img_shape) -> NCHW (free metadata reshape).
    return flat.reshape(batch, *IMG_SHAPE)


# ---------------------------------------------------------------------------
# Pure-JAX reference (identical math, no Pallas) for a sanity check.
# ---------------------------------------------------------------------------
def generator_forward_ref(z, labels, params):
    batch = z.shape[0]
    vals = dict(params)
    vals["labels"] = labels.reshape(batch, 1).astype(jnp.int32)
    vals["z"] = z
    flat = _forward_math(lambda name: vals[name], batch)
    return flat.reshape(batch, *IMG_SHAPE)


if __name__ == "__main__":
    key = jax.random.PRNGKey(0)
    kp, kz, kl = jax.random.split(key, 3)

    params = init_params(kp)
    z = jax.random.normal(kz, (BATCH, LATENT_DIM), jnp.float32)
    labels = jax.random.randint(kl, (BATCH,), 0, N_CLASSES, jnp.int32)

    img = jax.block_until_ready(generator_forward(z, labels, params))
    ref = jax.block_until_ready(generator_forward_ref(z, labels, params))

    assert img.shape == (BATCH, *IMG_SHAPE), img.shape
    # bf16 matmul inputs on both paths; tolerance covers summation-order diffs.
    np.testing.assert_allclose(np.asarray(img), np.asarray(ref),
                               atol=1e-2, rtol=1e-2)

    print("KERNEL_OK")
</pallas_src>

<mosaic_0001>
module attributes {stable_mosaic.version = 11 : i64} {
  func.func @generator_mlp_kernel(%arg0: memref<16x1xi32, #tpu.memory_space<vmem>>, %arg1: memref<16x16xf32, #tpu.memory_space<vmem>>, %arg2: memref<10x10xbf16, #tpu.memory_space<vmem>>, %arg3: memref<10x128xbf16, #tpu.memory_space<vmem>>, %arg4: memref<16x128xbf16, #tpu.memory_space<vmem>>, %arg5: memref<1x128xf32, #tpu.memory_space<vmem>>, %arg6: memref<128x256xbf16, #tpu.memory_space<vmem>>, %arg7: memref<1x256xf32, #tpu.memory_space<vmem>>, %arg8: memref<1x256xf32, #tpu.memory_space<vmem>>, %arg9: memref<1x256xf32, #tpu.memory_space<vmem>>, %arg10: memref<256x512xbf16, #tpu.memory_space<vmem>>, %arg11: memref<1x512xf32, #tpu.memory_space<vmem>>, %arg12: memref<1x512xf32, #tpu.memory_space<vmem>>, %arg13: memref<1x512xf32, #tpu.memory_space<vmem>>, %arg14: memref<1x1024xf32, #tpu.memory_space<vmem>>, %arg15: memref<1x1024xf32, #tpu.memory_space<vmem>>, %arg16: memref<1x1024xf32, #tpu.memory_space<vmem>>, %arg17: memref<1x64xf32, #tpu.memory_space<vmem>>, %arg18: memref<512x1024xbf16, #tpu.memory_space<any>>, %arg19: memref<1024x64xbf16, #tpu.memory_space<any>>, %arg20: memref<16x64xf32, #tpu.memory_space<vmem>>, %arg21: memref<512x1024xbf16, #tpu.memory_space<vmem>>, %arg22: memref<1024x64xbf16, #tpu.memory_space<vmem>>, %arg23: memref<2x!tpu.dma_semaphore, #tpu.memory_space<semaphore_mem>>) attributes {dimension_semantics = [], scalar_prefetch = 0 : i64, scratch_operands = 3 : i64, tpu.core_type = #tpu.core_type<tc>} {
    %c0_i32 = arith.constant 0 : i32
    %0 = tpu.memref_slice %arg23[%c0_i32] : memref<2x!tpu.dma_semaphore, #tpu.memory_space<semaphore_mem>> -> memref<1x!tpu.dma_semaphore, #tpu.memory_space<semaphore_mem>>
    %1 = tpu.memref_squeeze %0 : memref<1x!tpu.dma_semaphore, #tpu.memory_space<semaphore_mem>> -> memref<!tpu.dma_semaphore, #tpu.memory_space<semaphore_mem>>
    tpu.enqueue_dma source(%arg18 : memref<512x1024xbf16, #tpu.memory_space<any>>) target(%arg21 : memref<512x1024xbf16, #tpu.memory_space<vmem>>) target_semaphore(%1 : memref<!tpu.dma_semaphore, #tpu.memory_space<semaphore_mem>>)
    %c1_i32 = arith.constant 1 : i32
    %2 = tpu.memref_slice %arg23[%c1_i32] : memref<2x!tpu.dma_semaphore, #tpu.memory_space<semaphore_mem>> -> memref<1x!tpu.dma_semaphore, #tpu.memory_space<semaphore_mem>>
    %3 = tpu.memref_squeeze %2 : memref<1x!tpu.dma_semaphore, #tpu.memory_space<semaphore_mem>> -> memref<!tpu.dma_semaphore, #tpu.memory_space<semaphore_mem>>
    tpu.enqueue_dma source(%arg19 : memref<1024x64xbf16, #tpu.memory_space<any>>) target(%arg22 : memref<1024x64xbf16, #tpu.memory_space<vmem>>) target_semaphore(%3 : memref<!tpu.dma_semaphore, #tpu.memory_space<semaphore_mem>>)
    %c0 = arith.constant 0 : index
    %c0_0 = arith.constant 0 : index
    %4 = vector.load %arg0[%c0, %c0_0] : memref<16x1xi32, #tpu.memory_space<vmem>>, vector<16x1xi32>
    %5 = tpu.iota {dimensions = array<i32: 1>} : vector<16x10xi32>
    %6 = vector.broadcast %4 : vector<16x1xi32> to vector<16x10xi32>
    %7 = arith.cmpi eq, %6, %5 : vector<16x10xi32>
    %8 = arith.extui %7 : vector<16x10xi1> to vector<16x10xi32>
    %9 = arith.sitofp %8 : vector<16x10xi32> to vector<16x10xf32>
    %10 = arith.truncf %9 : vector<16x10xf32> to vector<16x10xbf16>
    %c0_1 = arith.constant 0 : index
    %c0_2 = arith.constant 0 : index
    %11 = vector.load %arg2[%c0_1, %c0_2] : memref<10x10xbf16, #tpu.memory_space<vmem>>, vector<10x10xbf16>
    %cst = arith.constant dense<0.000000e+00> : vector<16x10xf32>
    %12 = tpu.matmul %10, %11, %cst {dimension_numbers = #tpu.dot_dimension_numbers<[1], [0], [0], [1], [0, 0, 1, 1], [], []>} : vector<16x10xbf16>, vector<10x10xbf16>, vector<16x10xf32> -> vector<16x10xf32>
    %c0_3 = arith.constant 0 : index
    %c0_4 = arith.constant 0 : index
    %13 = vector.load %arg1[%c0_3, %c0_4] : memref<16x16xf32, #tpu.memory_space<vmem>>, vector<16x16xf32>
    %14 = arith.truncf %13 : vector<16x16xf32> to vector<16x16xbf16>
    %15 = arith.truncf %12 : vector<16x10xf32> to vector<16x10xbf16>
    %c0_5 = arith.constant 0 : index
    %c0_6 = arith.constant 0 : index
    %16 = vector.load %arg3[%c0_5, %c0_6] : memref<10x128xbf16, #tpu.memory_space<vmem>>, vector<10x128xbf16>
    %cst_7 = arith.constant dense<0.000000e+00> : vector<16x128xf32>
    %17 = tpu.matmul %15, %16, %cst_7 {dimension_numbers = #tpu.dot_dimension_numbers<[1], [0], [0], [1], [0, 0, 1, 1], [], []>} : vector<16x10xbf16>, vector<10x128xbf16>, vector<16x128xf32> -> vector<16x128xf32>
    %c0_8 = arith.constant 0 : index
    %c0_9 = arith.constant 0 : index
    %18 = vector.load %arg4[%c0_8, %c0_9] : memref<16x128xbf16, #tpu.memory_space<vmem>>, vector<16x128xbf16>
    %cst_10 = arith.constant dense<0.000000e+00> : vector<16x128xf32>
    %19 = tpu.matmul %14, %18, %cst_10 {dimension_numbers = #tpu.dot_dimension_numbers<[1], [0], [0], [1], [0, 0, 1, 1], [], []>} : vector<16x16xbf16>, vector<16x128xbf16>, vector<16x128xf32> -> vector<16x128xf32>
    %20 = arith.addf %17, %19 : vector<16x128xf32>
    %c0_11 = arith.constant 0 : index
    %c0_12 = arith.constant 0 : index
    %21 = vector.load %arg5[%c0_11, %c0_12] : memref<1x128xf32, #tpu.memory_space<vmem>>, vector<1x128xf32>
    %22 = vector.broadcast %21 : vector<1x128xf32> to vector<16x128xf32>
    %23 = arith.addf %20, %22 : vector<16x128xf32>
    %cst_13 = arith.constant 0.000000e+00 : f32
    %24 = vector.broadcast %cst_13 : f32 to vector<16x128xf32>
    %25 = arith.cmpf ogt, %23, %24 : vector<16x128xf32>
    %cst_14 = arith.constant 2.000000e-01 : f32
    %26 = vector.broadcast %cst_14 : f32 to vector<16x128xf32>
    %27 = arith.mulf %26, %23 : vector<16x128xf32>
    %28 = arith.select %25, %23, %27 : vector<16x128xi1>, vector<16x128xf32>
    %29 = arith.truncf %28 : vector<16x128xf32> to vector<16x128xbf16>
    %c0_15 = arith.constant 0 : index
    %c0_16 = arith.constant 0 : index
    %30 = vector.load %arg6[%c0_15, %c0_16] : memref<128x256xbf16, #tpu.memory_space<vmem>>, vector<128x256xbf16>
    %cst_17 = arith.constant dense<0.000000e+00> : vector<16x256xf32>
    %31 = tpu.matmul %29, %30, %cst_17 {dimension_numbers = #tpu.dot_dimension_numbers<[1], [0], [0], [1], [0, 0, 1, 1], [], []>} : vector<16x128xbf16>, vector<128x256xbf16>, vector<16x256xf32> -> vector<16x256xf32>
    %c0_18 = arith.constant 0 : index
    %c0_19 = arith.constant 0 : index
    %32 = vector.load %arg7[%c0_18, %c0_19] : memref<1x256xf32, #tpu.memory_space<vmem>>, vector<1x256xf32>
    %33 = vector.broadcast %32 : vector<1x256xf32> to vector<16x256xf32>
    %34 = arith.addf %31, %33 : vector<16x256xf32>
    %c0_20 = arith.constant 0 : index
    %c0_21 = arith.constant 0 : index
    %35 = vector.load %arg8[%c0_20, %c0_21] : memref<1x256xf32, #tpu.memory_space<vmem>>, vector<1x256xf32>
    %c0_22 = arith.constant 0 : index
    %c0_23 = arith.constant 0 : index
    %36 = vector.load %arg9[%c0_22, %c0_23] : memref<1x256xf32, #tpu.memory_space<vmem>>, vector<1x256xf32>
    %cst_24 = arith.constant dense<0.000000e+00> : vector<256xf32>
    %37 = vector.multi_reduction <add>, %34, %cst_24 [0] : vector<16x256xf32> to vector<256xf32>
    %38 = vector.shape_cast %37 : vector<256xf32> to vector<1x256xf32>
    %cst_25 = arith.constant 1.600000e+01 : f32
    %39 = vector.broadcast %cst_25 : f32 to vector<1x256xf32>
    %40 = arith.divf %38, %39 : vector<1x256xf32>
    %41 = vector.broadcast %40 : vector<1x256xf32> to vector<16x256xf32>
    %42 = arith.subf %34, %41 : vector<16x256xf32>
    %43 = vector.broadcast %40 : vector<1x256xf32> to vector<16x256xf32>
    %44 = arith.subf %34, %43 : vector<16x256xf32>
    %45 = arith.mulf %42, %44 : vector<16x256xf32>
    %cst_26 = arith.constant dense<0.000000e+00> : vector<256xf32>
    %46 = vector.multi_reduction <add>, %45, %cst_26 [0] : vector<16x256xf32> to vector<256xf32>
    %47 = vector.shape_cast %46 : vector<256xf32> to vector<1x256xf32>
    %cst_27 = arith.constant 1.600000e+01 : f32
    %48 = vector.broadcast %cst_27 : f32 to vector<1x256xf32>
    %49 = arith.divf %47, %48 : vector<1x256xf32>
    %cst_28 = arith.constant 8.000000e-01 : f32
    %50 = vector.broadcast %cst_28 : f32 to vector<1x256xf32>
    %51 = arith.addf %49, %50 : vector<1x256xf32>
    %52 = math.rsqrt %51 : vector<1x256xf32>
    %53 = arith.mulf %35, %52 : vector<1x256xf32>
    %54 = arith.mulf %40, %53 : vector<1x256xf32>
    %55 = arith.subf %36, %54 : vector<1x256xf32>
    %56 = vector.broadcast %53 : vector<1x256xf32> to vector<16x256xf32>
    %57 = arith.mulf %34, %56 : vector<16x256xf32>
    %58 = vector.broadcast %55 : vector<1x256xf32> to vector<16x256xf32>
    %59 = arith.addf %57, %58 : vector<16x256xf32>
    %cst_29 = arith.constant 0.000000e+00 : f32
    %60 = vector.broadcast %cst_29 : f32 to vector<16x256xf32>
    %61 = arith.cmpf ogt, %59, %60 : vector<16x256xf32>
    %cst_30 = arith.constant 2.000000e-01 : f32
    %62 = vector.broadcast %cst_30 : f32 to vector<16x256xf32>
    %63 = arith.mulf %62, %59 : vector<16x256xf32>
    %64 = arith.select %61, %59, %63 : vector<16x256xi1>, vector<16x256xf32>
    %65 = arith.truncf %64 : vector<16x256xf32> to vector<16x256xbf16>
    %c0_31 = arith.constant 0 : index
    %c0_32 = arith.constant 0 : index
    %66 = vector.load %arg10[%c0_31, %c0_32] : memref<256x512xbf16, #tpu.memory_space<vmem>>, vector<256x512xbf16>
    %cst_33 = arith.constant dense<0.000000e+00> : vector<16x512xf32>
    %67 = tpu.matmul %65, %66, %cst_33 {dimension_numbers = #tpu.dot_dimension_numbers<[1], [0], [0], [1], [0, 0, 1, 1], [], []>} : vector<16x256xbf16>, vector<256x512xbf16>, vector<16x512xf32> -> vector<16x512xf32>
    %c0_34 = arith.constant 0 : index
    %c0_35 = arith.constant 0 : index
    %68 = vector.load %arg11[%c0_34, %c0_35] : memref<1x512xf32, #tpu.memory_space<vmem>>, vector<1x512xf32>
    %69 = vector.broadcast %68 : vector<1x512xf32> to vector<16x512xf32>
    %70 = arith.addf %67, %69 : vector<16x512xf32>
    %c0_36 = arith.constant 0 : index
    %c0_37 = arith.constant 0 : index
    %71 = vector.load %arg12[%c0_36, %c0_37] : memref<1x512xf32, #tpu.memory_space<vmem>>, vector<1x512xf32>
    %c0_38 = arith.constant 0 : index
    %c0_39 = arith.constant 0 : index
    %72 = vector.load %arg13[%c0_38, %c0_39] : memref<1x512xf32, #tpu.memory_space<vmem>>, vector<1x512xf32>
    %cst_40 = arith.constant dense<0.000000e+00> : vector<512xf32>
    %73 = vector.multi_reduction <add>, %70, %cst_40 [0] : vector<16x512xf32> to vector<512xf32>
    %74 = vector.shape_cast %73 : vector<512xf32> to vector<1x512xf32>
    %cst_41 = arith.constant 1.600000e+01 : f32
    %75 = vector.broadcast %cst_41 : f32 to vector<1x512xf32>
    %76 = arith.divf %74, %75 : vector<1x512xf32>
    %77 = vector.broadcast %76 : vector<1x512xf32> to vector<16x512xf32>
    %78 = arith.subf %70, %77 : vector<16x512xf32>
    %79 = vector.broadcast %76 : vector<1x512xf32> to vector<16x512xf32>
    %80 = arith.subf %70, %79 : vector<16x512xf32>
    %81 = arith.mulf %78, %80 : vector<16x512xf32>
    %cst_42 = arith.constant dense<0.000000e+00> : vector<512xf32>
    %82 = vector.multi_reduction <add>, %81, %cst_42 [0] : vector<16x512xf32> to vector<512xf32>
    %83 = vector.shape_cast %82 : vector<512xf32> to vector<1x512xf32>
    %cst_43 = arith.constant 1.600000e+01 : f32
    %84 = vector.broadcast %cst_43 : f32 to vector<1x512xf32>
    %85 = arith.divf %83, %84 : vector<1x512xf32>
    %cst_44 = arith.constant 8.000000e-01 : f32
    %86 = vector.broadcast %cst_44 : f32 to vector<1x512xf32>
    %87 = arith.addf %85, %86 : vector<1x512xf32>
    %88 = math.rsqrt %87 : vector<1x512xf32>
    %89 = arith.mulf %71, %88 : vector<1x512xf32>
    %90 = arith.mulf %76, %89 : vector<1x512xf32>
    %91 = arith.subf %72, %90 : vector<1x512xf32>
    %92 = vector.broadcast %89 : vector<1x512xf32> to vector<16x512xf32>
    %93 = arith.mulf %70, %92 : vector<16x512xf32>
    %94 = vector.broadcast %91 : vector<1x512xf32> to vector<16x512xf32>
    %95 = arith.addf %93, %94 : vector<16x512xf32>
    %cst_45 = arith.constant 0.000000e+00 : f32
    %96 = vector.broadcast %cst_45 : f32 to vector<16x512xf32>
    %97 = arith.cmpf ogt, %95, %96 : vector<16x512xf32>
    %cst_46 = arith.constant 2.000000e-01 : f32
    %98 = vector.broadcast %cst_46 : f32 to vector<16x512xf32>
    %99 = arith.mulf %98, %95 : vector<16x512xf32>
    %100 = arith.select %97, %95, %99 : vector<16x512xi1>, vector<16x512xf32>
    %101 = arith.truncf %100 : vector<16x512xf32> to vector<16x512xbf16>
    %c0_i32_47 = arith.constant 0 : i32
    %102 = tpu.memref_slice %arg23[%c0_i32_47] : memref<2x!tpu.dma_semaphore, #tpu.memory_space<semaphore_mem>> -> memref<1x!tpu.dma_semaphore, #tpu.memory_space<semaphore_mem>>
    %103 = tpu.memref_squeeze %102 : memref<1x!tpu.dma_semaphore, #tpu.memory_space<semaphore_mem>> -> memref<!tpu.dma_semaphore, #tpu.memory_space<semaphore_mem>>
    tpu.wait_dma2 semaphore(%103 : memref<!tpu.dma_semaphore, #tpu.memory_space<semaphore_mem>>) src(%arg18 : memref<512x1024xbf16, #tpu.memory_space<any>>) dst(%arg21 : memref<512x1024xbf16, #tpu.memory_space<vmem>>)
    %c0_48 = arith.constant 0 : index
    %c0_49 = arith.constant 0 : index
    %104 = vector.load %arg21[%c0_48, %c0_49] : memref<512x1024xbf16, #tpu.memory_space<vmem>>, vector<512x1024xbf16>
    %cst_50 = arith.constant dense<0.000000e+00> : vector<16x1024xf32>
    %105 = tpu.matmul %101, %104, %cst_50 {dimension_numbers = #tpu.dot_dimension_numbers<[1], [0], [0], [1], [0, 0, 1, 1], [], []>} : vector<16x512xbf16>, vector<512x1024xbf16>, vector<16x1024xf32> -> vector<16x1024xf32>
    %c0_51 = arith.constant 0 : index
    %c0_52 = arith.constant 0 : index
    %106 = vector.load %arg14[%c0_51, %c0_52] : memref<1x1024xf32, #tpu.memory_space<vmem>>, vector<1x1024xf32>
    %107 = vector.broadcast %106 : vector<1x1024xf32> to vector<16x1024xf32>
    %108 = arith.addf %105, %107 : vector<16x1024xf32>
    %c0_53 = arith.constant 0 : index
    %c0_54 = arith.constant 0 : index
    %109 = vector.load %arg15[%c0_53, %c0_54] : memref<1x1024xf32, #tpu.memory_space<vmem>>, vector<1x1024xf32>
    %c0_55 = arith.constant 0 : index
    %c0_56 = arith.constant 0 : index
    %110 = vector.load %arg16[%c0_55, %c0_56] : memref<1x1024xf32, #tpu.memory_space<vmem>>, vector<1x1024xf32>
    %cst_57 = arith.constant dense<0.000000e+00> : vector<1024xf32>
    %111 = vector.multi_reduction <add>, %108, %cst_57 [0] : vector<16x1024xf32> to vector<1024xf32>
    %112 = vector.shape_cast %111 : vector<1024xf32> to vector<1x1024xf32>
    %cst_58 = arith.constant 1.600000e+01 : f32
    %113 = vector.broadcast %cst_58 : f32 to vector<1x1024xf32>
    %114 = arith.divf %112, %113 : vector<1x1024xf32>
    %115 = vector.broadcast %114 : vector<1x1024xf32> to vector<16x1024xf32>
    %116 = arith.subf %108, %115 : vector<16x1024xf32>
    %117 = vector.broadcast %114 : vector<1x1024xf32> to vector<16x1024xf32>
    %118 = arith.subf %108, %117 : vector<16x1024xf32>
    %119 = arith.mulf %116, %118 : vector<16x1024xf32>
    %cst_59 = arith.constant dense<0.000000e+00> : vector<1024xf32>
    %120 = vector.multi_reduction <add>, %119, %cst_59 [0] : vector<16x1024xf32> to vector<1024xf32>
    %121 = vector.shape_cast %120 : vector<1024xf32> to vector<1x1024xf32>
    %cst_60 = arith.constant 1.600000e+01 : f32
    %122 = vector.broadcast %cst_60 : f32 to vector<1x1024xf32>
    %123 = arith.divf %121, %122 : vector<1x1024xf32>
    %cst_61 = arith.constant 8.000000e-01 : f32
    %124 = vector.broadcast %cst_61 : f32 to vector<1x1024xf32>
    %125 = arith.addf %123, %124 : vector<1x1024xf32>
    %126 = math.rsqrt %125 : vector<1x1024xf32>
    %127 = arith.mulf %109, %126 : vector<1x1024xf32>
    %128 = arith.mulf %114, %127 : vector<1x1024xf32>
    %129 = arith.subf %110, %128 : vector<1x1024xf32>
    %130 = vector.broadcast %127 : vector<1x1024xf32> to vector<16x1024xf32>
    %131 = arith.mulf %108, %130 : vector<16x1024xf32>
    %132 = vector.broadcast %129 : vector<1x1024xf32> to vector<16x1024xf32>
    %133 = arith.addf %131, %132 : vector<16x1024xf32>
    %cst_62 = arith.constant 0.000000e+00 : f32
    %134 = vector.broadcast %cst_62 : f32 to vector<16x1024xf32>
    %135 = arith.cmpf ogt, %133, %134 : vector<16x1024xf32>
    %cst_63 = arith.constant 2.000000e-01 : f32
    %136 = vector.broadcast %cst_63 : f32 to vector<16x1024xf32>
    %137 = arith.mulf %136, %133 : vector<16x1024xf32>
    %138 = arith.select %135, %133, %137 : vector<16x1024xi1>, vector<16x1024xf32>
    %139 = arith.truncf %138 : vector<16x1024xf32> to vector<16x1024xbf16>
    %c1_i32_64 = arith.constant 1 : i32
    %140 = tpu.memref_slice %arg23[%c1_i32_64] : memref<2x!tpu.dma_semaphore, #tpu.memory_space<semaphore_mem>> -> memref<1x!tpu.dma_semaphore, #tpu.memory_space<semaphore_mem>>
    %141 = tpu.memref_squeeze %140 : memref<1x!tpu.dma_semaphore, #tpu.memory_space<semaphore_mem>> -> memref<!tpu.dma_semaphore, #tpu.memory_space<semaphore_mem>>
    tpu.wait_dma2 semaphore(%141 : memref<!tpu.dma_semaphore, #tpu.memory_space<semaphore_mem>>) src(%arg19 : memref<1024x64xbf16, #tpu.memory_space<any>>) dst(%arg22 : memref<1024x64xbf16, #tpu.memory_space<vmem>>)
    %c0_65 = arith.constant 0 : index
    %c0_66 = arith.constant 0 : index
    %142 = vector.load %arg22[%c0_65, %c0_66] : memref<1024x64xbf16, #tpu.memory_space<vmem>>, vector<1024x64xbf16>
    %cst_67 = arith.constant dense<0.000000e+00> : vector<16x64xf32>
    %143 = tpu.matmul %139, %142, %cst_67 {dimension_numbers = #tpu.dot_dimension_numbers<[1], [0], [0], [1], [0, 0, 1, 1], [], []>} : vector<16x1024xbf16>, vector<1024x64xbf16>, vector<16x64xf32> -> vector<16x64xf32>
    %c0_68 = arith.constant 0 : index
    %c0_69 = arith.constant 0 : index
    %144 = vector.load %arg17[%c0_68, %c0_69] : memref<1x64xf32, #tpu.memory_space<vmem>>, vector<1x64xf32>
    %145 = vector.broadcast %144 : vector<1x64xf32> to vector<16x64xf32>
    %146 = arith.addf %143, %145 : vector<16x64xf32>
    %147 = math.tanh %146 : vector<16x64xf32>
    %c0_70 = arith.constant 0 : index
    %c0_71 = arith.constant 0 : index
    %148 = vector.load %arg20[%c0_70, %c0_71] : memref<16x64xf32, #tpu.memory_space<vmem>>, vector<16x64xf32>
    tpu.vector_store %arg20[%c0_70, %c0_71], %147 {strides = array<i32>} : memref<16x64xf32, #tpu.memory_space<vmem>>, vector<16x64xf32>,
    return
  }
}

</mosaic_0001>

<bundles_post_ra>
// kernel: generator_forward.1
= control target key start
LH: loop header
LB: loop body
LE: loop exit
PB: predicated region body
PF: predicated region fallthrough
CT: control target
= control target key end

     0   :  { %s4461_s0 = inlined_call_operand.vmem [shape: s32[16,1], index: 0, kind: input, shape index: {}]   ;;  %s4462_s1 = inlined_call_operand.vmem [shape: f32[16,16], index: 1, kind: input, shape index: {}]   ;;  %s4463_s2 = inlined_call_operand.vmem [shape: bf16[10,10], index: 2, kind: input, shape index: {}]   ;;  %s4464_s3 = inlined_call_operand.vmem [shape: bf16[10,128], index: 3, kind: input, shape index: {}]   ;;  %s4465_s4 = inlined_call_operand.vmem [shape: bf16[16,128], index: 4, kind: input, shape index: {}]   ;;  %s4466_s5 = inlined_call_operand.vmem [shape: f32[1,128], index: 5, kind: input, shape index: {}]   ;;  %s4467_s6 = inlined_call_operand.vmem [shape: bf16[128,256], index: 6, kind: input, shape index: {}]   ;;  %s4468_s7 = inlined_call_operand.vmem [shape: f32[1,256], index: 7, kind: input, shape index: {}]   ;;  %s4469_s8 = inlined_call_operand.vmem [shape: f32[1,256], index: 8, kind: input, shape index: {}]   ;;  %s4470_s9 = inlined_call_operand.vmem [shape: f32[1,256], index: 9, kind: input, shape index: {}]   ;;  %s4471_s10 = inlined_call_operand.vmem [shape: bf16[256,512], index: 10, kind: input, shape index: {}]   ;;  %s4472_s11 = inlined_call_operand.vmem [shape: f32[1,512], index: 11, kind: input, shape index: {}]   ;;  %s4473_s12 = inlined_call_operand.vmem [shape: f32[1,512], index: 12, kind: input, shape index: {}]   ;;  %s4474_s13 = inlined_call_operand.vmem [shape: f32[1,512], index: 13, kind: input, shape index: {}]   ;;  %s4475_s14 = inlined_call_operand.vmem [shape: f32[1,1024], index: 14, kind: input, shape index: {}]   ;;  %s4476_s15 = inlined_call_operand.vmem [shape: f32[1,1024], index: 15, kind: input, shape index: {}]   ;;  %s4477_s16 = inlined_call_operand.vmem [shape: f32[1,1024], index: 16, kind: input, shape index: {}]   ;;  %s4478_s17 = inlined_call_operand.vmem [shape: f32[1,64], index: 17, kind: input, shape index: {}]   ;;  %s4479_s18 = inlined_call_operand.hbm [shape: bf16[512,1024], index: 18, kind: input, shape index: {}]   ;;  %s4480_s19 = inlined_call_operand.vmem [shape: bf16[1024,64], index: 19, kind: input, shape index: {}]   ;;  %s4481_s20 = inlined_call_operand.vmem [shape: f32[16,64], index: 20, kind: output, shape index: {}]  }
   0x1   :  { %4488 = sst [smem:[#allocation77_spill]] %s4461_s0 }
   0x2   :  { %4489 = sst [smem:[#allocation78_spill]] %s4462_s1 }
   0x3   :  { %4490 = sst [smem:[#allocation79_spill]] %s4463_s2 }
   0x4   :  { %4491 = sst [smem:[#allocation80_spill]] %s4464_s3 }
   0x5   :  { %4492 = sst [smem:[#allocation81_spill]] %s4465_s4 }
   0x6   :  { %s66_s1 = sld [smem:[#allocation0]]   ;;  %s3281_s22 = smov [#allocation2]  }
   0x7   :  { %s74_s23 = sshll.u32 %s3281_s22, 4  ;;  %s3282_s24 = smov 1024   ;;  %s75_s23 = int_to_ptr.vmem [resolvable:$true] %s74_s23 }
   0x8   :  { %78 = sst [smem:[#allocation6]] %s3282_s24  ;;  %s3283_s2 = smov 8  }
   0x9   :  { %80 = sst [smem:[#allocation6 + $0x1]] %s3282_s24  ;;  %s3284_s25 = smov 64  }
   0xa   :  { %82 = sst [smem:[#allocation6 + $0x2]] %s3283_s2  ;;  %s3285_s26 = smov 128  }
   0xb   :  { %84 = sst [smem:[#allocation6 + $0x3]] %s3284_s25  ;;  %s3286_s28 = smov 2  }
   0xc   :  { %s2869_s3 = sshll.u32 %s66_s1, 26  ;;  %86 = sst [smem:[#allocation6 + $0x4]] %s3285_s26 }
   0xd   :  { %s2870_s27 = sadd.s32 134217728, %s2869_s3  ;;  %88 = sst [smem:[#allocation6 + $0x5]] %s3286_s28 }
   0xe   :  { %s3287_s4 = smov 512   ;;  %92 = sst [smem:[#allocation6 + $0x7]] %s3284_s25 }
   0xf   :  { %90 = sst [smem:[#allocation6 + $0x6]] %s3287_s4  ;;  %s3288_s29 = smov 4  }
  0x10   :  { %94 = sst [smem:[#allocation6 + $0x8]] %s3288_s29  ;;  %s3289_s30 = smov [#allocation4]  }
  0x11   :  { %s3290_s0 = smov [#allocation5]  }
  0x12   :  { %96 = dma.general %s4479_s18, 32768, %s75_s23, %s3289_s30, %s3290_s0, [#allocation6], %s2870_s27, 0  }
  0x13   :  { %v3406_v0 = vld [vmem:[%s4480_s19] sm:$0xff]  ;;  %v3411_v1 = vld [vmem:[%s4480_s19 + $0x8] sm:$0xff]  ;;  %v3416_v2 = vld [vmem:[%s4480_s19 + $0x10] sm:$0xff]  ;;  %s4557_s1 = sld [smem:[#allocation77_spill]] }
  0x14   :  { %4493 = vst [vmem:[#allocation10_spill] sm:$0xff] %v3406_v0  ;;  %4494 = vst [vmem:[#allocation11_spill] sm:$0xff] %v3411_v1  ;;  %v3421_v3 = vld [vmem:[%s4480_s19 + $0x18] sm:$0xff]  ;;  %v3426_v4 = vld [vmem:[%s4480_s19 + $0x20] sm:$0xff] }
  0x15   :  { %4495 = vst [vmem:[#allocation12_spill] sm:$0xff] %v3416_v2  ;;  %4496 = vst [vmem:[#allocation13_spill] sm:$0xff] %v3421_v3  ;;  %v3431_v5 = vld [vmem:[%s4480_s19 + $0x28] sm:$0xff]  ;;  %v3436_v6 = vld [vmem:[%s4480_s19 + $0x30] sm:$0xff] }
  0x16   :  { %4497 = vst [vmem:[#allocation14_spill] sm:$0xff] %v3426_v4  ;;  %4498 = vst [vmem:[#allocation15_spill] sm:$0xff] %v3431_v5  ;;  %v3441_v7 = vld [vmem:[%s4480_s19 + $0x38] sm:$0xff]  ;;  %v3446_v8 = vld [vmem:[%s4480_s19 + $0x40] sm:$0xff] }
  0x17   :  { %4499 = vst [vmem:[#allocation16_spill] sm:$0xff] %v3436_v6  ;;  %4500 = vst [vmem:[#allocation17_spill] sm:$0xff] %v3441_v7  ;;  %v3451_v9 = vld [vmem:[%s4480_s19 + $0x48] sm:$0xff]  ;;  %v3456_v10 = vld [vmem:[%s4480_s19 + $0x50] sm:$0xff] }
  0x18   :  { %4501 = vst [vmem:[#allocation18_spill] sm:$0xff] %v3446_v8  ;;  %4502 = vst [vmem:[#allocation19_spill] sm:$0xff] %v3451_v9  ;;  %v3461_v11 = vld [vmem:[%s4480_s19 + $0x58] sm:$0xff]  ;;  %v3466_v12 = vld [vmem:[%s4480_s19 + $0x60] sm:$0xff] }
  0x19   :  { %4503 = vst [vmem:[#allocation20_spill] sm:$0xff] %v3456_v10  ;;  %4504 = vst [vmem:[#allocation21_spill] sm:$0xff] %v3461_v11  ;;  %v3471_v13 = vld [vmem:[%s4480_s19 + $0x68] sm:$0xff]  ;;  %v3476_v14 = vld [vmem:[%s4480_s19 + $0x70] sm:$0xff] }
  0x1a   :  { %4505 = vst [vmem:[#allocation22_spill] sm:$0xff] %v3466_v12  ;;  %4506 = vst [vmem:[#allocation23_spill] sm:$0xff] %v3471_v13  ;;  %v3481_v15 = vld [vmem:[%s4480_s19 + $0x78] sm:$0xff]  ;;  %v3486_v16 = vld [vmem:[%s4480_s19 + $0x80] sm:$0xff] }
  0x1b   :  { %4507 = vst [vmem:[#allocation24_spill] sm:$0xff] %v3476_v14  ;;  %4508 = vst [vmem:[#allocation25_spill] sm:$0xff] %v3481_v15  ;;  %v3491_v17 = vld [vmem:[%s4480_s19 + $0x88] sm:$0xff]  ;;  %v3496_v18 = vld [vmem:[%s4480_s19 + $0x90] sm:$0xff] }
  0x1c   :  { %4509 = vst [vmem:[#allocation26_spill] sm:$0xff] %v3486_v16  ;;  %4510 = vst [vmem:[#allocation27_spill] sm:$0xff] %v3491_v17  ;;  %v3501_v19 = vld [vmem:[%s4480_s19 + $0x98] sm:$0xff]  ;;  %v3506_v20 = vld [vmem:[%s4480_s19 + $0xa0] sm:$0xff] }
  0x1d   :  { %4511 = vst [vmem:[#allocation28_spill] sm:$0xff] %v3496_v18  ;;  %4512 = vst [vmem:[#allocation29_spill] sm:$0xff] %v3501_v19  ;;  %v3511_v21 = vld [vmem:[%s4480_s19 + $0xa8] sm:$0xff]  ;;  %v3516_v22 = vld [vmem:[%s4480_s19 + $0xb0] sm:$0xff] }
  0x1e   :  { %4513 = vst [vmem:[#allocation30_spill] sm:$0xff] %v3506_v20  ;;  %4514 = vst [vmem:[#allocation31_spill] sm:$0xff] %v3511_v21  ;;  %v3521_v23 = vld [vmem:[%s4480_s19 + $0xb8] sm:$0xff]  ;;  %v3526_v24 = vld [vmem:[%s4480_s19 + $0xc0] sm:$0xff] }
  0x1f   :  { %4515 = vst [vmem:[#allocation32_spill] sm:$0xff] %v3516_v22  ;;  %4516 = vst [vmem:[#allocation33_spill] sm:$0xff] %v3521_v23  ;;  %v3531_v25 = vld [vmem:[%s4480_s19 + $0xc8] sm:$0xff]  ;;  %v3536_v26 = vld [vmem:[%s4480_s19 + $0xd0] sm:$0xff] }
  0x20   :  { %4517 = vst [vmem:[#allocation34_spill] sm:$0xff] %v3526_v24  ;;  %4518 = vst [vmem:[#allocation35_spill] sm:$0xff] %v3531_v25  ;;  %v3541_v27 = vld [vmem:[%s4480_s19 + $0xd8] sm:$0xff]  ;;  %v3546_v28 = vld [vmem:[%s4480_s19 + $0xe0] sm:$0xff] }
  0x21   :  { %4519 = vst [vmem:[#allocation36_spill] sm:$0xff] %v3536_v26  ;;  %4520 = vst [vmem:[#allocation37_spill] sm:$0xff] %v3541_v27  ;;  %v3551_v29 = vld [vmem:[%s4480_s19 + $0xe8] sm:$0xff]  ;;  %v3556_v30 = vld [vmem:[%s4480_s19 + $0xf0] sm:$0xff] }
  0x22   :  { %4521 = vst [vmem:[#allocation38_spill] sm:$0xff] %v3546_v28  ;;  %4522 = vst [vmem:[#allocation39_spill] sm:$0xff] %v3551_v29  ;;  %v3561_v31 = vld [vmem:[%s4480_s19 + $0xf8] sm:$0xff]  ;;  %v3566_v32 = vld [vmem:[%s4480_s19 + $0x100] sm:$0xff] }
  0x23   :  { %4523 = vst [vmem:[#allocation40_spill] sm:$0xff] %v3556_v30  ;;  %4524 = vst [vmem:[#allocation41_spill] sm:$0xff] %v3561_v31  ;;  %v3571_v33 = vld [vmem:[%s4480_s19 + $0x108] sm:$0xff]  ;;  %v3576_v34 = vld [vmem:[%s4480_s19 + $0x110] sm:$0xff] }
  0x24   :  { %4525 = vst [vmem:[#allocation42_spill] sm:$0xff] %v3566_v32  ;;  %4526 = vst [vmem:[#allocation43_spill] sm:$0xff] %v3571_v33  ;;  %v3581_v35 = vld [vmem:[%s4480_s19 + $0x118] sm:$0xff]  ;;  %v3586_v36 = vld [vmem:[%s4480_s19 + $0x120] sm:$0xff] }
  0x25   :  { %4527 = vst [vmem:[#allocation44_spill] sm:$0xff] %v3576_v34  ;;  %4528 = vst [vmem:[#allocation45_spill] sm:$0xff] %v3581_v35  ;;  %v3591_v37 = vld [vmem:[%s4480_s19 + $0x128] sm:$0xff]  ;;  %v3596_v38 = vld [vmem:[%s4480_s19 + $0x130] sm:$0xff] }
  0x26   :  { %4529 = vst [vmem:[#allocation46_spill] sm:$0xff] %v3586_v36  ;;  %4530 = vst [vmem:[#allocation47_spill] sm:$0xff] %v3591_v37  ;;  %v3601_v39 = vld [vmem:[%s4480_s19 + $0x138] sm:$0xff]  ;;  %v3606_v40 = vld [vmem:[%s4480_s19 + $0x140] sm:$0xff] }
  0x27   :  { %4531 = vst [vmem:[#allocation48_spill] sm:$0xff] %v3596_v38  ;;  %4532 = vst [vmem:[#allocation49_spill] sm:$0xff] %v3601_v39  ;;  %v3611_v41 = vld [vmem:[%s4480_s19 + $0x148] sm:$0xff]  ;;  %v3616_v42 = vld [vmem:[%s4480_s19 + $0x150] sm:$0xff]  ;;  %v3291_v39 = vmov 0  }
  0x28   :  { %4533 = vst [vmem:[#allocation50_spill] sm:$0xff] %v3606_v40  ;;  %4534 = vst [vmem:[#allocation51_spill] sm:$0xff] %v3611_v41  ;;  %v3621_v43 = vld [vmem:[%s4480_s19 + $0x158] sm:$0xff]  ;;  %v3626_v44 = vld [vmem:[%s4480_s19 + $0x160] sm:$0xff]  ;;  %3121 = vset.pattern.permute.xlu0 %v3291_v39 }
  0x29   :  { %4535 = vst [vmem:[#allocation52_spill] sm:$0xff] %v3616_v42  ;;  %4536 = vst [vmem:[#allocation53_spill] sm:$0xff] %v3621_v43  ;;  %v3631_v45 = vld [vmem:[%s4480_s19 + $0x168] sm:$0xff]  ;;  %v3636_v46 = vld [vmem:[%s4480_s19 + $0x170] sm:$0xff] }
  0x2a   :  { %4537 = vst [vmem:[#allocation54_spill] sm:$0xff] %v3626_v44  ;;  %4538 = vst [vmem:[#allocation55_spill] sm:$0xff] %v3631_v45  ;;  %v3641_v47 = vld [vmem:[%s4480_s19 + $0x178] sm:$0xff]  ;;  %v3646_v48 = vld [vmem:[%s4480_s19 + $0x180] sm:$0xff] }
  0x2b   :  { %4539 = vst [vmem:[#allocation56_spill] sm:$0xff] %v3636_v46  ;;  %4540 = vst [vmem:[#allocation57_spill] sm:$0xff] %v3641_v47  ;;  %v3651_v49 = vld [vmem:[%s4480_s19 + $0x188] sm:$0xff]  ;;  %v3656_v50 = vld [vmem:[%s4480_s19 + $0x190] sm:$0xff] }
  0x2c   :  { %4541 = vst [vmem:[#allocation58_spill] sm:$0xff] %v3646_v48  ;;  %4542 = vst [vmem:[#allocation59_spill] sm:$0xff] %v3651_v49  ;;  %v3661_v51 = vld [vmem:[%s4480_s19 + $0x198] sm:$0xff]  ;;  %v3666_v52 = vld [vmem:[%s4480_s19 + $0x1a0] sm:$0xff] }
  0x2d   :  { %4543 = vst [vmem:[#allocation60_spill] sm:$0xff] %v3656_v50  ;;  %4544 = vst [vmem:[#allocation61_spill] sm:$0xff] %v3661_v51  ;;  %v3671_v53 = vld [vmem:[%s4480_s19 + $0x1a8] sm:$0xff]  ;;  %v3676_v54 = vld [vmem:[%s4480_s19 + $0x1b0] sm:$0xff] }
  0x2e   :  { %4545 = vst [vmem:[#allocation62_spill] sm:$0xff] %v3666_v52  ;;  %4546 = vst [vmem:[#allocation63_spill] sm:$0xff] %v3671_v53  ;;  %v3681_v55 = vld [vmem:[%s4480_s19 + $0x1b8] sm:$0xff]  ;;  %v3686_v56 = vld [vmem:[%s4480_s19 + $0x1c0] sm:$0xff] }
  0x2f   :  { %4547 = vst [vmem:[#allocation64_spill] sm:$0xff] %v3676_v54  ;;  %4548 = vst [vmem:[#allocation65_spill] sm:$0xff] %v3681_v55  ;;  %v3691_v57 = vld [vmem:[%s4480_s19 + $0x1c8] sm:$0xff]  ;;  %v3696_v58 = vld [vmem:[%s4480_s19 + $0x1d0] sm:$0xff] }
  0x30   :  { %4549 = vst [vmem:[#allocation66_spill] sm:$0xff] %v3686_v56  ;;  %4550 = vst [vmem:[#allocation67_spill] sm:$0xff] %v3691_v57  ;;  %v3701_v59 = vld [vmem:[%s4480_s19 + $0x1d8] sm:$0xff]  ;;  %v3706_v60 = vld [vmem:[%s4480_s19 + $0x1e0] sm:$0xff] }
  0x31   :  { %4551 = vst [vmem:[#allocation68_spill] sm:$0xff] %v3696_v58  ;;  %4552 = vst [vmem:[#allocation69_spill] sm:$0xff] %v3701_v59  ;;  %v3711_v61 = vld [vmem:[%s4480_s19 + $0x1e8] sm:$0xff]  ;;  %v3716_v62 = vld [vmem:[%s4480_s19 + $0x1f0] sm:$0xff] }
  0x32   :  { %4553 = vst [vmem:[#allocation70_spill] sm:$0xff] %v3706_v60  ;;  %4554 = vst [vmem:[#allocation71_spill] sm:$0xff] %v3711_v61  ;;  %v3721_v63 = vld [vmem:[%s4480_s19 + $0x1f8] sm:$0xff]  ;;  %v266_v55 = vld [vmem:[%s4557_s1] sm:$0xff] }
  0x33   :  { %4555 = vst [vmem:[#allocation72_spill] sm:$0xff] %v3716_v62  ;;  %4556 = vst [vmem:[#allocation73_spill] sm:$0xff] %v3721_v63 }
  0x34   :  { %265 = vsyncadd [#allocation4 + $0x1], 8192  ;;  %v3292_v47 = vmov 0.0   ;;  %271 = vperm.xlu0 %3121, %v266_v55   ;;  %v267_v54 = vld [vmem:[%s4557_s1 + $0x8] sm:$0xff]  ;;  %606 = vmatprep.mubr.bf16.mxu1 %v3291_v39  ;;  %s4558_s4 = sld [smem:[#allocation79_spill]]  ;;  %vm294_vm0 = vcmask 1044480   ;;  %v4484_v62 = vlaneseq }
  0x35   :  { %3057 = vmatprep.subr.bf16.mxu0 %v3292_v47  ;;  %vm3293_vm1 = vmmov 0   ;;  %vm290_vm4 = vcmask 80896   ;;  %s4559_s23 = sld [smem:[#allocation81_spill]]  ;;  %s4560_s30 = sld [smem:[#allocation78_spill]]  ;;  %vm353_vm5 = vcmask 130048  }
  0x36   :  { %3059 = vmatprep.mubr.msk.bf16.mxu0 %vm3293_vm1, %v3292_v47  ;;  %v269_v55 = vand.u32 127, %v4484_v62  ;;  %s4561_s2 = sld [smem:[#allocation80_spill]] }
  0x38   :  { %274 = vperm.xlu0 %3121, %v267_v54  }
  0x3a   :  { %v3122_v38 = vld [vmem:[%s4558_s4] sm:$0x1f]  }
  0x3b   :  { %v296_v63 = vsel %vm294_vm0, %v3122_v38, 0  ;;  %v3124_v54 = vld [vmem:[%s4559_s23] sm:$0xff]  }
  0x3c   :  { %3058 = vmatpush3.bf16.msra.mxu0 %v296_v63  ;;  %v339_v63 = vld [vmem:[%s4560_s30] sm:$0xff] }
  0x3d   :  { %3063 = vmatprep.subr.bf16.mxu0 %v3292_v47 }
  0xb3   :  { %v272_v46 = vpop.permute.xlu0 %271 }
  0xb4   :  { %vm276_vm2 = vcmp.eq.s32.totalorder %v272_v46, %v269_v55  ;;  %v340_v46 = vld [vmem:[%s4560_s30 + $0x8] sm:$0xff] }
  0xb5   :  { %v2871_v39 = vsel %vm276_vm2, 1.0, %v3292_v47 }
  0xb7   :  { %v275_v53 = vpop.permute.xlu0 %274 }
  0xb8   :  { %vm277_vm3 = vcmp.eq.s32.totalorder %v275_v53, %v269_v55  ;;  %v3123_v53 = vld [vmem:[%s4561_s2] sm:$0x1f]   ;;  %v341_v55 = vpack.c.bf16 %v340_v46, %v339_v63  ;;  %v3130_v63 = vld [vmem:[%s4467_s6 + $0x10] ss:$8 sps:$4 sm:$0xff]  }
  0xb9   :  { %v2872_v37 = vsel %vm277_vm3, 1.0, %v3292_v47  ;;  %v3133_v46 = vld [vmem:[%s4467_s6 + $0x20] ss:$8 sps:$4 sm:$0xff]  }
  0xba   :  { %v282_v38 = vpack.c.bf16 %v2872_v37, %v2871_v39  ;;  %v407_v37 = vsel %vm294_vm0, %v3123_v53, 0  ;;  %v3125_v39 = vld [vmem:[%s4467_s6 + $0x4] ss:$8 sps:$4 sm:$0xff]   ;;  %v3134_v53 = vld [vmem:[%s4467_s6 + $0x34] ss:$8 sps:$4 sm:$0xff]  }
  0xbb   :  { %574 = vmatprep.subr.bf16.mxu1 %v3125_v39  ;;  %v3139_v39 = vld [vmem:[%s4467_s6 + $0x40] ss:$8 sps:$4 sm:$0xff]  }
  0xbc   :  { %3060 = vmatmul.mubr.msk.bf16.vlgmr.msra.gmra.mrb[0].mxu0 %vm290_vm4, %v282_v38  ;;  %v3128_v38 = vld [vmem:[%s4467_s6 + $0x14] ss:$8 sps:$4 sm:$0xff]  }
  0xbd   :  { %3064 = vmatpush3.bf16.msra.mxu0 %v3124_v54  ;;  %3065 = vmatprep.mubr.msk.bf16.mxu0 %vm3293_vm1, %v3292_v47  ;;  %v3127_v54 = vld [vmem:[%s4467_s6] ss:$8 sps:$4 sm:$0xff]  }
  0xbe   :  { %3069 = vmatprep.subr.bf16.mxu0 %v3292_v47  ;;  %575 = vmatpush1.bf16.msra.mxu1 %v3127_v54 }
  0xbf   :  { %576 = vmatprep.subr.bf16.mxu1 %v3128_v38 }
  0xc2   :  { %577 = vmatpush1.bf16.msra.mxu1 %v3130_v63 }
  0xc4   :  { %3066 = vmatmul.mubr.msk.bf16.vlgmr.msra.gmra.mrb[4].mxu0 %vm353_vm5, %v341_v55  ;;  %v3136_v55 = vld [vmem:[%s4467_s6 + $0x30] ss:$8 sps:$4 sm:$0xff]  }
  0xc5   :  { %3070 = vmatpush3.bf16.msra.mxu0 %v407_v37  ;;  %3071 = vmatprep.mubr.msk.bf16.mxu0 %vm3293_vm1, %v3292_v47  ;;  %v3131_v47 = vld [vmem:[%s4467_s6 + $0x24] ss:$8 sps:$4 sm:$0xff]  }
  0xc6   :  { %578 = vmatprep.subr.bf16.mxu1 %v3131_v47  ;;  %v3137_v37 = vld [vmem:[%s4467_s6 + $0x44] ss:$8 sps:$4 sm:$0xff]  }
  0xc7   :  { %579 = vmatpush1.bf16.msra.mxu1 %v3133_v46 }
  0xc8   :  { %580 = vmatprep.subr.bf16.mxu1 %v3134_v53 }
  0xcb   :  { %581 = vmatpush1.bf16.msra.mxu1 %v3136_v55  ;;  %v3140_v55 = vld [vmem:[%s4467_s6 + $0x54] ss:$8 sps:$4 sm:$0xff]  }
  0xcc   :  { %582 = vmatprep.subr.bf16.mxu1 %v3137_v37  ;;  %v3142_v37 = vld [vmem:[%s4467_s6 + $0x50] ss:$8 sps:$4 sm:$0xff]  }
  0xcf   :  { %583 = vmatpush1.bf16.msra.mxu1 %v3139_v39  ;;  %v3143_v39 = vld [vmem:[%s4467_s6 + $0x64] ss:$8 sps:$4 sm:$0xff]  }
  0xd0   :  { %584 = vmatprep.subr.bf16.mxu1 %v3140_v55 }
  0xd3   :  { %585 = vmatpush1.bf16.msra.mxu1 %v3142_v37 }
  0xd4   :  { %586 = vmatprep.subr.bf16.mxu1 %v3143_v39 }
 0x18f   :  { %v332_v54 = vpop.f32.mrb[0].mxu0 }
 0x190   :  { %v3061_v38 = vpop.f32.mrb[1].mxu0 }
 0x191   :  { %v335_v63 = vpop.f32.mrb[2].mxu0  ;;  %v3148_v38 = vld [vmem:[%s4467_s6 + $0x70] ss:$8 sps:$4 sm:$0xff]  }
 0x192   :  { %v342_v47 = vpack.c.bf16 %v335_v63, %v332_v54  ;;  %v3062_v46 = vpop.f32.mrb[3].mxu0  ;;  %v3145_v54 = vld [vmem:[%s4467_s6 + $0x60] ss:$8 sps:$4 sm:$0xff]  }
 0x193   :  { %587 = vmatpush1.bf16.msra.mxu1 %v3145_v54 }
 0x194   :  { %3072 = vmatmul.mubr.msk.bf16.vlgmr.msra.gmra.mrb[8].mxu0 %vm290_vm4, %v342_v47  ;;  %v2879_v47 = vld [vmem:[%s4466_s5] ss:$0 sm:$0xff] }
 0x197   :  { %v391_v62 = vpop.f32.mrb[4].mxu0 }
 0x198   :  { %v3067_v53 = vpop.f32.mrb[5].mxu0 }
 0x199   :  { %v394_v61 = vpop.f32.mrb[6].mxu0 }
 0x19a   :  { %v3068_v45 = vpop.f32.mrb[7].mxu0 }
 0x19b   :  { %v3146_v45 = vld [vmem:[%s4467_s6 + $0x74] ss:$8 sps:$4 sm:$0xff]  }
 0x19c   :  { %588 = vmatprep.subr.bf16.mxu1 %v3146_v45 }
 0x19d   :  { %589 = vmatpush1.bf16.msra.mxu1 %v3148_v38  ;;  %v3151_v38 = vld [vmem:[%s4471_s10 + $0x4] ss:$16 sps:$4 sm:$0xff]  }
 0x19e   :  { %1154 = vmatprep.subr.bf16.mxu0 %v3151_v38  ;;  %v3178_v38 = vld [vmem:[%s4471_s10 + $0x8c] ss:$16 sps:$4 sm:$0xff]  }
 0x267   :  { %v443_v63 = vpop.f32.mrb[8].mxu0 }
 0x268   :  { %v444_v46 = vadd.f32 %v443_v63, %v391_v62  ;;  %v3073_v53 = vpop.f32.mrb[9].mxu0  ;;  %v3154_v62 = vld [vmem:[%s4471_s10 + $0xc] ss:$16 sps:$4 sm:$0xff]   ;;  %v3152_v63 = vld [vmem:[%s4471_s10 + $0x8] ss:$16 sps:$4 sm:$0xff]  }
 0x269   :  { %v446_v55 = vpop.f32.mrb[10].mxu0  ;;  %1197 = vmatprep.subr.bf16.mxu1 %v3154_v62  ;;  %v3164_v53 = vld [vmem:[%s4471_s10 + $0x48] ss:$16 sps:$4 sm:$0xff]   ;;  %v3173_v62 = vld [vmem:[%s4471_s10 + $0x80] ss:$16 sps:$4 sm:$0xff]  }
 0x26a   :  { %v457_v37 = vadd.f32 %v2879_v47, %v444_v46  ;;  %v447_v39 = vadd.f32 %v446_v55, %v394_v61  ;;  %v3074_v54 = vpop.f32.mrb[11].mxu0  ;;  %v3149_v61 = vld [vmem:[%s4471_s10] ss:$16 sps:$4 sm:$0xff]   ;;  %v3169_v55 = vld [vmem:[%s4471_s10 + $0x64] ss:$16 sps:$4 sm:$0xff]  }
 0x26b   :  { %1155 = vmatpush1.bf16.msra.mxu0 %v3149_v61  ;;  %v3161_v46 = vld [vmem:[%s4471_s10 + $0x40] ss:$16 sps:$4 sm:$0xff]   ;;  %v3170_v54 = vld [vmem:[%s4471_s10 + $0x68] ss:$16 sps:$4 sm:$0xff]  }
 0x26c   :  { %v461_v52 = vmul.f32 0.2, %v457_v37  ;;  %v458_v36 = vadd.f32 %v2879_v47, %v447_v39  ;;  %vm459_vm6 = vcmp.gt.f32.partialorder %v457_v37, 0.0  ;;  %v3166_v47 = vld [vmem:[%s4471_s10 + $0x4c] ss:$16 sps:$4 sm:$0xff]  }
 0x26d   :  { %v3167_v39 = vld [vmem:[%s4471_s10 + $0x60] ss:$16 sps:$4 sm:$0xff]   ;;  %v3176_v61 = vld [vmem:[%s4471_s10 + $0x88] ss:$16 sps:$4 sm:$0xff]  }
 0x26e   :  { %vm460_vm7 = vcmp.gt.f32.partialorder %v458_v36, 0.0  ;;  %v462_v60 = vmul.f32 0.2, %v458_v36  ;;  %v463_v44 = vsel %vm459_vm6, %v457_v37, %v461_v52  ;;  %v3158_v52 = vld [vmem:[%s4471_s10 + $0x28] ss:$16 sps:$4 sm:$0xff]  }
 0x26f   :  { %v3172_v37 = vld [vmem:[%s4471_s10 + $0x6c] ss:$16 sps:$4 sm:$0xff]  }
 0x270   :  { %v464_v51 = vsel %vm460_vm7, %v458_v36, %v462_v60  ;;  %v3157_v36 = vld [vmem:[%s4471_s10 + $0x24] ss:$16 sps:$4 sm:$0xff]  }
 0x271   :  { %v465_v45 = vpack.c.bf16 %v464_v51, %v463_v44  ;;  %v3160_v44 = vld [vmem:[%s4471_s10 + $0x2c] ss:$16 sps:$4 sm:$0xff]   ;;  %v3155_v51 = vld [vmem:[%s4471_s10 + $0x20] ss:$16 sps:$4 sm:$0xff]   ;;  %1156 = vmatprep.subr.bf16.mxu0 %v3157_v36  ;;  %v3163_v60 = vld [vmem:[%s4471_s10 + $0x44] ss:$16 sps:$4 sm:$0xff]  }
 0x272   :  { %1157 = vmatpush1.bf16.msra.mxu0 %v3155_v51  ;;  %v3184_v36 = vld [vmem:[%s4471_s10 + $0xac] ss:$16 sps:$4 sm:$0xff]   ;;  %v3182_v51 = vld [vmem:[%s4471_s10 + $0xa8] ss:$16 sps:$4 sm:$0xff]  }
 0x273   :  { %607 = vmatmul.mubr.bf16.vlgmr.msra.gmra.mrb[0].mxu1 %v465_v45  ;;  %1158 = vmatprep.subr.bf16.mxu0 %v3163_v60  ;;  %v3175_v45 = vld [vmem:[%s4471_s10 + $0x84] ss:$16 sps:$4 sm:$0xff]   ;;  %v3185_v60 = vld [vmem:[%s4471_s10 + $0xc0] ss:$16 sps:$4 sm:$0xff]  }
 0x274   :  { %1198 = vmatpush1.bf16.msra.mxu1 %v3152_v63  ;;  %v3181_v63 = vld [vmem:[%s4471_s10 + $0xa4] ss:$16 sps:$4 sm:$0xff]  }
 0x275   :  { %1199 = vmatprep.subr.bf16.mxu1 %v3160_v44  ;;  %v3179_v44 = vld [vmem:[%s4471_s10 + $0xa0] ss:$16 sps:$4 sm:$0xff]  }
 0x276   :  { %1159 = vmatpush1.bf16.msra.mxu0 %v3161_v46  ;;  %v3190_v46 = vld [vmem:[%s4471_s10 + $0xcc] ss:$16 sps:$4 sm:$0xff]  }
 0x277   :  { %1160 = vmatprep.subr.bf16.mxu0 %v3169_v55  ;;  %v3196_v55 = vld [vmem:[%s4471_s10 + $0xec] ss:$16 sps:$4 sm:$0xff]  }
 0x278   :  { %1200 = vmatpush1.bf16.msra.mxu1 %v3158_v52  ;;  %v3187_v52 = vld [vmem:[%s4471_s10 + $0xc4] ss:$16 sps:$4 sm:$0xff]  }
 0x279   :  { %1201 = vmatprep.subr.bf16.mxu1 %v3166_v47  ;;  %v3188_v47 = vld [vmem:[%s4471_s10 + $0xc8] ss:$16 sps:$4 sm:$0xff]  }
 0x27a   :  { %1161 = vmatpush1.bf16.msra.mxu0 %v3167_v39  ;;  %v3194_v39 = vld [vmem:[%s4471_s10 + $0xe8] ss:$16 sps:$4 sm:$0xff]  }
 0x27b   :  { %1162 = vmatprep.subr.bf16.mxu0 %v3175_v45  ;;  %v3202_v45 = vld [vmem:[%s4471_s10 + $0x10c] ss:$16 sps:$4 sm:$0xff]  }
 0x27c   :  { %1202 = vmatpush1.bf16.msra.mxu1 %v3164_v53  ;;  %v3193_v53 = vld [vmem:[%s4471_s10 + $0xe4] ss:$16 sps:$4 sm:$0xff]  }
 0x27d   :  { %1203 = vmatprep.subr.bf16.mxu1 %v3172_v37  ;;  %v3191_v37 = vld [vmem:[%s4471_s10 + $0xe0] ss:$16 sps:$4 sm:$0xff]  }
 0x27e   :  { %1163 = vmatpush1.bf16.msra.mxu0 %v3173_v62  ;;  %v3200_v62 = vld [vmem:[%s4471_s10 + $0x108] ss:$16 sps:$4 sm:$0xff]  }
 0x27f   :  { %1164 = vmatprep.subr.bf16.mxu0 %v3181_v63  ;;  %v3208_v63 = vld [vmem:[%s4471_s10 + $0x12c] ss:$16 sps:$4 sm:$0xff]  }
 0x280   :  { %1204 = vmatpush1.bf16.msra.mxu1 %v3170_v54  ;;  %v3199_v54 = vld [vmem:[%s4471_s10 + $0x104] ss:$16 sps:$4 sm:$0xff]  }
 0x281   :  { %1205 = vmatprep.subr.bf16.mxu1 %v3178_v38  ;;  %v3197_v38 = vld [vmem:[%s4471_s10 + $0x100] ss:$16 sps:$4 sm:$0xff]  }
 0x282   :  { %1165 = vmatpush1.bf16.msra.mxu0 %v3179_v44  ;;  %v3206_v44 = vld [vmem:[%s4471_s10 + $0x128] ss:$16 sps:$4 sm:$0xff]  }
 0x283   :  { %1166 = vmatprep.subr.bf16.mxu0 %v3187_v52  ;;  %v3214_v52 = vld [vmem:[%s4471_s10 + $0x14c] ss:$16 sps:$4 sm:$0xff]  }
 0x284   :  { %1206 = vmatpush1.bf16.msra.mxu1 %v3176_v61  ;;  %v3205_v61 = vld [vmem:[%s4471_s10 + $0x124] ss:$16 sps:$4 sm:$0xff]  }
 0x285   :  { %1207 = vmatprep.subr.bf16.mxu1 %v3184_v36  ;;  %v3203_v36 = vld [vmem:[%s4471_s10 + $0x120] ss:$16 sps:$4 sm:$0xff]  }
 0x286   :  { %1167 = vmatpush1.bf16.msra.mxu0 %v3185_v60  ;;  %v3209_v60 = vld [vmem:[%s4471_s10 + $0x140] ss:$16 sps:$4 sm:$0xff]  }
 0x287   :  { %1168 = vmatprep.subr.bf16.mxu0 %v3193_v53  ;;  %v3220_v53 = vld [vmem:[%s4471_s10 + $0x16c] ss:$16 sps:$4 sm:$0xff]  }
 0x288   :  { %1208 = vmatpush1.bf16.msra.mxu1 %v3182_v51  ;;  %v3211_v51 = vld [vmem:[%s4471_s10 + $0x144] ss:$16 sps:$4 sm:$0xff]  }
 0x289   :  { %1209 = vmatprep.subr.bf16.mxu1 %v3190_v46  ;;  %v3217_v46 = vld [vmem:[%s4471_s10 + $0x164] ss:$16 sps:$4 sm:$0xff]  }
 0x28a   :  { %1169 = vmatpush1.bf16.msra.mxu0 %v3191_v37  ;;  %v3218_v37 = vld [vmem:[%s4471_s10 + $0x168] ss:$16 sps:$4 sm:$0xff]  }
 0x28b   :  { %1170 = vmatprep.subr.bf16.mxu0 %v3199_v54  ;;  %v3226_v54 = vld [vmem:[%s4471_s10 + $0x18c] ss:$16 sps:$4 sm:$0xff]  }
 0x28c   :  { %1210 = vmatpush1.bf16.msra.mxu1 %v3188_v47  ;;  %v3212_v47 = vld [vmem:[%s4471_s10 + $0x148] ss:$16 sps:$4 sm:$0xff]  }
 0x28d   :  { %1211 = vmatprep.subr.bf16.mxu1 %v3196_v55  ;;  %v3215_v55 = vld [vmem:[%s4471_s10 + $0x160] ss:$16 sps:$4 sm:$0xff]  }
 0x28e   :  { %1171 = vmatpush1.bf16.msra.mxu0 %v3197_v38  ;;  %v3224_v38 = vld [vmem:[%s4471_s10 + $0x188] ss:$16 sps:$4 sm:$0xff]  }
 0x28f   :  { %1172 = vmatprep.subr.bf16.mxu0 %v3205_v61  ;;  %v3232_v61 = vld [vmem:[%s4471_s10 + $0x1ac] ss:$16 sps:$4 sm:$0xff]  }
 0x290   :  { %1212 = vmatpush1.bf16.msra.mxu1 %v3194_v39  ;;  %v3223_v39 = vld [vmem:[%s4471_s10 + $0x184] ss:$16 sps:$4 sm:$0xff]  }
 0x291   :  { %1213 = vmatprep.subr.bf16.mxu1 %v3202_v45  ;;  %v3221_v45 = vld [vmem:[%s4471_s10 + $0x180] ss:$16 sps:$4 sm:$0xff]  }
 0x292   :  { %1173 = vmatpush1.bf16.msra.mxu0 %v3203_v36  ;;  %v3230_v36 = vld [vmem:[%s4471_s10 + $0x1a8] ss:$16 sps:$4 sm:$0xff]  }
 0x293   :  { %1174 = vmatprep.subr.bf16.mxu0 %v3211_v51  ;;  %v3238_v51 = vld [vmem:[%s4471_s10 + $0x1cc] ss:$16 sps:$4 sm:$0xff]  }
 0x294   :  { %1214 = vmatpush1.bf16.msra.mxu1 %v3200_v62  ;;  %v3229_v62 = vld [vmem:[%s4471_s10 + $0x1a4] ss:$16 sps:$4 sm:$0xff]  }
 0x295   :  { %1215 = vmatprep.subr.bf16.mxu1 %v3208_v63  ;;  %v3227_v63 = vld [vmem:[%s4471_s10 + $0x1a0] ss:$16 sps:$4 sm:$0xff]  }
 0x296   :  { %1175 = vmatpush1.bf16.msra.mxu0 %v3209_v60  ;;  %v3236_v60 = vld [vmem:[%s4471_s10 + $0x1c8] ss:$16 sps:$4 sm:$0xff]  }
 0x297   :  { %1176 = vmatprep.subr.bf16.mxu0 %v3217_v46  ;;  %v3239_v46 = vld [vmem:[%s4471_s10 + $0x1e0] ss:$16 sps:$4 sm:$0xff]  }
 0x298   :  { %1216 = vmatpush1.bf16.msra.mxu1 %v3206_v44  ;;  %v3235_v44 = vld [vmem:[%s4471_s10 + $0x1c4] ss:$16 sps:$4 sm:$0xff]  }
 0x299   :  { %1217 = vmatprep.subr.bf16.mxu1 %v3214_v52  ;;  %v3233_v52 = vld [vmem:[%s4471_s10 + $0x1c0] ss:$16 sps:$4 sm:$0xff]  }
 0x29a   :  { %1177 = vmatpush1.bf16.msra.mxu0 %v3215_v55  ;;  %v3242_v55 = vld [vmem:[%s4471_s10 + $0x1e8] ss:$16 sps:$4 sm:$0xff]  }
 0x29b   :  { %1178 = vmatprep.subr.bf16.mxu0 %v3223_v39 }
 0x29c   :  { %1218 = vmatpush1.bf16.msra.mxu1 %v3212_v47  ;;  %v3241_v47 = vld [vmem:[%s4471_s10 + $0x1e4] ss:$16 sps:$4 sm:$0xff]  }
 0x29d   :  { %1219 = vmatprep.subr.bf16.mxu1 %v3220_v53  ;;  %v3244_v53 = vld [vmem:[%s4471_s10 + $0x1ec] ss:$16 sps:$4 sm:$0xff]  }
 0x29e   :  { %1179 = vmatpush1.bf16.msra.mxu0 %v3221_v45 }
 0x29f   :  { %1180 = vmatprep.subr.bf16.mxu0 %v3229_v62 }
 0x2a0   :  { %1220 = vmatpush1.bf16.msra.mxu1 %v3218_v37  ;;  %v4562_v37 = vlaneseq }
 0x2a1   :  { %1221 = vmatprep.subr.bf16.mxu1 %v3226_v54 }
 0x2a2   :  { %1181 = vmatpush1.bf16.msra.mxu0 %v3227_v63  ;;  %v3996_v39 = vshrl.u32 %v4562_v37, 7 }
 0x2a3   :  { %1182 = vmatprep.subr.bf16.mxu0 %v3235_v44 }
 0x2a4   :  { %1222 = vmatpush1.bf16.msra.mxu1 %v3224_v38  ;;  %v3999_v54 = vsub.s32 0, %v3996_v39  ;;  %v4002_v45 = vsub.s32 1, %v3996_v39  ;;  %v482_v38 = vld [vmem:[%s4468_s7] sm:$0x3] }
 0x2a5   :  { %1223 = vmatprep.subr.bf16.mxu1 %v3232_v61 }
 0x2a6   :  { %1183 = vmatpush1.bf16.msra.mxu0 %v3233_v52  ;;  %v487_v62 = vrot.slane %v482_v38, %v3999_v54  ;;  %v491_v63 = vrot.slane %v482_v38, %v4002_v45 }
 0x2a7   :  { %1184 = vmatprep.subr.bf16.mxu0 %v3241_v47 }
 0x2a8   :  { %1224 = vmatpush1.bf16.msra.mxu1 %v3230_v36 }
 0x2a9   :  { %1225 = vmatprep.subr.bf16.mxu1 %v3238_v51 }
 0x2aa   :  { %1185 = vmatpush1.bf16.msra.mxu0 %v3239_v46 }
 0x2ac   :  { %1226 = vmatpush1.bf16.msra.mxu1 %v3236_v60 }
 0x2ad   :  { %1227 = vmatprep.subr.bf16.mxu1 %v3244_v53 }
 0x2b0   :  { %1228 = vmatpush1.bf16.msra.mxu1 %v3242_v55 }
 0x346   :  { %v608_v61 = vpop.f32.mrb[0].mxu1 }
 0x347   :  { %v610_v36 = vpop.f32.mrb[1].mxu1  ;;  %v4009_v51 = vadd.f32 %v608_v61, %v487_v62 }
 0x348   :  { %v612_v44 = vpop.f32.mrb[2].mxu1  ;;  %v611_v47 = vadd.f32 %v610_v36, %v491_v63 }
 0x349   :  { %v4011_v52 = vadd.f32 %v612_v44, %v487_v62  ;;  %v614_v60 = vpop.f32.mrb[3].mxu1 }
 0x34a   :  { %v615_v46 = vadd.f32 %v614_v60, %v491_v63 }
 0x34b   :  { %v619_v53 = vadd.f32 %v4011_v52, %v4009_v51 }
 0x34c   :  { %v626_v55 = vadd.f32 %v615_v46, %v611_v47 }
 0x34d   :  { %v620_v37 = vrot.slane %v619_v53, 4 }
 0x34e   :  { %v627_v35 = vrot.slane %v626_v55, 4 }
 0x34f   :  { %v621_v59 = vadd.f32 %v620_v37, %v619_v53 }
 0x350   :  { %v628_v43 = vadd.f32 %v627_v35, %v626_v55 }
 0x351   :  { %v622_v50 = vrot.slane %v621_v59, 2 }
 0x352   :  { %v629_v34 = vrot.slane %v628_v43, 2 }
 0x353   :  { %v623_v38 = vadd.f32 %v622_v50, %v621_v59 }
 0x354   :  { %v630_v58 = vadd.f32 %v629_v34, %v628_v43 }
 0x355   :  { %v624_v42 = vrot.slane %v623_v38, 1 }
 0x356   :  { %v631_v61 = vrot.slane %v630_v58, 1 }
 0x357   :  { %v625_v49 = vadd.f32 %v624_v42, %v623_v38 }
 0x358   :  { %v632_v62 = vadd.f32 %v631_v61, %v630_v58 }
 0x359   :  { %v634_v44 = vmul.f32 0.0625, %v625_v49 }
 0x35a   :  { %v635_v33 = vmul.f32 0.0625, %v632_v62 }
 0x35b   :  { %v636_v63 = vsub.f32 %v4009_v51, %v634_v44  ;;  %v638_v36 = vsub.f32 %v4011_v52, %v634_v44 }
 0x35c   :  { %v637_v60 = vsub.f32 %v611_v47, %v635_v33  ;;  %v639_v57 = vsub.f32 %v615_v46, %v635_v33 }
 0x35d   :  { %v640_v41 = vmul.f32 %v636_v63, %v636_v63  ;;  %v642_v48 = vmul.f32 %v638_v36, %v638_v36 }
 0x35e   :  { %v641_v53 = vmul.f32 %v637_v60, %v637_v60  ;;  %v643_v35 = vmul.f32 %v639_v57, %v639_v57 }
 0x35f   :  { %v644_v55 = vadd.f32 %v642_v48, %v640_v41  ;;  %v3294_v41 = vmov 1966171168  }
 0x360   :  { %v651_v37 = vadd.f32 %v643_v35, %v641_v53  ;;  %v668_v48 = vunpack.c.l.s4 %v3294_v41 }
 0x361   :  { %v645_v50 = vrot.slane %v644_v55, 4 }
 0x362   :  { %v652_v34 = vrot.slane %v651_v37, 4  ;;  %v669_v57 = vunpack.c.0.s8 %v668_v48 }
 0x363   :  { %v646_v43 = vadd.f32 %v645_v50, %v644_v55 }
 0x364   :  { %v653_v59 = vadd.f32 %v652_v34, %v651_v37  ;;  %v4018_v53 = vsub.s32 %v669_v57, %v3996_v39 }
 0x365   :  { %v647_v42 = vrot.slane %v646_v43, 2 }
 0x366   :  { %v654_v58 = vrot.slane %v653_v59, 2 }
 0x367   :  { %v648_v49 = vadd.f32 %v647_v42, %v646_v43 }
 0x368   :  { %v655_v38 = vadd.f32 %v654_v58, %v653_v59 }
 0x369   :  { %v649_v61 = vrot.slane %v648_v49, 1 }
 0x36a   :  { %v656_v62 = vrot.slane %v655_v38, 1 }
 0x36b   :  { %v650_v32 = vadd.f32 %v649_v61, %v648_v49 }
 0x36c   :  { %v657_v56 = vadd.f32 %v656_v62, %v655_v38  ;;  %v618_v62 = vld [vmem:[%s4470_s9] sm:$0x3] }
 0x36d   :  { %v658_v40 = vmul.f32 0.0625, %v650_v32  ;;  %v617_v32 = vld [vmem:[%s4469_s8] sm:$0x3] }
 0x36e   :  { %v659_v23 = vmul.f32 0.0625, %v657_v56 }
 0x36f   :  { %v660_v63 = vadd.f32 0.8, %v658_v40 }
 0x370   :  { %v661_v36 = vadd.f32 0.8, %v659_v23 }
 0x371   :  { %3245 = vrsqrt.f32 %v660_v63 }
 0x372   :  { %3247 = vrsqrt.f32 %v661_v36 }
 0x37b   :  { %v3246_v60 = vpop.eup %3245 }
 0x37c   :  { %v3248_v35 = vpop.eup %3247 }
 0x37d   :  { %v666_v55 = vcombine.low %v3246_v60, %v3248_v35 }
 0x37f   :  { %v673_v37 = vrot.slane %v666_v55, %v4018_v53 }
 0x381   :  { %v680_v40 = vrot.slane %v673_v37, %v4018_v53 }
 0x383   :  { %v682_v23 = vmul.f32 %v680_v40, %v617_v32 }
 0x385   :  { %v687_v56 = vrot.slane %v682_v23, %v3999_v54  ;;  %v691_v50 = vrot.slane %v682_v23, %v4002_v45 }
 0x387   :  { %v694_v34 = vmul.f32 %v687_v56, %v634_v44  ;;  %v695_v43 = vmul.f32 %v691_v50, %v635_v33  ;;  %v718_v59 = vmul.f32 %v691_v50, %v615_v46  ;;  %v716_v42 = vmul.f32 %v691_v50, %v611_v47  ;;  %v812_v50 = vld [vmem:[%s4472_s11] sm:$0xf] }
 0x388   :  { %v715_v58 = vmul.f32 %v687_v56, %v4009_v51  ;;  %v717_v49 = vmul.f32 %v687_v56, %v4011_v52  ;;  %v4037_v56 = vsub.s32 2, %v3996_v39 }
 0x389   :  { %v698_v38 = vcombine.low %v694_v34, %v695_v43  ;;  %v4043_v34 = vsub.s32 3, %v3996_v39  ;;  %v817_v43 = vrot.slane %v812_v50, %v3999_v54 }
 0x38b   :  { %v705_v61 = vrot.slane %v698_v38, %v4018_v53  ;;  %v829_v38 = vrot.slane %v812_v50, %v4043_v34 }
 0x38d   :  { %v712_v63 = vrot.slane %v705_v61, %v4018_v53 }
 0x38f   :  { %v714_v36 = vsub.f32 %v618_v62, %v712_v63 }
 0x391   :  { %v723_v41 = vrot.slane %v714_v36, %v3999_v54  ;;  %v727_v33 = vrot.slane %v714_v36, %v4002_v45 }
 0x393   :  { %v733_v46 = vadd.f32 %v727_v33, %v718_v59  ;;  %v731_v47 = vadd.f32 %v727_v33, %v716_v42  ;;  %v730_v44 = vadd.f32 %v723_v41, %v715_v58  ;;  %v732_v51 = vadd.f32 %v723_v41, %v717_v49 }
 0x394   :  { %v825_v59 = vrot.slane %v812_v50, %v4037_v56  ;;  %v821_v49 = vrot.slane %v812_v50, %v4002_v45 }
 0x395   :  { %vm735_vm8 = vcmp.gt.f32.partialorder %v731_v47, 0.0  ;;  %vm737_vm9 = vcmp.gt.f32.partialorder %v733_v46, 0.0  ;;  %v739_v52 = vmul.f32 0.2, %v731_v47  ;;  %v741_v48 = vmul.f32 0.2, %v733_v46 }
 0x396   :  { %vm734_vm10 = vcmp.gt.f32.partialorder %v730_v44, 0.0  ;;  %vm736_vm11 = vcmp.gt.f32.partialorder %v732_v51, 0.0  ;;  %v738_v57 = vmul.f32 0.2, %v730_v44  ;;  %v740_v60 = vmul.f32 0.2, %v732_v51 }
 0x397   :  { %v743_v35 = vsel %vm735_vm8, %v731_v47, %v739_v52  ;;  %v745_v55 = vsel %vm737_vm9, %v733_v46, %v741_v48 }
 0x398   :  { %v747_v37 = vpack.c.bf16 %v745_v55, %v743_v35  ;;  %v742_v32 = vsel %vm734_vm10, %v730_v44, %v738_v57  ;;  %v744_v40 = vsel %vm736_vm11, %v732_v51, %v740_v60 }
 0x399   :  { %v746_v23 = vpack.c.bf16 %v744_v40, %v742_v32 }
 0x39a   :  { %1186 = vmatprep.mubr.bf16.mxu0 %v747_v37  ;;  %1229 = vmatprep.mubr.bf16.mxu1 %v747_v37 }
 0x39b   :  { %1187 = vmatmul.mubr.bf16.vlgmr.msra.gmra.mrb[12].mxu0 %v746_v23  ;;  %1230 = vmatmul.mubr.bf16.vlgmr.msra.gmra.mrb[4].mxu1 %v746_v23 }
 0x46e   :  { %v1188_v42 = vpop.f32.mrb[12].mxu0  ;;  %v1231_v58 = vpop.f32.mrb[4].mxu1 }
 0x46f   :  { %v1190_v61 = vpop.f32.mrb[13].mxu0  ;;  %v1233_v62 = vpop.f32.mrb[5].mxu1  ;;  %v4049_v41 = vadd.f32 %v1188_v42, %v817_v43  ;;  %v4051_v33 = vadd.f32 %v1231_v58, %v825_v59 }
 0x470   :  { %v1192_v63 = vpop.f32.mrb[14].mxu0  ;;  %v1235_v36 = vpop.f32.mrb[6].mxu1  ;;  %v4057_v52 = vadd.f32 %v1190_v61, %v821_v49  ;;  %v4059_v48 = vadd.f32 %v1233_v62, %v829_v38 }
 0x471   :  { %v4053_v46 = vadd.f32 %v1192_v63, %v817_v43  ;;  %v4055_v47 = vadd.f32 %v1235_v36, %v825_v59  ;;  %v1194_v44 = vpop.f32.mrb[15].mxu0  ;;  %v1237_v51 = vpop.f32.mrb[7].mxu1 }
 0x472   :  { %v4061_v57 = vadd.f32 %v1194_v44, %v821_v49  ;;  %v4063_v60 = vadd.f32 %v1237_v51, %v829_v38 }
 0x473   :  { %v1242_v35 = vadd.f32 %v4053_v46, %v4049_v41  ;;  %v1256_v55 = vadd.f32 %v4055_v47, %v4051_v33 }
 0x474   :  { %v1249_v37 = vadd.f32 %v4061_v57, %v4057_v52  ;;  %v1263_v32 = vadd.f32 %v4063_v60, %v4059_v48 }
 0x475   :  { %v1243_v40 = vrot.slane %v1242_v35, 4  ;;  %v1257_v23 = vrot.slane %v1256_v55, 4 }
 0x476   :  { %v1250_v50 = vrot.slane %v1249_v37, 4  ;;  %v1264_v43 = vrot.slane %v1263_v32, 4 }
 0x477   :  { %v1244_v59 = vadd.f32 %v1243_v40, %v1242_v35  ;;  %v1258_v42 = vadd.f32 %v1257_v23, %v1256_v55 }
 0x478   :  { %v1251_v58 = vadd.f32 %v1250_v50, %v1249_v37  ;;  %v1265_v49 = vadd.f32 %v1264_v43, %v1263_v32 }
 0x479   :  { %v1245_v38 = vrot.slane %v1244_v59, 2  ;;  %v1259_v61 = vrot.slane %v1258_v42, 2 }
 0x47a   :  { %v1252_v62 = vrot.slane %v1251_v58, 2  ;;  %v1266_v63 = vrot.slane %v1265_v49, 2 }
 0x47b   :  { %v1246_v36 = vadd.f32 %v1245_v38, %v1244_v59  ;;  %v1260_v44 = vadd.f32 %v1259_v61, %v1258_v42 }
 0x47c   :  { %v1253_v51 = vadd.f32 %v1252_v62, %v1251_v58  ;;  %v1267_v7 = vadd.f32 %v1266_v63, %v1265_v49 }
 0x47d   :  { %v1247_v31 = vrot.slane %v1246_v36, 1  ;;  %v1261_v15 = vrot.slane %v1260_v44, 1 }
 0x47e   :  { %v1254_v22 = vrot.slane %v1253_v51, 1  ;;  %v1268_v6 = vrot.slane %v1267_v7, 1 }
 0x47f   :  { %v1248_v30 = vadd.f32 %v1247_v31, %v1246_v36  ;;  %v1262_v14 = vadd.f32 %v1261_v15, %v1260_v44 }
 0x480   :  { %v1255_v21 = vadd.f32 %v1254_v22, %v1253_v51  ;;  %v1269_v5 = vadd.f32 %v1268_v6, %v1267_v7 }
 0x481   :  { %v4073_v35 = vmul.f32 0.0625, %v1248_v30  ;;  %v4075_v55 = vmul.f32 0.0625, %v1262_v14 }
 0x482   :  { %v4077_v37 = vmul.f32 0.0625, %v1255_v21  ;;  %v4079_v32 = vmul.f32 0.0625, %v1269_v5 }
 0x483   :  { %v1274_v40 = vsub.f32 %v4049_v41, %v4073_v35  ;;  %v1278_v23 = vsub.f32 %v4053_v46, %v4073_v35  ;;  %v1276_v31 = vsub.f32 %v4051_v33, %v4075_v55  ;;  %v1280_v6 = vsub.f32 %v4055_v47, %v4075_v55 }
 0x484   :  { %v1275_v7 = vsub.f32 %v4057_v52, %v4077_v37  ;;  %v1279_v14 = vsub.f32 %v4061_v57, %v4077_v37  ;;  %v1277_v5 = vsub.f32 %v4059_v48, %v4079_v32  ;;  %v1281_v15 = vsub.f32 %v4063_v60, %v4079_v32 }
 0x485   :  { %v1282_v21 = vmul.f32 %v1274_v40, %v1274_v40  ;;  %v1286_v22 = vmul.f32 %v1278_v23, %v1278_v23  ;;  %v1284_v30 = vmul.f32 %v1276_v31, %v1276_v31  ;;  %v1288_v50 = vmul.f32 %v1280_v6, %v1280_v6 }
 0x486   :  { %v1283_v43 = vmul.f32 %v1275_v7, %v1275_v7  ;;  %v1287_v59 = vmul.f32 %v1279_v14, %v1279_v14  ;;  %v1285_v42 = vmul.f32 %v1277_v5, %v1277_v5  ;;  %v1289_v58 = vmul.f32 %v1281_v15, %v1281_v15 }
 0x487   :  { %v1290_v49 = vadd.f32 %v1286_v22, %v1282_v21  ;;  %v1304_v38 = vadd.f32 %v1288_v50, %v1284_v30 }
 0x488   :  { %v1297_v61 = vadd.f32 %v1287_v59, %v1283_v43  ;;  %v1311_v62 = vadd.f32 %v1289_v58, %v1285_v42 }
 0x489   :  { %v1291_v63 = vrot.slane %v1290_v49, 4  ;;  %v1305_v36 = vrot.slane %v1304_v38, 4 }
 0x48a   :  { %v1298_v44 = vrot.slane %v1297_v61, 4  ;;  %v1312_v51 = vrot.slane %v1311_v62, 4 }
 0x48b   :  { %v1292_v29 = vadd.f32 %v1291_v63, %v1290_v49  ;;  %v1306_v13 = vadd.f32 %v1305_v36, %v1304_v38 }
 0x48c   :  { %v1299_v20 = vadd.f32 %v1298_v44, %v1297_v61  ;;  %v1313_v4 = vadd.f32 %v1312_v51, %v1311_v62 }
 0x48d   :  { %v1293_v40 = vrot.slane %v1292_v29, 2  ;;  %v1307_v23 = vrot.slane %v1306_v13, 2 }
 0x48e   :  { %v1300_v31 = vrot.slane %v1299_v20, 2  ;;  %v1314_v6 = vrot.slane %v1313_v4, 2 }
 0x48f   :  { %v1294_v7 = vadd.f32 %v1293_v40, %v1292_v29  ;;  %v1308_v14 = vadd.f32 %v1307_v23, %v1306_v13 }
 0x490   :  { %v1301_v5 = vadd.f32 %v1300_v31, %v1299_v20  ;;  %v1315_v15 = vadd.f32 %v1314_v6, %v1313_v4 }
 0x491   :  { %v1295_v21 = vrot.slane %v1294_v7, 1  ;;  %v1309_v22 = vrot.slane %v1308_v14, 1 }
 0x492   :  { %v1302_v30 = vrot.slane %v1301_v5, 1  ;;  %v1316_v50 = vrot.slane %v1315_v15, 1 }
 0x493   :  { %v1296_v43 = vadd.f32 %v1295_v21, %v1294_v7  ;;  %v1310_v59 = vadd.f32 %v1309_v22, %v1308_v14  ;;  %v1240_v14 = vld [vmem:[%s4473_s12] sm:$0xf] }
 0x494   :  { %v1303_v42 = vadd.f32 %v1302_v30, %v1301_v5  ;;  %v1317_v58 = vadd.f32 %v1316_v50, %v1315_v15 }
 0x495   :  { %v1318_v49 = vmul.f32 0.0625, %v1296_v43  ;;  %v1320_v38 = vmul.f32 0.0625, %v1310_v59 }
 0x496   :  { %v1319_v61 = vmul.f32 0.0625, %v1303_v42  ;;  %v1321_v62 = vmul.f32 0.0625, %v1317_v58 }
 0x497   :  { %v1322_v63 = vadd.f32 0.8, %v1318_v49  ;;  %v1324_v36 = vadd.f32 0.8, %v1320_v38 }
 0x498   :  { %v1323_v44 = vadd.f32 0.8, %v1319_v61  ;;  %v1325_v51 = vadd.f32 0.8, %v1321_v62 }
 0x499   :  { %3249 = vrsqrt.f32 %v1322_v63 }
 0x49a   :  { %3251 = vrsqrt.f32 %v1324_v36 }
 0x49b   :  { %3253 = vrsqrt.f32 %v1323_v44 }
 0x49c   :  { %3255 = vrsqrt.f32 %v1325_v51 }
 0x4a3   :  { %v3250_v4 = vpop.eup %3249 }
 0x4a4   :  { %v3252_v13 = vpop.eup %3251 }
 0x4a5   :  { %v3254_v20 = vpop.eup %3253 }
 0x4a6   :  { %v3256_v29 = vpop.eup %3255  ;;  %v1334_v40 = vcombine.low %v3250_v4, %v3254_v20 }
 0x4a7   :  { %v1335_v23 = vcombine.low %v3252_v13, %v3256_v29 }
 0x4a8   :  { %v1342_v31 = vrot.slane %v1334_v40, %v4018_v53 }
 0x4a9   :  { %v1349_v6 = vrot.slane %v1335_v23, %v4018_v53 }
 0x4ab   :  { %v1350_v7 = vcombine.low %v1342_v31, %v1349_v6 }
 0x4ad   :  { %v1357_v5 = vrot.slane %v1350_v7, %v4018_v53 }
 0x4af   :  { %v1359_v15 = vmul.f32 %v1357_v5, %v1240_v14 }
 0x4b1   :  { %v1364_v21 = vrot.slane %v1359_v15, %v3999_v54  ;;  %v1368_v22 = vrot.slane %v1359_v15, %v4002_v45  ;;  %v1372_v30 = vrot.slane %v1359_v15, %v4037_v56  ;;  %v1376_v50 = vrot.slane %v1359_v15, %v4043_v34 }
 0x4b3   :  { %v1381_v43 = vmul.f32 %v1364_v21, %v4073_v35  ;;  %v1382_v59 = vmul.f32 %v1368_v22, %v4077_v37  ;;  %v1383_v42 = vmul.f32 %v1372_v30, %v4075_v55  ;;  %v1384_v58 = vmul.f32 %v1376_v50, %v4079_v32  ;;  %v1241_v35 = vld [vmem:[%s4474_s13] sm:$0xf] }
 0x4b4   :  { %v1416_v49 = vmul.f32 %v1368_v22, %v4057_v52  ;;  %v1418_v38 = vmul.f32 %v1376_v50, %v4059_v48  ;;  %v1415_v32 = vmul.f32 %v1364_v21, %v4049_v41  ;;  %v1417_v52 = vmul.f32 %v1372_v30, %v4051_v33 }
 0x4b5   :  { %v1389_v61 = vcombine.low %v1381_v43, %v1382_v59  ;;  %v1390_v62 = vcombine.low %v1383_v42, %v1384_v58  ;;  %v1419_v20 = vmul.f32 %v1364_v21, %v4053_v46  ;;  %v1420_v29 = vmul.f32 %v1368_v22, %v4061_v57 }
 0x4b6   :  { %v1421_v40 = vmul.f32 %v1372_v30, %v4055_v47  ;;  %v1422_v23 = vmul.f32 %v1376_v50, %v4063_v60 }
 0x4b7   :  { %v1397_v63 = vrot.slane %v1389_v61, %v4018_v53  ;;  %v1404_v36 = vrot.slane %v1390_v62, %v4018_v53 }
 0x4b9   :  { %v1405_v44 = vcombine.low %v1397_v63, %v1404_v36 }
 0x4bb   :  { %v1412_v37 = vrot.slane %v1405_v44, %v4018_v53 }
 0x4bd   :  { %v1414_v55 = vsub.f32 %v1241_v35, %v1412_v37 }
 0x4bf   :  { %v1427_v48 = vrot.slane %v1414_v55, %v3999_v54  ;;  %v1431_v51 = vrot.slane %v1414_v55, %v4002_v45  ;;  %v1435_v4 = vrot.slane %v1414_v55, %v4037_v56  ;;  %v1439_v13 = vrot.slane %v1414_v55, %v4043_v34 }
 0x4c1   :  { %v1444_v31 = vadd.f32 %v1427_v48, %v1415_v32  ;;  %v1445_v41 = vadd.f32 %v1431_v51, %v1416_v49  ;;  %v1446_v6 = vadd.f32 %v1435_v4, %v1417_v52  ;;  %v1447_v33 = vadd.f32 %v1439_v13, %v1418_v38 }
 0x4c2   :  { %v1448_v7 = vadd.f32 %v1427_v48, %v1419_v20  ;;  %v1449_v14 = vadd.f32 %v1431_v51, %v1420_v29  ;;  %v1450_v5 = vadd.f32 %v1435_v4, %v1421_v40  ;;  %v1451_v15 = vadd.f32 %v1439_v13, %v1422_v23 }
 0x4c3   :  { %vm1452_vm12 = vcmp.gt.f32.partialorder %v1444_v31, 0.0  ;;  %vm1453_vm13 = vcmp.gt.f32.partialorder %v1445_v41, 0.0  ;;  %vm1454_vm14 = vcmp.gt.f32.partialorder %v1446_v6, 0.0  ;;  %vm1455_vm15 = vcmp.gt.f32.partialorder %v1447_v33, 0.0 }
 0x4c4   :  { %vm1456_vm0 = vcmp.gt.f32.partialorder %v1448_v7, 0.0  ;;  %vm1457_vm1 = vcmp.gt.f32.partialorder %v1449_v14, 0.0  ;;  %vm1458_vm2 = vcmp.gt.f32.partialorder %v1450_v5, 0.0  ;;  %vm1459_vm3 = vcmp.gt.f32.partialorder %v1451_v15, 0.0 }
 0x4c5   :  { %v1460_v46 = vmul.f32 0.2, %v1444_v31  ;;  %v1461_v47 = vmul.f32 0.2, %v1445_v41  ;;  %v1462_v57 = vmul.f32 0.2, %v1446_v6 }
 0x4c6   :  { %v1463_v60 = vmul.f32 0.2, %v1447_v33  ;;  %v1464_v21 = vmul.f32 0.2, %v1448_v7  ;;  %v1465_v22 = vmul.f32 0.2, %v1449_v14 }
 0x4c7   :  { %v1466_v30 = vmul.f32 0.2, %v1450_v5  ;;  %v1467_v50 = vmul.f32 0.2, %v1451_v15  ;;  %v1468_v43 = vsel %vm1452_vm12, %v1444_v31, %v1460_v46  ;;  %v1469_v59 = vsel %vm1453_vm13, %v1445_v41, %v1461_v47 }
 0x4c8   :  { %v1470_v42 = vsel %vm1454_vm14, %v1446_v6, %v1462_v57  ;;  %v1471_v58 = vsel %vm1455_vm15, %v1447_v33, %v1463_v60  ;;  %v1472_v49 = vsel %vm1456_vm0, %v1448_v7, %v1464_v21  ;;  %v1473_v38 = vsel %vm1457_vm1, %v1449_v14, %v1465_v22 }
 0x4c9   :  { %v1474_v61 = vsel %vm1458_vm2, %v1450_v5, %v1466_v30  ;;  %v1475_v62 = vsel %vm1459_vm3, %v1451_v15, %v1467_v50  ;;  %v4137_v63 = vpack.c.bf16 %v1472_v49, %v1468_v43  ;;  %v4139_v36 = vpack.c.bf16 %v1473_v38, %v1469_v59 }
 0x4ca   :  { %v4141_v44 = vpack.c.bf16 %v1474_v61, %v1470_v42  ;;  %v4143_v35 = vpack.c.bf16 %v1475_v62, %v1471_v58 }
 0x4cb   :  { %3277 = dma.done.wait [#allocation4], 32768 }
 0x4cc   :  { %3278 = vsyncadd [#allocation4], 4294934528  ;;  %1814 = vmatprep.mubr.bf16.mxu0 %v4139_v36  ;;  %1900 = vmatprep.mubr.bf16.mxu1 %v4139_v36  ;;  %v1485_v37 = vld [vmem:[#allocation2 + $0x8] sm:$0xff]  ;;  %v1487_v55 = vld [vmem:[#allocation2 + $0x18] sm:$0xff] }
 0x4cd   :  { %v1484_v32 = vld [vmem:[#allocation2] sm:$0xff]  ;;  %1782 = vmatprep.subr.bf16.mxu0 %v1485_v37  ;;  %1868 = vmatprep.subr.bf16.mxu1 %v1487_v55  ;;  %v1486_v52 = vld [vmem:[#allocation2 + $0x10] sm:$0xff]  ;;  %v1493_v48 = vld [vmem:[#allocation2 + $0x48] sm:$0xff] }
 0x4ce   :  { %v1495_v51 = vld [vmem:[#allocation2 + $0x58] sm:$0xff]  ;;  %1783 = vmatpush1.bf16.msra.mxu0 %v1484_v32  ;;  %1869 = vmatpush1.bf16.msra.mxu1 %v1486_v52  ;;  %v1492_v4 = vld [vmem:[#allocation2 + $0x40] sm:$0xff]  ;;  %v1494_v13 = vld [vmem:[#allocation2 + $0x50] sm:$0xff] }
 0x4cf   :  { %1784 = vmatprep.subr.bf16.mxu0 %v1493_v48  ;;  %1870 = vmatprep.subr.bf16.mxu1 %v1495_v51  ;;  %v1501_v20 = vld [vmem:[#allocation2 + $0x88] sm:$0xff]  ;;  %v1503_v29 = vld [vmem:[#allocation2 + $0x98] sm:$0xff]  ;;  %v1500_v40 = vld [vmem:[#allocation2 + $0x80] sm:$0xff] }
 0x4d0   :  { %v1502_v23 = vld [vmem:[#allocation2 + $0x90] sm:$0xff]  ;;  %v1509_v31 = vld [vmem:[#allocation2 + $0xc8] sm:$0xff]  ;;  %v1511_v41 = vld [vmem:[#allocation2 + $0xd8] sm:$0xff] }
 0x4d1   :  { %v1508_v6 = vld [vmem:[#allocation2 + $0xc0] sm:$0xff]  ;;  %v1510_v33 = vld [vmem:[#allocation2 + $0xd0] sm:$0xff]  ;;  %v1517_v7 = vld [vmem:[#allocation2 + $0x108] sm:$0xff] }
 0x4d2   :  { %1785 = vmatpush1.bf16.msra.mxu0 %v1492_v4  ;;  %1871 = vmatpush1.bf16.msra.mxu1 %v1494_v13  ;;  %v1519_v14 = vld [vmem:[#allocation2 + $0x118] sm:$0xff]  ;;  %v1516_v5 = vld [vmem:[#allocation2 + $0x100] sm:$0xff]  ;;  %v1518_v15 = vld [vmem:[#allocation2 + $0x110] sm:$0xff] }
 0x4d3   :  { %1786 = vmatprep.subr.bf16.mxu0 %v1501_v20  ;;  %1872 = vmatprep.subr.bf16.mxu1 %v1503_v29  ;;  %v1525_v46 = vld [vmem:[#allocation2 + $0x148] sm:$0xff]  ;;  %v1527_v47 = vld [vmem:[#allocation2 + $0x158] sm:$0xff]  ;;  %v1524_v57 = vld [vmem:[#allocation2 + $0x140] sm:$0xff] }
 0x4d4   :  { %v1526_v60 = vld [vmem:[#allocation2 + $0x150] sm:$0xff]  ;;  %v1533_v21 = vld [vmem:[#allocation2 + $0x188] sm:$0xff]  ;;  %v1535_v22 = vld [vmem:[#allocation2 + $0x198] sm:$0xff] }
 0x4d5   :  { %v1532_v30 = vld [vmem:[#allocation2 + $0x180] sm:$0xff]  ;;  %v1534_v50 = vld [vmem:[#allocation2 + $0x190] sm:$0xff]  ;;  %v1541_v43 = vld [vmem:[#allocation2 + $0x1c8] sm:$0xff] }
 0x4d6   :  { %1787 = vmatpush1.bf16.msra.mxu0 %v1500_v40  ;;  %1873 = vmatpush1.bf16.msra.mxu1 %v1502_v23  ;;  %v1543_v59 = vld [vmem:[#allocation2 + $0x1d8] sm:$0xff]  ;;  %v1540_v42 = vld [vmem:[#allocation2 + $0x1c0] sm:$0xff]  ;;  %v1542_v58 = vld [vmem:[#allocation2 + $0x1d0] sm:$0xff] }
 0x4d7   :  { %1788 = vmatprep.subr.bf16.mxu0 %v1509_v31  ;;  %1874 = vmatprep.subr.bf16.mxu1 %v1511_v41  ;;  %v1549_v49 = vld [vmem:[#allocation2 + $0x208] sm:$0xff]  ;;  %v1551_v38 = vld [vmem:[#allocation2 + $0x218] sm:$0xff]  ;;  %v1548_v61 = vld [vmem:[#allocation2 + $0x200] sm:$0xff] }
 0x4d8   :  { %v1550_v62 = vld [vmem:[#allocation2 + $0x210] sm:$0xff]  ;;  %v1557_v37 = vld [vmem:[#allocation2 + $0x248] sm:$0xff]  ;;  %v1559_v55 = vld [vmem:[#allocation2 + $0x258] sm:$0xff] }
 0x4d9   :  { %v1556_v32 = vld [vmem:[#allocation2 + $0x240] sm:$0xff]  ;;  %v1558_v52 = vld [vmem:[#allocation2 + $0x250] sm:$0xff]  ;;  %v1565_v48 = vld [vmem:[#allocation2 + $0x288] sm:$0xff] }
 0x4da   :  { %1789 = vmatpush1.bf16.msra.mxu0 %v1508_v6  ;;  %1875 = vmatpush1.bf16.msra.mxu1 %v1510_v33  ;;  %v1567_v51 = vld [vmem:[#allocation2 + $0x298] sm:$0xff]  ;;  %v1564_v4 = vld [vmem:[#allocation2 + $0x280] sm:$0xff]  ;;  %v1566_v13 = vld [vmem:[#allocation2 + $0x290] sm:$0xff] }
 0x4db   :  { %1790 = vmatprep.subr.bf16.mxu0 %v1517_v7  ;;  %1876 = vmatprep.subr.bf16.mxu1 %v1519_v14  ;;  %v1573_v20 = vld [vmem:[#allocation2 + $0x2c8] sm:$0xff]  ;;  %v1575_v29 = vld [vmem:[#allocation2 + $0x2d8] sm:$0xff]  ;;  %v1572_v40 = vld [vmem:[#allocation2 + $0x2c0] sm:$0xff] }
 0x4dc   :  { %v1574_v23 = vld [vmem:[#allocation2 + $0x2d0] sm:$0xff]  ;;  %v1581_v31 = vld [vmem:[#allocation2 + $0x308] sm:$0xff]  ;;  %v1583_v41 = vld [vmem:[#allocation2 + $0x318] sm:$0xff] }
 0x4dd   :  { %v1580_v6 = vld [vmem:[#allocation2 + $0x300] sm:$0xff]  ;;  %v1582_v33 = vld [vmem:[#allocation2 + $0x310] sm:$0xff]  ;;  %v1589_v7 = vld [vmem:[#allocation2 + $0x348] sm:$0xff] }
 0x4de   :  { %1791 = vmatpush1.bf16.msra.mxu0 %v1516_v5  ;;  %1877 = vmatpush1.bf16.msra.mxu1 %v1518_v15  ;;  %v1591_v14 = vld [vmem:[#allocation2 + $0x358] sm:$0xff]  ;;  %v1588_v5 = vld [vmem:[#allocation2 + $0x340] sm:$0xff]  ;;  %v1590_v15 = vld [vmem:[#allocation2 + $0x350] sm:$0xff] }
 0x4df   :  { %1792 = vmatprep.subr.bf16.mxu0 %v1525_v46  ;;  %1878 = vmatprep.subr.bf16.mxu1 %v1527_v47  ;;  %v1597_v46 = vld [vmem:[#allocation2 + $0x388] sm:$0xff]  ;;  %v1599_v47 = vld [vmem:[#allocation2 + $0x398] sm:$0xff] }
 0x4e2   :  { %1793 = vmatpush1.bf16.msra.mxu0 %v1524_v57  ;;  %1879 = vmatpush1.bf16.msra.mxu1 %v1526_v60  ;;  %v1596_v57 = vld [vmem:[#allocation2 + $0x380] sm:$0xff]  ;;  %v1598_v60 = vld [vmem:[#allocation2 + $0x390] sm:$0xff] }
 0x4e3   :  { %1794 = vmatprep.subr.bf16.mxu0 %v1533_v21  ;;  %1880 = vmatprep.subr.bf16.mxu1 %v1535_v22  ;;  %v1605_v21 = vld [vmem:[#allocation2 + $0x3c8] sm:$0xff]  ;;  %v1607_v22 = vld [vmem:[#allocation2 + $0x3d8] sm:$0xff] }
 0x4e6   :  { %1795 = vmatpush1.bf16.msra.mxu0 %v1532_v30  ;;  %1881 = vmatpush1.bf16.msra.mxu1 %v1534_v50  ;;  %v1604_v30 = vld [vmem:[#allocation2 + $0x3c0] sm:$0xff]  ;;  %v1606_v50 = vld [vmem:[#allocation2 + $0x3d0] sm:$0xff] }
 0x4e7   :  { %1796 = vmatprep.subr.bf16.mxu0 %v1541_v43  ;;  %1882 = vmatprep.subr.bf16.mxu1 %v1543_v59  ;;  %v1613_v43 = vld [vmem:[#allocation2 + $0x408] sm:$0xff]  ;;  %v1615_v59 = vld [vmem:[#allocation2 + $0x418] sm:$0xff] }
 0x4ea   :  { %1797 = vmatpush1.bf16.msra.mxu0 %v1540_v42  ;;  %1883 = vmatpush1.bf16.msra.mxu1 %v1542_v58  ;;  %v1612_v42 = vld [vmem:[#allocation2 + $0x400] sm:$0xff]  ;;  %v1614_v58 = vld [vmem:[#allocation2 + $0x410] sm:$0xff] }
 0x4eb   :  { %1798 = vmatprep.subr.bf16.mxu0 %v1549_v49  ;;  %1884 = vmatprep.subr.bf16.mxu1 %v1551_v38  ;;  %v1621_v49 = vld [vmem:[#allocation2 + $0x448] sm:$0xff]  ;;  %v1623_v38 = vld [vmem:[#allocation2 + $0x458] sm:$0xff] }
 0x4ee   :  { %1799 = vmatpush1.bf16.msra.mxu0 %v1548_v61  ;;  %1885 = vmatpush1.bf16.msra.mxu1 %v1550_v62  ;;  %v1620_v61 = vld [vmem:[#allocation2 + $0x440] sm:$0xff]  ;;  %v1622_v62 = vld [vmem:[#allocation2 + $0x450] sm:$0xff] }
 0x4ef   :  { %1800 = vmatprep.subr.bf16.mxu0 %v1557_v37  ;;  %1886 = vmatprep.subr.bf16.mxu1 %v1559_v55  ;;  %v1629_v37 = vld [vmem:[#allocation2 + $0x488] sm:$0xff]  ;;  %v1631_v55 = vld [vmem:[#allocation2 + $0x498] sm:$0xff] }
 0x4f2   :  { %1801 = vmatpush1.bf16.msra.mxu0 %v1556_v32  ;;  %1887 = vmatpush1.bf16.msra.mxu1 %v1558_v52  ;;  %v1628_v32 = vld [vmem:[#allocation2 + $0x480] sm:$0xff]  ;;  %v1630_v52 = vld [vmem:[#allocation2 + $0x490] sm:$0xff] }
 0x4f3   :  { %1802 = vmatprep.subr.bf16.mxu0 %v1565_v48  ;;  %1888 = vmatprep.subr.bf16.mxu1 %v1567_v51  ;;  %v1637_v48 = vld [vmem:[#allocation2 + $0x4c8] sm:$0xff]  ;;  %v1639_v51 = vld [vmem:[#allocation2 + $0x4d8] sm:$0xff] }
 0x4f6   :  { %1803 = vmatpush1.bf16.msra.mxu0 %v1564_v4  ;;  %1889 = vmatpush1.bf16.msra.mxu1 %v1566_v13  ;;  %v1636_v4 = vld [vmem:[#allocation2 + $0x4c0] sm:$0xff]  ;;  %v1638_v13 = vld [vmem:[#allocation2 + $0x4d0] sm:$0xff] }
 0x4f7   :  { %1804 = vmatprep.subr.bf16.mxu0 %v1573_v20  ;;  %1890 = vmatprep.subr.bf16.mxu1 %v1575_v29  ;;  %v1645_v20 = vld [vmem:[#allocation2 + $0x508] sm:$0xff]  ;;  %v1647_v29 = vld [vmem:[#allocation2 + $0x518] sm:$0xff] }
 0x4fa   :  { %1805 = vmatpush1.bf16.msra.mxu0 %v1572_v40  ;;  %1891 = vmatpush1.bf16.msra.mxu1 %v1574_v23  ;;  %v1644_v40 = vld [vmem:[#allocation2 + $0x500] sm:$0xff]  ;;  %v1646_v23 = vld [vmem:[#allocation2 + $0x510] sm:$0xff] }
 0x4fb   :  { %1806 = vmatprep.subr.bf16.mxu0 %v1581_v31  ;;  %1892 = vmatprep.subr.bf16.mxu1 %v1583_v41  ;;  %v1653_v31 = vld [vmem:[#allocation2 + $0x548] sm:$0xff]  ;;  %v1655_v41 = vld [vmem:[#allocation2 + $0x558] sm:$0xff] }
 0x4fe   :  { %1807 = vmatpush1.bf16.msra.mxu0 %v1580_v6  ;;  %1893 = vmatpush1.bf16.msra.mxu1 %v1582_v33  ;;  %v1652_v6 = vld [vmem:[#allocation2 + $0x540] sm:$0xff]  ;;  %v1654_v33 = vld [vmem:[#allocation2 + $0x550] sm:$0xff] }
 0x4ff   :  { %1808 = vmatprep.subr.bf16.mxu0 %v1589_v7  ;;  %1894 = vmatprep.subr.bf16.mxu1 %v1591_v14  ;;  %v1661_v7 = vld [vmem:[#allocation2 + $0x588] sm:$0xff]  ;;  %v1663_v14 = vld [vmem:[#allocation2 + $0x598] sm:$0xff] }
 0x502   :  { %1809 = vmatpush1.bf16.msra.mxu0 %v1588_v5  ;;  %1895 = vmatpush1.bf16.msra.mxu1 %v1590_v15  ;;  %v1660_v5 = vld [vmem:[#allocation2 + $0x580] sm:$0xff]  ;;  %v1662_v15 = vld [vmem:[#allocation2 + $0x590] sm:$0xff] }
 0x503   :  { %1810 = vmatprep.subr.bf16.mxu0 %v1597_v46  ;;  %1896 = vmatprep.subr.bf16.mxu1 %v1599_v47  ;;  %v1669_v46 = vld [vmem:[#allocation2 + $0x5c8] sm:$0xff]  ;;  %v1671_v47 = vld [vmem:[#allocation2 + $0x5d8] sm:$0xff] }
 0x506   :  { %1811 = vmatpush1.bf16.msra.mxu0 %v1596_v57  ;;  %1897 = vmatpush1.bf16.msra.mxu1 %v1598_v60  ;;  %v1668_v57 = vld [vmem:[#allocation2 + $0x5c0] sm:$0xff]  ;;  %v1670_v60 = vld [vmem:[#allocation2 + $0x5d0] sm:$0xff] }
 0x507   :  { %1812 = vmatprep.subr.bf16.mxu0 %v1605_v21  ;;  %1898 = vmatprep.subr.bf16.mxu1 %v1607_v22  ;;  %v1677_v21 = vld [vmem:[#allocation2 + $0x608] sm:$0xff]  ;;  %v1679_v22 = vld [vmem:[#allocation2 + $0x618] sm:$0xff] }
 0x50a   :  { %1813 = vmatpush1.bf16.msra.mxu0 %v1604_v30  ;;  %1899 = vmatpush1.bf16.msra.mxu1 %v1606_v50  ;;  %v1676_v30 = vld [vmem:[#allocation2 + $0x600] sm:$0xff]  ;;  %v1678_v50 = vld [vmem:[#allocation2 + $0x610] sm:$0xff] }
 0x50b   :  { %1825 = vmatprep.subr.bf16.mxu0 %v1613_v43  ;;  %1911 = vmatprep.subr.bf16.mxu1 %v1615_v59  ;;  %v1685_v43 = vld [vmem:[#allocation2 + $0x648] sm:$0xff]  ;;  %v1687_v59 = vld [vmem:[#allocation2 + $0x658] sm:$0xff] }
 0x50d   :  { %1815 = vmatmul.mubr.bf16.vlgmr.msra.gmra.mrb[16].mxu0 %v4137_v63  ;;  %1901 = vmatmul.mubr.bf16.vlgmr.msra.gmra.mrb[8].mxu1 %v4137_v63 }
 0x50e   :  { %1826 = vmatpush1.bf16.msra.mxu0 %v1612_v42  ;;  %1912 = vmatpush1.bf16.msra.mxu1 %v1614_v58  ;;  %v1684_v42 = vld [vmem:[#allocation2 + $0x640] sm:$0xff]  ;;  %v1686_v58 = vld [vmem:[#allocation2 + $0x650] sm:$0xff] }
 0x50f   :  { %1827 = vmatprep.subr.bf16.mxu0 %v1621_v49  ;;  %1913 = vmatprep.subr.bf16.mxu1 %v1623_v38  ;;  %v1693_v49 = vld [vmem:[#allocation2 + $0x688] sm:$0xff]  ;;  %v1695_v38 = vld [vmem:[#allocation2 + $0x698] sm:$0xff] }
 0x510   :  { %1857 = vmatprep.mubr.bf16.mxu0 %v4143_v35  ;;  %1943 = vmatprep.mubr.bf16.mxu1 %v4143_v35 }
 0x512   :  { %1828 = vmatpush1.bf16.msra.mxu0 %v1620_v61  ;;  %1914 = vmatpush1.bf16.msra.mxu1 %v1622_v62  ;;  %v1692_v61 = vld [vmem:[#allocation2 + $0x680] sm:$0xff]  ;;  %v1694_v62 = vld [vmem:[#allocation2 + $0x690] sm:$0xff] }
 0x513   :  { %1829 = vmatprep.subr.bf16.mxu0 %v1629_v37  ;;  %1915 = vmatprep.subr.bf16.mxu1 %v1631_v55  ;;  %v1701_v37 = vld [vmem:[#allocation2 + $0x6c8] sm:$0xff]  ;;  %v1703_v55 = vld [vmem:[#allocation2 + $0x6d8] sm:$0xff] }
 0x516   :  { %1830 = vmatpush1.bf16.msra.mxu0 %v1628_v32  ;;  %1916 = vmatpush1.bf16.msra.mxu1 %v1630_v52  ;;  %v1700_v32 = vld [vmem:[#allocation2 + $0x6c0] sm:$0xff]  ;;  %v1702_v52 = vld [vmem:[#allocation2 + $0x6d0] sm:$0xff] }
 0x517   :  { %1831 = vmatprep.subr.bf16.mxu0 %v1637_v48  ;;  %1917 = vmatprep.subr.bf16.mxu1 %v1639_v51  ;;  %v1709_v48 = vld [vmem:[#allocation2 + $0x708] sm:$0xff]  ;;  %v1711_v51 = vld [vmem:[#allocation2 + $0x718] sm:$0xff] }
 0x51a   :  { %1832 = vmatpush1.bf16.msra.mxu0 %v1636_v4  ;;  %1918 = vmatpush1.bf16.msra.mxu1 %v1638_v13  ;;  %v1708_v4 = vld [vmem:[#allocation2 + $0x700] sm:$0xff]  ;;  %v1710_v13 = vld [vmem:[#allocation2 + $0x710] sm:$0xff] }
 0x51b   :  { %1833 = vmatprep.subr.bf16.mxu0 %v1645_v20  ;;  %1919 = vmatprep.subr.bf16.mxu1 %v1647_v29  ;;  %v1717_v20 = vld [vmem:[#allocation2 + $0x748] sm:$0xff]  ;;  %v1719_v29 = vld [vmem:[#allocation2 + $0x758] sm:$0xff] }
 0x51e   :  { %1834 = vmatpush1.bf16.msra.mxu0 %v1644_v40  ;;  %1920 = vmatpush1.bf16.msra.mxu1 %v1646_v23  ;;  %v1716_v40 = vld [vmem:[#allocation2 + $0x740] sm:$0xff]  ;;  %v1718_v23 = vld [vmem:[#allocation2 + $0x750] sm:$0xff] }
 0x51f   :  { %1835 = vmatprep.subr.bf16.mxu0 %v1653_v31  ;;  %1921 = vmatprep.subr.bf16.mxu1 %v1655_v41  ;;  %v1725_v31 = vld [vmem:[#allocation2 + $0x788] sm:$0xff]  ;;  %v1727_v41 = vld [vmem:[#allocation2 + $0x798] sm:$0xff] }
 0x522   :  { %1836 = vmatpush1.bf16.msra.mxu0 %v1652_v6  ;;  %1922 = vmatpush1.bf16.msra.mxu1 %v1654_v33  ;;  %v1724_v6 = vld [vmem:[#allocation2 + $0x780] sm:$0xff]  ;;  %v1726_v33 = vld [vmem:[#allocation2 + $0x790] sm:$0xff] }
 0x523   :  { %1837 = vmatprep.subr.bf16.mxu0 %v1661_v7  ;;  %1923 = vmatprep.subr.bf16.mxu1 %v1663_v14  ;;  %v1733_v7 = vld [vmem:[#allocation2 + $0x7c8] sm:$0xff]  ;;  %v1735_v14 = vld [vmem:[#allocation2 + $0x7d8] sm:$0xff] }
 0x526   :  { %1838 = vmatpush1.bf16.msra.mxu0 %v1660_v5  ;;  %1924 = vmatpush1.bf16.msra.mxu1 %v1662_v15  ;;  %v1732_v5 = vld [vmem:[#allocation2 + $0x7c0] sm:$0xff]  ;;  %v1734_v15 = vld [vmem:[#allocation2 + $0x7d0] sm:$0xff] }
 0x527   :  { %1839 = vmatprep.subr.bf16.mxu0 %v1669_v46  ;;  %1925 = vmatprep.subr.bf16.mxu1 %v1671_v47  ;;  %v1489_v46 = vld [vmem:[#allocation2 + $0x28] sm:$0xff]  ;;  %v1491_v47 = vld [vmem:[#allocation2 + $0x38] sm:$0xff] }
 0x52a   :  { %1840 = vmatpush1.bf16.msra.mxu0 %v1668_v57  ;;  %1926 = vmatpush1.bf16.msra.mxu1 %v1670_v60  ;;  %v1488_v57 = vld [vmem:[#allocation2 + $0x20] sm:$0xff]  ;;  %v1490_v60 = vld [vmem:[#allocation2 + $0x30] sm:$0xff] }
 0x52b   :  { %1841 = vmatprep.subr.bf16.mxu0 %v1677_v21  ;;  %1927 = vmatprep.subr.bf16.mxu1 %v1679_v22  ;;  %v1497_v21 = vld [vmem:[#allocation2 + $0x68] sm:$0xff]  ;;  %v1499_v22 = vld [vmem:[#allocation2 + $0x78] sm:$0xff] }
 0x52e   :  { %1842 = vmatpush1.bf16.msra.mxu0 %v1676_v30  ;;  %1928 = vmatpush1.bf16.msra.mxu1 %v1678_v50  ;;  %v1496_v30 = vld [vmem:[#allocation2 + $0x60] sm:$0xff]  ;;  %v1498_v50 = vld [vmem:[#allocation2 + $0x70] sm:$0xff] }
 0x52f   :  { %1843 = vmatprep.subr.bf16.mxu0 %v1685_v43  ;;  %1929 = vmatprep.subr.bf16.mxu1 %v1687_v59  ;;  %v1505_v43 = vld [vmem:[#allocation2 + $0xa8] sm:$0xff]  ;;  %v1507_v59 = vld [vmem:[#allocation2 + $0xb8] sm:$0xff] }
 0x532   :  { %1844 = vmatpush1.bf16.msra.mxu0 %v1684_v42  ;;  %1930 = vmatpush1.bf16.msra.mxu1 %v1686_v58  ;;  %v1504_v42 = vld [vmem:[#allocation2 + $0xa0] sm:$0xff]  ;;  %v1506_v58 = vld [vmem:[#allocation2 + $0xb0] sm:$0xff] }
 0x533   :  { %1845 = vmatprep.subr.bf16.mxu0 %v1693_v49  ;;  %1931 = vmatprep.subr.bf16.mxu1 %v1695_v38  ;;  %v1513_v49 = vld [vmem:[#allocation2 + $0xe8] sm:$0xff]  ;;  %v1515_v38 = vld [vmem:[#allocation2 + $0xf8] sm:$0xff] }
 0x536   :  { %1846 = vmatpush1.bf16.msra.mxu0 %v1692_v61  ;;  %1932 = vmatpush1.bf16.msra.mxu1 %v1694_v62  ;;  %v1512_v61 = vld [vmem:[#allocation2 + $0xe0] sm:$0xff]  ;;  %v1514_v62 = vld [vmem:[#allocation2 + $0xf0] sm:$0xff] }
 0x537   :  { %1847 = vmatprep.subr.bf16.mxu0 %v1701_v37  ;;  %1933 = vmatprep.subr.bf16.mxu1 %v1703_v55  ;;  %v1521_v37 = vld [vmem:[#allocation2 + $0x128] sm:$0xff]  ;;  %v1523_v55 = vld [vmem:[#allocation2 + $0x138] sm:$0xff] }
 0x53a   :  { %1848 = vmatpush1.bf16.msra.mxu0 %v1700_v32  ;;  %1934 = vmatpush1.bf16.msra.mxu1 %v1702_v52  ;;  %v1522_v32 = vld [vmem:[#allocation2 + $0x130] sm:$0xff]  ;;  %v1529_v52 = vld [vmem:[#allocation2 + $0x168] sm:$0xff] }
 0x53b   :  { %1849 = vmatprep.subr.bf16.mxu0 %v1709_v48  ;;  %1935 = vmatprep.subr.bf16.mxu1 %v1711_v51  ;;  %v1531_v48 = vld [vmem:[#allocation2 + $0x178] sm:$0xff]  ;;  %v1528_v51 = vld [vmem:[#allocation2 + $0x160] sm:$0xff] }
 0x53e   :  { %1850 = vmatpush1.bf16.msra.mxu0 %v1708_v4  ;;  %1936 = vmatpush1.bf16.msra.mxu1 %v1710_v13  ;;  %v1530_v4 = vld [vmem:[#allocation2 + $0x170] sm:$0xff]  ;;  %v1537_v13 = vld [vmem:[#allocation2 + $0x1a8] sm:$0xff] }
 0x53f   :  { %1851 = vmatprep.subr.bf16.mxu0 %v1717_v20  ;;  %1937 = vmatprep.subr.bf16.mxu1 %v1719_v29  ;;  %v1539_v20 = vld [vmem:[#allocation2 + $0x1b8] sm:$0xff]  ;;  %v1536_v29 = vld [vmem:[#allocation2 + $0x1a0] sm:$0xff] }
 0x542   :  { %1852 = vmatpush1.bf16.msra.mxu0 %v1716_v40  ;;  %1938 = vmatpush1.bf16.msra.mxu1 %v1718_v23  ;;  %v1538_v40 = vld [vmem:[#allocation2 + $0x1b0] sm:$0xff]  ;;  %v1545_v23 = vld [vmem:[#allocation2 + $0x1e8] sm:$0xff] }
 0x543   :  { %1853 = vmatprep.subr.bf16.mxu0 %v1725_v31  ;;  %1939 = vmatprep.subr.bf16.mxu1 %v1727_v41  ;;  %v1547_v31 = vld [vmem:[#allocation2 + $0x1f8] sm:$0xff]  ;;  %v1544_v41 = vld [vmem:[#allocation2 + $0x1e0] sm:$0xff] }
 0x546   :  { %1854 = vmatpush1.bf16.msra.mxu0 %v1724_v6  ;;  %1940 = vmatpush1.bf16.msra.mxu1 %v1726_v33  ;;  %v1546_v6 = vld [vmem:[#allocation2 + $0x1f0] sm:$0xff]  ;;  %v1553_v33 = vld [vmem:[#allocation2 + $0x228] sm:$0xff] }
 0x547   :  { %1855 = vmatprep.subr.bf16.mxu0 %v1733_v7  ;;  %1941 = vmatprep.subr.bf16.mxu1 %v1735_v14  ;;  %v1555_v7 = vld [vmem:[#allocation2 + $0x238] sm:$0xff]  ;;  %v1552_v14 = vld [vmem:[#allocation2 + $0x220] sm:$0xff] }
 0x54a   :  { %1856 = vmatpush1.bf16.msra.mxu0 %v1732_v5  ;;  %1942 = vmatpush1.bf16.msra.mxu1 %v1734_v15  ;;  %v1554_v5 = vld [vmem:[#allocation2 + $0x230] sm:$0xff]  ;;  %v1561_v15 = vld [vmem:[#allocation2 + $0x268] sm:$0xff] }
 0x54b   :  { %1954 = vmatprep.subr.bf16.mxu0 %v1489_v46  ;;  %2040 = vmatprep.subr.bf16.mxu1 %v1491_v47  ;;  %v1563_v46 = vld [vmem:[#allocation2 + $0x278] sm:$0xff]  ;;  %v1560_v47 = vld [vmem:[#allocation2 + $0x260] sm:$0xff] }
 0x54d   :  { %1858 = vmatmul.mubr.bf16.vlgmr.msra.gmra.mrb[16].mxu0 %v4141_v44  ;;  %1944 = vmatmul.mubr.bf16.vlgmr.msra.gmra.mrb[8].mxu1 %v4141_v44 }
 0x54e   :  { %1955 = vmatpush1.bf16.msra.mxu0 %v1488_v57  ;;  %2041 = vmatpush1.bf16.msra.mxu1 %v1490_v60  ;;  %v1562_v57 = vld [vmem:[#allocation2 + $0x270] sm:$0xff]  ;;  %v1569_v60 = vld [vmem:[#allocation2 + $0x2a8] sm:$0xff] }
 0x54f   :  { %1956 = vmatprep.subr.bf16.mxu0 %v1497_v21  ;;  %2042 = vmatprep.subr.bf16.mxu1 %v1499_v22  ;;  %v1571_v21 = vld [vmem:[#allocation2 + $0x2b8] sm:$0xff]  ;;  %v1568_v22 = vld [vmem:[#allocation2 + $0x2a0] sm:$0xff] }
 0x550   :  { %1986 = vmatprep.mubr.bf16.mxu0 %v4139_v36  ;;  %2072 = vmatprep.mubr.bf16.mxu1 %v4139_v36  ;;  %v1520_v36 = vld [vmem:[#allocation2 + $0x120] sm:$0xff] }
 0x552   :  { %1957 = vmatpush1.bf16.msra.mxu0 %v1496_v30  ;;  %2043 = vmatpush1.bf16.msra.mxu1 %v1498_v50  ;;  %v1570_v30 = vld [vmem:[#allocation2 + $0x2b0] sm:$0xff]  ;;  %v1577_v50 = vld [vmem:[#allocation2 + $0x2e8] sm:$0xff] }
 0x553   :  { %1958 = vmatprep.subr.bf16.mxu0 %v1505_v43  ;;  %2044 = vmatprep.subr.bf16.mxu1 %v1507_v59  ;;  %v1579_v43 = vld [vmem:[#allocation2 + $0x2f8] sm:$0xff]  ;;  %v1576_v59 = vld [vmem:[#allocation2 + $0x2e0] sm:$0xff] }
 0x556   :  { %1959 = vmatpush1.bf16.msra.mxu0 %v1504_v42  ;;  %2045 = vmatpush1.bf16.msra.mxu1 %v1506_v58  ;;  %v1578_v42 = vld [vmem:[#allocation2 + $0x2f0] sm:$0xff]  ;;  %v1585_v58 = vld [vmem:[#allocation2 + $0x328] sm:$0xff] }
 0x557   :  { %1960 = vmatprep.subr.bf16.mxu0 %v1513_v49  ;;  %2046 = vmatprep.subr.bf16.mxu1 %v1515_v38  ;;  %v1587_v49 = vld [vmem:[#allocation2 + $0x338] sm:$0xff]  ;;  %v1584_v38 = vld [vmem:[#allocation2 + $0x320] sm:$0xff] }
 0x55a   :  { %1961 = vmatpush1.bf16.msra.mxu0 %v1512_v61  ;;  %2047 = vmatpush1.bf16.msra.mxu1 %v1514_v62  ;;  %v1586_v61 = vld [vmem:[#allocation2 + $0x330] sm:$0xff]  ;;  %v1593_v62 = vld [vmem:[#allocation2 + $0x368] sm:$0xff] }
 0x55b   :  { %1962 = vmatprep.subr.bf16.mxu0 %v1521_v37  ;;  %2048 = vmatprep.subr.bf16.mxu1 %v1523_v55  ;;  %v1595_v37 = vld [vmem:[#allocation2 + $0x378] sm:$0xff]  ;;  %v1592_v55 = vld [vmem:[#allocation2 + $0x360] sm:$0xff] }
 0x55e   :  { %1963 = vmatpush1.bf16.msra.mxu0 %v1520_v36  ;;  %2049 = vmatpush1.bf16.msra.mxu1 %v1522_v32  ;;  %v1594_v36 = vld [vmem:[#allocation2 + $0x370] sm:$0xff]  ;;  %v1601_v32 = vld [vmem:[#allocation2 + $0x3a8] sm:$0xff] }
 0x55f   :  { %1964 = vmatprep.subr.bf16.mxu0 %v1529_v52  ;;  %2050 = vmatprep.subr.bf16.mxu1 %v1531_v48  ;;  %v1603_v52 = vld [vmem:[#allocation2 + $0x3b8] sm:$0xff]  ;;  %v1600_v48 = vld [vmem:[#allocation2 + $0x3a0] sm:$0xff] }
 0x562   :  { %1965 = vmatpush1.bf16.msra.mxu0 %v1528_v51  ;;  %2051 = vmatpush1.bf16.msra.mxu1 %v1530_v4  ;;  %v1602_v51 = vld [vmem:[#allocation2 + $0x3b0] sm:$0xff]  ;;  %v1609_v4 = vld [vmem:[#allocation2 + $0x3e8] sm:$0xff] }
 0x563   :  { %1966 = vmatprep.subr.bf16.mxu0 %v1537_v13  ;;  %2052 = vmatprep.subr.bf16.mxu1 %v1539_v20  ;;  %v1611_v13 = vld [vmem:[#allocation2 + $0x3f8] sm:$0xff]  ;;  %v1608_v20 = vld [vmem:[#allocation2 + $0x3e0] sm:$0xff] }
 0x566   :  { %1967 = vmatpush1.bf16.msra.mxu0 %v1536_v29  ;;  %2053 = vmatpush1.bf16.msra.mxu1 %v1538_v40  ;;  %v1610_v29 = vld [vmem:[#allocation2 + $0x3f0] sm:$0xff]  ;;  %v1617_v40 = vld [vmem:[#allocation2 + $0x428] sm:$0xff] }
 0x567   :  { %1968 = vmatprep.subr.bf16.mxu0 %v1545_v23  ;;  %2054 = vmatprep.subr.bf16.mxu1 %v1547_v31  ;;  %v1619_v23 = vld [vmem:[#allocation2 + $0x438] sm:$0xff]  ;;  %v1616_v31 = vld [vmem:[#allocation2 + $0x420] sm:$0xff] }
 0x56a   :  { %1969 = vmatpush1.bf16.msra.mxu0 %v1544_v41  ;;  %2055 = vmatpush1.bf16.msra.mxu1 %v1546_v6  ;;  %v1618_v41 = vld [vmem:[#allocation2 + $0x430] sm:$0xff]  ;;  %v1625_v6 = vld [vmem:[#allocation2 + $0x468] sm:$0xff] }
 0x56b   :  { %1970 = vmatprep.subr.bf16.mxu0 %v1553_v33  ;;  %2056 = vmatprep.subr.bf16.mxu1 %v1555_v7  ;;  %v1627_v33 = vld [vmem:[#allocation2 + $0x478] sm:$0xff]  ;;  %v1624_v7 = vld [vmem:[#allocation2 + $0x460] sm:$0xff] }
 0x56e   :  { %1971 = vmatpush1.bf16.msra.mxu0 %v1552_v14  ;;  %2057 = vmatpush1.bf16.msra.mxu1 %v1554_v5  ;;  %v1626_v14 = vld [vmem:[#allocation2 + $0x470] sm:$0xff]  ;;  %v1633_v5 = vld [vmem:[#allocation2 + $0x4a8] sm:$0xff] }
 0x56f   :  { %1972 = vmatprep.subr.bf16.mxu0 %v1561_v15  ;;  %2058 = vmatprep.subr.bf16.mxu1 %v1563_v46  ;;  %v1635_v15 = vld [vmem:[#allocation2 + $0x4b8] sm:$0xff]  ;;  %v1632_v46 = vld [vmem:[#allocation2 + $0x4a0] sm:$0xff] }
 0x572   :  { %1973 = vmatpush1.bf16.msra.mxu0 %v1560_v47  ;;  %2059 = vmatpush1.bf16.msra.mxu1 %v1562_v57  ;;  %v1634_v47 = vld [vmem:[#allocation2 + $0x4b0] sm:$0xff]  ;;  %v1641_v57 = vld [vmem:[#allocation2 + $0x4e8] sm:$0xff] }
 0x573   :  { %1974 = vmatprep.subr.bf16.mxu0 %v1569_v60  ;;  %2060 = vmatprep.subr.bf16.mxu1 %v1571_v21  ;;  %v1640_v60 = vld [vmem:[#allocation2 + $0x4e0] sm:$0xff]  ;;  %v1642_v21 = vld [vmem:[#allocation2 + $0x4f0] sm:$0xff] }
 0x576   :  { %1975 = vmatpush1.bf16.msra.mxu0 %v1568_v22  ;;  %2061 = vmatpush1.bf16.msra.mxu1 %v1570_v30  ;;  %v1649_v22 = vld [vmem:[#allocation2 + $0x528] sm:$0xff]  ;;  %v1651_v30 = vld [vmem:[#allocation2 + $0x538] sm:$0xff] }
 0x577   :  { %1976 = vmatprep.subr.bf16.mxu0 %v1577_v50  ;;  %2062 = vmatprep.subr.bf16.mxu1 %v1579_v43  ;;  %v1650_v50 = vld [vmem:[#allocation2 + $0x530] sm:$0xff]  ;;  %v1657_v43 = vld [vmem:[#allocation2 + $0x568] sm:$0xff] }
 0x57a   :  { %1977 = vmatpush1.bf16.msra.mxu0 %v1576_v59  ;;  %2063 = vmatpush1.bf16.msra.mxu1 %v1578_v42  ;;  %v1659_v59 = vld [vmem:[#allocation2 + $0x578] sm:$0xff]  ;;  %v1656_v42 = vld [vmem:[#allocation2 + $0x560] sm:$0xff] }
 0x57b   :  { %1978 = vmatprep.subr.bf16.mxu0 %v1585_v58  ;;  %2064 = vmatprep.subr.bf16.mxu1 %v1587_v49  ;;  %v1658_v58 = vld [vmem:[#allocation2 + $0x570] sm:$0xff]  ;;  %v1665_v49 = vld [vmem:[#allocation2 + $0x5a8] sm:$0xff] }
 0x57e   :  { %1979 = vmatpush1.bf16.msra.mxu0 %v1584_v38  ;;  %2065 = vmatpush1.bf16.msra.mxu1 %v1586_v61  ;;  %v1667_v38 = vld [vmem:[#allocation2 + $0x5b8] sm:$0xff]  ;;  %v1664_v61 = vld [vmem:[#allocation2 + $0x5a0] sm:$0xff] }
 0x57f   :  { %1980 = vmatprep.subr.bf16.mxu0 %v1593_v62  ;;  %2066 = vmatprep.subr.bf16.mxu1 %v1595_v37  ;;  %v1666_v62 = vld [vmem:[#allocation2 + $0x5b0] sm:$0xff]  ;;  %v1673_v37 = vld [vmem:[#allocation2 + $0x5e8] sm:$0xff] }
 0x582   :  { %1981 = vmatpush1.bf16.msra.mxu0 %v1592_v55  ;;  %2067 = vmatpush1.bf16.msra.mxu1 %v1594_v36  ;;  %v1675_v55 = vld [vmem:[#allocation2 + $0x5f8] sm:$0xff]  ;;  %v1672_v36 = vld [vmem:[#allocation2 + $0x5e0] sm:$0xff] }
 0x583   :  { %1982 = vmatprep.subr.bf16.mxu0 %v1601_v32  ;;  %2068 = vmatprep.subr.bf16.mxu1 %v1603_v52  ;;  %v1674_v32 = vld [vmem:[#allocation2 + $0x5f0] sm:$0xff]  ;;  %v1681_v52 = vld [vmem:[#allocation2 + $0x628] sm:$0xff] }
 0x586   :  { %1983 = vmatpush1.bf16.msra.mxu0 %v1600_v48  ;;  %2069 = vmatpush1.bf16.msra.mxu1 %v1602_v51  ;;  %v1683_v48 = vld [vmem:[#allocation2 + $0x638] sm:$0xff]  ;;  %v1680_v51 = vld [vmem:[#allocation2 + $0x620] sm:$0xff] }
 0x587   :  { %1984 = vmatprep.subr.bf16.mxu0 %v1609_v4  ;;  %2070 = vmatprep.subr.bf16.mxu1 %v1611_v13  ;;  %v1682_v4 = vld [vmem:[#allocation2 + $0x630] sm:$0xff]  ;;  %v1689_v13 = vld [vmem:[#allocation2 + $0x668] sm:$0xff] }
 0x58a   :  { %1985 = vmatpush1.bf16.msra.mxu0 %v1608_v20  ;;  %2071 = vmatpush1.bf16.msra.mxu1 %v1610_v29  ;;  %v1691_v20 = vld [vmem:[#allocation2 + $0x678] sm:$0xff]  ;;  %v1688_v29 = vld [vmem:[#allocation2 + $0x660] sm:$0xff] }
 0x58b   :  { %1997 = vmatprep.subr.bf16.mxu0 %v1617_v40  ;;  %2083 = vmatprep.subr.bf16.mxu1 %v1619_v23  ;;  %v1690_v40 = vld [vmem:[#allocation2 + $0x670] sm:$0xff]  ;;  %v1697_v23 = vld [vmem:[#allocation2 + $0x6a8] sm:$0xff] }
 0x58d   :  { %1987 = vmatmul.mubr.bf16.vlgmr.msra.gmra.mrb[20].mxu0 %v4137_v63  ;;  %2073 = vmatmul.mubr.bf16.vlgmr.msra.gmra.mrb[12].mxu1 %v4137_v63  ;;  %v1643_v63 = vld [vmem:[#allocation2 + $0x4f8] sm:$0xff] }
 0x58e   :  { %1998 = vmatpush1.bf16.msra.mxu0 %v1616_v31  ;;  %2084 = vmatpush1.bf16.msra.mxu1 %v1618_v41  ;;  %v1699_v31 = vld [vmem:[#allocation2 + $0x6b8] sm:$0xff]  ;;  %v1696_v41 = vld [vmem:[#allocation2 + $0x6a0] sm:$0xff] }
 0x58f   :  { %1999 = vmatprep.subr.bf16.mxu0 %v1625_v6  ;;  %2085 = vmatprep.subr.bf16.mxu1 %v1627_v33  ;;  %v1698_v6 = vld [vmem:[#allocation2 + $0x6b0] sm:$0xff]  ;;  %v1705_v33 = vld [vmem:[#allocation2 + $0x6e8] sm:$0xff] }
 0x590   :  { %2029 = vmatprep.mubr.bf16.mxu0 %v4143_v35  ;;  %2115 = vmatprep.mubr.bf16.mxu1 %v4143_v35  ;;  %v1648_v35 = vld [vmem:[#allocation2 + $0x520] sm:$0xff] }
 0x592   :  { %2000 = vmatpush1.bf16.msra.mxu0 %v1624_v7  ;;  %2086 = vmatpush1.bf16.msra.mxu1 %v1626_v14  ;;  %v1707_v7 = vld [vmem:[#allocation2 + $0x6f8] sm:$0xff]  ;;  %v1704_v14 = vld [vmem:[#allocation2 + $0x6e0] sm:$0xff] }
 0x593   :  { %2001 = vmatprep.subr.bf16.mxu0 %v1633_v5  ;;  %2087 = vmatprep.subr.bf16.mxu1 %v1635_v15  ;;  %v1706_v5 = vld [vmem:[#allocation2 + $0x6f0] sm:$0xff]  ;;  %v1713_v15 = vld [vmem:[#allocation2 + $0x728] sm:$0xff] }
 0x596   :  { %2002 = vmatpush1.bf16.msra.mxu0 %v1632_v46  ;;  %2088 = vmatpush1.bf16.msra.mxu1 %v1634_v47  ;;  %v1715_v46 = vld [vmem:[#allocation2 + $0x738] sm:$0xff]  ;;  %v1712_v47 = vld [vmem:[#allocation2 + $0x720] sm:$0xff] }
 0x597   :  { %2003 = vmatprep.subr.bf16.mxu0 %v1641_v57  ;;  %2089 = vmatprep.subr.bf16.mxu1 %v1643_v63  ;;  %v1714_v57 = vld [vmem:[#allocation2 + $0x730] sm:$0xff]  ;;  %v1721_v63 = vld [vmem:[#allocation2 + $0x768] sm:$0xff] }
 0x59a   :  { %2004 = vmatpush1.bf16.msra.mxu0 %v1640_v60  ;;  %2090 = vmatpush1.bf16.msra.mxu1 %v1642_v21  ;;  %v1723_v60 = vld [vmem:[#allocation2 + $0x778] sm:$0xff]  ;;  %v1720_v21 = vld [vmem:[#allocation2 + $0x760] sm:$0xff] }
 0x59b   :  { %2005 = vmatprep.subr.bf16.mxu0 %v1649_v22  ;;  %2091 = vmatprep.subr.bf16.mxu1 %v1651_v30  ;;  %v1722_v22 = vld [vmem:[#allocation2 + $0x770] sm:$0xff]  ;;  %v1729_v30 = vld [vmem:[#allocation2 + $0x7a8] sm:$0xff] }
 0x59e   :  { %2006 = vmatpush1.bf16.msra.mxu0 %v1648_v35  ;;  %2092 = vmatpush1.bf16.msra.mxu1 %v1650_v50  ;;  %v1731_v35 = vld [vmem:[#allocation2 + $0x7b8] sm:$0xff]  ;;  %v1728_v50 = vld [vmem:[#allocation2 + $0x7a0] sm:$0xff] }
 0x59f   :  { %2007 = vmatprep.subr.bf16.mxu0 %v1657_v43  ;;  %2093 = vmatprep.subr.bf16.mxu1 %v1659_v59  ;;  %v1730_v43 = vld [vmem:[#allocation2 + $0x7b0] sm:$0xff]  ;;  %v1737_v59 = vld [vmem:[#allocation2 + $0x7e8] sm:$0xff] }
 0x5a2   :  { %2008 = vmatpush1.bf16.msra.mxu0 %v1656_v42  ;;  %2094 = vmatpush1.bf16.msra.mxu1 %v1658_v58  ;;  %v1739_v42 = vld [vmem:[#allocation2 + $0x7f8] sm:$0xff]  ;;  %v1736_v58 = vld [vmem:[#allocation2 + $0x7e0] sm:$0xff] }
 0x5a3   :  { %2009 = vmatprep.subr.bf16.mxu0 %v1665_v49  ;;  %2095 = vmatprep.subr.bf16.mxu1 %v1667_v38  ;;  %v1738_v49 = vld [vmem:[#allocation2 + $0x7f0] sm:$0xff] }
 0x5a6   :  { %2010 = vmatpush1.bf16.msra.mxu0 %v1664_v61  ;;  %2096 = vmatpush1.bf16.msra.mxu1 %v1666_v62 }
 0x5a7   :  { %2011 = vmatprep.subr.bf16.mxu0 %v1673_v37  ;;  %2097 = vmatprep.subr.bf16.mxu1 %v1675_v55 }
 0x5aa   :  { %2012 = vmatpush1.bf16.msra.mxu0 %v1672_v36  ;;  %2098 = vmatpush1.bf16.msra.mxu1 %v1674_v32 }
 0x5ab   :  { %2013 = vmatprep.subr.bf16.mxu0 %v1681_v52  ;;  %2099 = vmatprep.subr.bf16.mxu1 %v1683_v48  ;;  %v4164_v48 = vld [vmem:[%s4475_s14] sm:$0xff] }
 0x5ae   :  { %2014 = vmatpush1.bf16.msra.mxu0 %v1680_v51  ;;  %2100 = vmatpush1.bf16.msra.mxu1 %v1682_v4  ;;  %v1745_v51 = vrot.slane %v4164_v48, %v3999_v54  ;;  %v1753_v4 = vrot.slane %v4164_v48, %v4037_v56 }
 0x5af   :  { %2015 = vmatprep.subr.bf16.mxu0 %v1689_v13  ;;  %2101 = vmatprep.subr.bf16.mxu1 %v1691_v20  ;;  %v1749_v20 = vrot.slane %v4164_v48, %v4002_v45 }
 0x5b2   :  { %2016 = vmatpush1.bf16.msra.mxu0 %v1688_v29  ;;  %2102 = vmatpush1.bf16.msra.mxu1 %v1690_v40  ;;  %v1757_v29 = vrot.slane %v4164_v48, %v4043_v34 }
 0x5b3   :  { %2017 = vmatprep.subr.bf16.mxu0 %v1697_v23  ;;  %2103 = vmatprep.subr.bf16.mxu1 %v1699_v31 }
 0x5b6   :  { %2018 = vmatpush1.bf16.msra.mxu0 %v1696_v41  ;;  %2104 = vmatpush1.bf16.msra.mxu1 %v1698_v6 }
 0x5b7   :  { %2019 = vmatprep.subr.bf16.mxu0 %v1705_v33  ;;  %2105 = vmatprep.subr.bf16.mxu1 %v1707_v7 }
 0x5ba   :  { %2020 = vmatpush1.bf16.msra.mxu0 %v1704_v14  ;;  %2106 = vmatpush1.bf16.msra.mxu1 %v1706_v5 }
 0x5bb   :  { %2021 = vmatprep.subr.bf16.mxu0 %v1713_v15  ;;  %2107 = vmatprep.subr.bf16.mxu1 %v1715_v46 }
 0x5be   :  { %2022 = vmatpush1.bf16.msra.mxu0 %v1712_v47  ;;  %2108 = vmatpush1.bf16.msra.mxu1 %v1714_v57 }
 0x5bf   :  { %2023 = vmatprep.subr.bf16.mxu0 %v1721_v63  ;;  %2109 = vmatprep.subr.bf16.mxu1 %v1723_v60 }
 0x5c2   :  { %2024 = vmatpush1.bf16.msra.mxu0 %v1720_v21  ;;  %2110 = vmatpush1.bf16.msra.mxu1 %v1722_v22 }
 0x5c3   :  { %2025 = vmatprep.subr.bf16.mxu0 %v1729_v30  ;;  %2111 = vmatprep.subr.bf16.mxu1 %v1731_v35 }
 0x5c6   :  { %2026 = vmatpush1.bf16.msra.mxu0 %v1728_v50  ;;  %2112 = vmatpush1.bf16.msra.mxu1 %v1730_v43 }
 0x5c7   :  { %2027 = vmatprep.subr.bf16.mxu0 %v1737_v59  ;;  %2113 = vmatprep.subr.bf16.mxu1 %v1739_v42 }
 0x5ca   :  { %2028 = vmatpush1.bf16.msra.mxu0 %v1736_v58  ;;  %2114 = vmatpush1.bf16.msra.mxu1 %v1738_v49 }
 0x5cd   :  { %2030 = vmatmul.mubr.bf16.vlgmr.msra.gmra.mrb[20].mxu0 %v4141_v44  ;;  %2116 = vmatmul.mubr.bf16.vlgmr.msra.gmra.mrb[12].mxu1 %v4141_v44 }
 0x620   :  { %v1859_v38 = vpop.f32.mrb[16].mxu0  ;;  %v1945_v61 = vpop.f32.mrb[8].mxu1 }
 0x621   :  { %v1861_v62 = vpop.f32.mrb[17].mxu0  ;;  %v1947_v37 = vpop.f32.mrb[9].mxu1  ;;  %v4178_v40 = vadd.f32 %v1859_v38, %v1745_v51  ;;  %v4180_v23 = vadd.f32 %v1945_v61, %v1753_v4 }
 0x622   :  { %v1863_v55 = vpop.f32.mrb[18].mxu0  ;;  %v1949_v36 = vpop.f32.mrb[10].mxu1  ;;  %v4190_v7 = vadd.f32 %v1861_v62, %v1749_v20  ;;  %v4192_v14 = vadd.f32 %v1947_v37, %v1757_v29 }
 0x623   :  { %v1865_v32 = vpop.f32.mrb[19].mxu0  ;;  %v1951_v52 = vpop.f32.mrb[11].mxu1  ;;  %v4170_v44 = vadd.f32 %v1863_v55, %v1745_v51  ;;  %v4172_v13 = vadd.f32 %v1949_v36, %v1753_v4 }
 0x624   :  { %v4182_v31 = vadd.f32 %v1865_v32, %v1749_v20  ;;  %v4184_v41 = vadd.f32 %v1951_v52, %v1757_v29 }
 0x625   :  { %v2128_v6 = vadd.f32 %v4170_v44, %v4178_v40  ;;  %v2142_v33 = vadd.f32 %v4172_v13, %v4180_v23 }
 0x626   :  { %v2135_v5 = vadd.f32 %v4182_v31, %v4190_v7  ;;  %v2149_v15 = vadd.f32 %v4184_v41, %v4192_v14 }
 0x627   :  { %v2129_v46 = vrot.slane %v2128_v6, 4  ;;  %v2143_v47 = vrot.slane %v2142_v33, 4 }
 0x628   :  { %v2136_v57 = vrot.slane %v2135_v5, 4  ;;  %v2150_v63 = vrot.slane %v2149_v15, 4 }
 0x629   :  { %v2130_v60 = vadd.f32 %v2129_v46, %v2128_v6  ;;  %v2144_v21 = vadd.f32 %v2143_v47, %v2142_v33 }
 0x62a   :  { %v2137_v22 = vadd.f32 %v2136_v57, %v2135_v5  ;;  %v2151_v30 = vadd.f32 %v2150_v63, %v2149_v15 }
 0x62b   :  { %v2131_v35 = vrot.slane %v2130_v60, 2  ;;  %v2145_v50 = vrot.slane %v2144_v21, 2 }
 0x62c   :  { %v2138_v43 = vrot.slane %v2137_v22, 2  ;;  %v2152_v59 = vrot.slane %v2151_v30, 2 }
 0x62d   :  { %v2132_v42 = vadd.f32 %v2131_v35, %v2130_v60  ;;  %v2146_v58 = vadd.f32 %v2145_v50, %v2144_v21 }
 0x62e   :  { %v2139_v49 = vadd.f32 %v2138_v43, %v2137_v22  ;;  %v2153_v38 = vadd.f32 %v2152_v59, %v2151_v30 }
 0x62f   :  { %v2133_v61 = vrot.slane %v2132_v42, 1  ;;  %v2147_v62 = vrot.slane %v2146_v58, 1 }
 0x630   :  { %v2140_v37 = vrot.slane %v2139_v49, 1  ;;  %v2154_v55 = vrot.slane %v2153_v38, 1 }
 0x631   :  { %v2134_v36 = vadd.f32 %v2133_v61, %v2132_v42  ;;  %v2148_v32 = vadd.f32 %v2147_v62, %v2146_v58  ;;  %v4226_v61 = vsub.s32 6, %v3996_v39  ;;  %v4229_v62 = vsub.s32 5, %v3996_v39 }
 0x632   :  { %v2141_v52 = vadd.f32 %v2140_v37, %v2139_v49  ;;  %v2155_v51 = vadd.f32 %v2154_v55, %v2153_v38  ;;  %v4223_v38 = vsub.s32 4, %v3996_v39  ;;  %v4232_v37 = vsub.s32 7, %v3996_v39 }
 0x633   :  { %v4198_v4 = vmul.f32 0.0625, %v2134_v36  ;;  %v4200_v20 = vmul.f32 0.0625, %v2148_v32 }
 0x634   :  { %v4202_v29 = vmul.f32 0.0625, %v2141_v52  ;;  %v4204_v6 = vmul.f32 0.0625, %v2155_v51  ;;  %v1761_v51 = vrot.slane %v4164_v48, %v4223_v38 }
 0x635   :  { %v2192_v33 = vsub.f32 %v4178_v40, %v4198_v4  ;;  %v2200_v5 = vsub.f32 %v4170_v44, %v4198_v4  ;;  %v2194_v15 = vsub.f32 %v4180_v23, %v4200_v20  ;;  %v2202_v46 = vsub.f32 %v4172_v13, %v4200_v20 }
 0x636   :  { %v2193_v47 = vsub.f32 %v4190_v7, %v4202_v29  ;;  %v2201_v57 = vsub.f32 %v4182_v31, %v4202_v29  ;;  %v2195_v63 = vsub.f32 %v4192_v14, %v4204_v6  ;;  %v2203_v60 = vsub.f32 %v4184_v41, %v4204_v6 }
 0x637   :  { %v2208_v21 = vmul.f32 %v2192_v33, %v2192_v33  ;;  %v2216_v22 = vmul.f32 %v2200_v5, %v2200_v5  ;;  %v2210_v30 = vmul.f32 %v2194_v15, %v2194_v15  ;;  %v2218_v35 = vmul.f32 %v2202_v46, %v2202_v46 }
 0x638   :  { %v2209_v50 = vmul.f32 %v2193_v47, %v2193_v47  ;;  %v2217_v43 = vmul.f32 %v2201_v57, %v2201_v57  ;;  %v2211_v58 = vmul.f32 %v2195_v63, %v2195_v63  ;;  %v2219_v49 = vmul.f32 %v2203_v60, %v2203_v60 }
 0x639   :  { %v2224_v59 = vadd.f32 %v2216_v22, %v2208_v21  ;;  %v2238_v42 = vadd.f32 %v2218_v35, %v2210_v30  ;;  %v1769_v33 = vrot.slane %v4164_v48, %v4226_v61  ;;  %v1765_v46 = vrot.slane %v4164_v48, %v4229_v62 }
 0x63a   :  { %v2231_v32 = vadd.f32 %v2217_v43, %v2209_v50  ;;  %v2245_v52 = vadd.f32 %v2219_v49, %v2211_v58  ;;  %v1773_v47 = vrot.slane %v4164_v48, %v4232_v37 }
 0x63b   :  { %v2225_v55 = vrot.slane %v2224_v59, 4  ;;  %v2239_v36 = vrot.slane %v2238_v42, 4 }
 0x63c   :  { %v2232_v21 = vrot.slane %v2231_v32, 4  ;;  %v2246_v22 = vrot.slane %v2245_v52, 4 }
 0x63d   :  { %v2226_v63 = vadd.f32 %v2225_v55, %v2224_v59  ;;  %v2240_v60 = vadd.f32 %v2239_v36, %v2238_v42 }
 0x6a0   :  { %v2031_v5 = vpop.f32.mrb[20].mxu0  ;;  %v2117_v15 = vpop.f32.mrb[12].mxu1 }
 0x6a1   :  { %v2033_v39 = vpop.f32.mrb[21].mxu0  ;;  %v2119_v57 = vpop.f32.mrb[13].mxu1  ;;  %v4242_v50 = vadd.f32 %v2031_v5, %v1761_v51  ;;  %v4244_v43 = vadd.f32 %v2117_v15, %v1769_v33  ;;  %v2233_v5 = vadd.f32 %v2232_v21, %v2231_v32  ;;  %v2247_v15 = vadd.f32 %v2246_v22, %v2245_v52 }
 0x6a2   :  { %v2035_v30 = vpop.f32.mrb[22].mxu0  ;;  %v2121_v35 = vpop.f32.mrb[14].mxu1  ;;  %v4250_v19 = vadd.f32 %v2033_v39, %v1765_v46  ;;  %v4252_v48 = vadd.f32 %v2119_v57, %v1773_v47 }
 0x6a3   :  { %v4246_v58 = vadd.f32 %v2035_v30, %v1761_v51  ;;  %v4248_v49 = vadd.f32 %v2121_v35, %v1769_v33  ;;  %v2037_v28 = vpop.f32.mrb[23].mxu0  ;;  %v2123_v12 = vpop.f32.mrb[15].mxu1  ;;  %v2234_v11 = vrot.slane %v2233_v5, 2  ;;  %v2248_v18 = vrot.slane %v2247_v15, 2 }
 0x6a4   :  { %v4254_v59 = vadd.f32 %v2037_v28, %v1765_v46  ;;  %v4256_v42 = vadd.f32 %v2123_v12, %v1773_v47  ;;  %v2227_v28 = vrot.slane %v2226_v63, 2  ;;  %v2241_v46 = vrot.slane %v2240_v60, 2 }
 0x6a5   :  { %4563 = vst [vmem:[#allocation74_spill] sm:$0xff] %v4248_v49  ;;  %v2156_v55 = vadd.f32 %v4246_v58, %v4242_v50  ;;  %v2170_v36 = vadd.f32 %v4248_v49, %v4244_v43  ;;  %v2235_v9 = vadd.f32 %v2234_v11, %v2233_v5  ;;  %v2249_v16 = vadd.f32 %v2248_v18, %v2247_v15 }
 0x6a6   :  { %4564 = vst [vmem:[#allocation75_spill] sm:$0xff] %v4254_v59  ;;  %4565 = vst [vmem:[#allocation76_spill] sm:$0xff] %v4256_v42  ;;  %v2163_v51 = vadd.f32 %v4254_v59, %v4250_v19  ;;  %v2177_v33 = vadd.f32 %v4256_v42, %v4252_v48  ;;  %v2228_v10 = vadd.f32 %v2227_v28, %v2226_v63 }
 0x6a7   :  { %v2157_v39 = vrot.slane %v2156_v55, 4  ;;  %v2171_v57 = vrot.slane %v2170_v36, 4  ;;  %v2242_v17 = vadd.f32 %v2241_v46, %v2240_v60  ;;  %v2236_v63 = vrot.slane %v2235_v9, 1 }
 0x6a8   :  { %v2164_v12 = vrot.slane %v2163_v51, 4  ;;  %v2178_v47 = vrot.slane %v2177_v33, 4  ;;  %v2250_v60 = vrot.slane %v2249_v16, 1 }
 0x6a9   :  { %v2158_v30 = vadd.f32 %v2157_v39, %v2156_v55  ;;  %v2172_v35 = vadd.f32 %v2171_v57, %v2170_v36  ;;  %v2229_v55 = vrot.slane %v2228_v10, 1  ;;  %v2243_v36 = vrot.slane %v2242_v17, 1 }
 0x6aa   :  { %v2165_v3 = vadd.f32 %v2164_v12, %v2163_v51  ;;  %v2179_v27 = vadd.f32 %v2178_v47, %v2177_v33 }
 0x6ab   :  { %v2159_v2 = vrot.slane %v2158_v30, 2  ;;  %v2173_v26 = vrot.slane %v2172_v35, 2 }
 0x6ac   :  { %v2166_v1 = vrot.slane %v2165_v3, 2  ;;  %v2180_v25 = vrot.slane %v2179_v27, 2 }
 0x6ad   :  { %v2160_v32 = vadd.f32 %v2159_v2, %v2158_v30  ;;  %v2174_v52 = vadd.f32 %v2173_v26, %v2172_v35 }
 0x6ae   :  { %v2167_v21 = vadd.f32 %v2166_v1, %v2165_v3  ;;  %v2181_v22 = vadd.f32 %v2180_v25, %v2179_v27  ;;  %v2230_v1 = vadd.f32 %v2229_v55, %v2228_v10  ;;  %v2244_v3 = vadd.f32 %v2243_v36, %v2242_v17 }
 0x6af   :  { %v2161_v0 = vrot.slane %v2160_v32, 1  ;;  %v2175_v24 = vrot.slane %v2174_v52, 1  ;;  %v2237_v55 = vadd.f32 %v2236_v63, %v2235_v9 }
 0x6b0   :  { %v2168_v51 = vrot.slane %v2167_v21, 1  ;;  %v2182_v33 = vrot.slane %v2181_v22, 1 }
 0x6b1   :  { %v2162_v39 = vadd.f32 %v2161_v0, %v2160_v32  ;;  %v2176_v57 = vadd.f32 %v2175_v24, %v2174_v52 }
 0x6b2   :  { %v2169_v12 = vadd.f32 %v2168_v51, %v2167_v21  ;;  %v2183_v47 = vadd.f32 %v2182_v33, %v2181_v22  ;;  %v2251_v33 = vadd.f32 %v2250_v60, %v2249_v16 }
 0x6b3   :  { %v4266_v28 = vmul.f32 0.0625, %v2162_v39  ;;  %v4268_v2 = vmul.f32 0.0625, %v2176_v57 }
 0x6b4   :  { %v4270_v11 = vmul.f32 0.0625, %v2169_v12  ;;  %v4272_v18 = vmul.f32 0.0625, %v2183_v47  ;;  %v2280_v12 = vmul.f32 0.0625, %v2230_v1 }
 0x6b5   :  { %v2196_v25 = vsub.f32 %v4242_v50, %v4266_v28  ;;  %v2204_v0 = vsub.f32 %v4246_v58, %v4266_v28  ;;  %v2198_v24 = vsub.f32 %v4244_v43, %v4268_v2  ;;  %v2206_v26 = vsub.f32 %v4248_v49, %v4268_v2 }
 0x6b6   :  { %v2197_v10 = vsub.f32 %v4250_v19, %v4270_v11  ;;  %v2205_v17 = vsub.f32 %v4254_v59, %v4270_v11  ;;  %v2199_v27 = vsub.f32 %v4252_v48, %v4272_v18  ;;  %v2207_v5 = vsub.f32 %v4256_v42, %v4272_v18 }
 0x6b7   :  { %v2212_v15 = vmul.f32 %v2196_v25, %v2196_v25  ;;  %v2220_v46 = vmul.f32 %v2204_v0, %v2204_v0  ;;  %v2214_v30 = vmul.f32 %v2198_v24, %v2198_v24  ;;  %v2222_v35 = vmul.f32 %v2206_v26, %v2206_v26 }
 0x6b8   :  { %v2213_v32 = vmul.f32 %v2197_v10, %v2197_v10  ;;  %v2221_v52 = vmul.f32 %v2205_v17, %v2205_v17  ;;  %v2215_v21 = vmul.f32 %v2199_v27, %v2199_v27  ;;  %v2223_v22 = vmul.f32 %v2207_v5, %v2207_v5 }
 0x6b9   :  { %v2252_v36 = vadd.f32 %v2220_v46, %v2212_v15  ;;  %v2266_v51 = vadd.f32 %v2222_v35, %v2214_v30  ;;  %v2282_v49 = vmul.f32 0.0625, %v2244_v3  ;;  %v2281_v25 = vmul.f32 0.0625, %v2237_v55 }
 0x6ba   :  { %v2259_v39 = vadd.f32 %v2221_v52, %v2213_v32  ;;  %v2273_v57 = vadd.f32 %v2223_v22, %v2215_v21  ;;  %v2283_v26 = vmul.f32 0.0625, %v2251_v33  ;;  %v2288_v27 = vadd.f32 0.8, %v2280_v12 }
 0x6bb   :  { %v2253_v47 = vrot.slane %v2252_v36, 4  ;;  %v2267_v8 = vrot.slane %v2266_v51, 4  ;;  %v2290_v63 = vadd.f32 0.8, %v2282_v49  ;;  %v2289_v60 = vadd.f32 0.8, %v2281_v25 }
 0x6bc   :  { %v2260_v59 = vrot.slane %v2259_v39, 4  ;;  %v2274_v42 = vrot.slane %v2273_v57, 4  ;;  %v2291_v30 = vadd.f32 0.8, %v2283_v26  ;;  %3257 = vrsqrt.f32 %v2288_v27 }
 0x6bd   :  { %v2254_v0 = vadd.f32 %v2253_v47, %v2252_v36  ;;  %v2268_v24 = vadd.f32 %v2267_v8, %v2266_v51  ;;  %3259 = vrsqrt.f32 %v2290_v63 }
 0x6be   :  { %v2261_v10 = vadd.f32 %v2260_v59, %v2259_v39  ;;  %v2275_v17 = vadd.f32 %v2274_v42, %v2273_v57  ;;  %3261 = vrsqrt.f32 %v2289_v60 }
 0x6bf   :  { %v2255_v5 = vrot.slane %v2254_v0, 2  ;;  %v2269_v9 = vrot.slane %v2268_v24, 2  ;;  %3263 = vrsqrt.f32 %v2291_v30 }
 0x6c0   :  { %v2262_v15 = vrot.slane %v2261_v10, 2  ;;  %v2276_v16 = vrot.slane %v2275_v17, 2 }
 0x6c1   :  { %v2256_v46 = vadd.f32 %v2255_v5, %v2254_v0  ;;  %v2270_v1 = vadd.f32 %v2269_v9, %v2268_v24 }
 0x6c2   :  { %v2263_v35 = vadd.f32 %v2262_v15, %v2261_v10  ;;  %v2277_v3 = vadd.f32 %v2276_v16, %v2275_v17 }
 0x6c3   :  { %v2257_v32 = vrot.slane %v2256_v46, 1  ;;  %v2271_v52 = vrot.slane %v2270_v1, 1 }
 0x6c4   :  { %v2264_v8 = vrot.slane %v2263_v35, 1  ;;  %v2278_v21 = vrot.slane %v2277_v3, 1 }
 0x6c5   :  { %v2258_v59 = vadd.f32 %v2257_v32, %v2256_v46  ;;  %v2272_v42 = vadd.f32 %v2271_v52, %v2270_v1 }
 0x6c6   :  { %v2265_v22 = vadd.f32 %v2264_v8, %v2263_v35  ;;  %v2279_v49 = vadd.f32 %v2278_v21, %v2277_v3  ;;  %v3258_v25 = vpop.eup %3257  ;;  %v2126_v8 = vld [vmem:[%s4476_s15] sm:$0xff] }
 0x6c7   :  { %v2284_v55 = vmul.f32 0.0625, %v2258_v59  ;;  %v2286_v36 = vmul.f32 0.0625, %v2272_v42  ;;  %v3260_v0 = vpop.eup %3259 }
 0x6c8   :  { %v2285_v51 = vmul.f32 0.0625, %v2265_v22  ;;  %v2287_v33 = vmul.f32 0.0625, %v2279_v49  ;;  %v3262_v24 = vpop.eup %3261 }
 0x6c9   :  { %v2292_v39 = vadd.f32 0.8, %v2284_v55  ;;  %v2294_v57 = vadd.f32 0.8, %v2286_v36  ;;  %v3264_v26 = vpop.eup %3263  ;;  %v2312_v10 = vcombine.low %v3258_v25, %v3262_v24 }
 0x6ca   :  { %v2293_v12 = vadd.f32 0.8, %v2285_v51  ;;  %v2295_v47 = vadd.f32 0.8, %v2287_v33  ;;  %v2313_v17 = vcombine.low %v3260_v0, %v3264_v26 }
 0x6cb   :  { %3265 = vrsqrt.f32 %v2292_v39  ;;  %v2322_v63 = vrot.slane %v2312_v10, %v4018_v53 }
 0x6cc   :  { %3267 = vrsqrt.f32 %v2294_v57  ;;  %v2329_v15 = vrot.slane %v2313_v17, %v4018_v53 }
 0x6cd   :  { %3269 = vrsqrt.f32 %v2293_v12 }
 0x6ce   :  { %3271 = vrsqrt.f32 %v2295_v47  ;;  %v2344_v30 = vcombine.low %v2322_v63, %v2329_v15 }
 0x6d0   :  { %v2352_v32 = vrot.slane %v2344_v30, %v4018_v53 }
 0x6d5   :  { %v3266_v27 = vpop.eup %3265 }
 0x6d6   :  { %v3268_v5 = vpop.eup %3267 }
 0x6d7   :  { %v3270_v9 = vpop.eup %3269 }
 0x6d8   :  { %v3272_v16 = vpop.eup %3271  ;;  %v2314_v60 = vcombine.low %v3266_v27, %v3270_v9 }
 0x6d9   :  { %v2315_v46 = vcombine.low %v3268_v5, %v3272_v16 }
 0x6da   :  { %v2336_v1 = vrot.slane %v2314_v60, %v4018_v53 }
 0x6db   :  { %v2343_v35 = vrot.slane %v2315_v46, %v4018_v53 }
 0x6dd   :  { %v2345_v3 = vcombine.low %v2336_v1, %v2343_v35 }
 0x6df   :  { %v2359_v52 = vrot.slane %v2345_v3, %v4018_v53 }
 0x6e1   :  { %v2360_v21 = vcombine.low %v2352_v32, %v2359_v52 }
 0x6e3   :  { %v2362_v59 = vmul.f32 %v2360_v21, %v2126_v8 }
 0x6e5   :  { %v2367_v42 = vrot.slane %v2362_v59, %v3999_v54  ;;  %v2371_v22 = vrot.slane %v2362_v59, %v4002_v45  ;;  %v2375_v49 = vrot.slane %v2362_v59, %v4037_v56  ;;  %v2379_v55 = vrot.slane %v2362_v59, %v4043_v34 }
 0x6e6   :  { %v2383_v36 = vrot.slane %v2362_v59, %v4223_v38  ;;  %v2387_v51 = vrot.slane %v2362_v59, %v4229_v62  ;;  %v2391_v33 = vrot.slane %v2362_v59, %v4226_v61  ;;  %v2395_v39 = vrot.slane %v2362_v59, %v4232_v37 }
 0x6e7   :  { %v2404_v57 = vmul.f32 %v2367_v42, %v4198_v4  ;;  %v2405_v12 = vmul.f32 %v2371_v22, %v4202_v29  ;;  %v2406_v47 = vmul.f32 %v2375_v49, %v4200_v20  ;;  %v2407_v25 = vmul.f32 %v2379_v55, %v4204_v6 }
 0x6e8   :  { %v2408_v0 = vmul.f32 %v2383_v36, %v4266_v28  ;;  %v2409_v24 = vmul.f32 %v2387_v51, %v4270_v11  ;;  %v2410_v26 = vmul.f32 %v2391_v33, %v4268_v2  ;;  %v2411_v10 = vmul.f32 %v2395_v39, %v4272_v18  ;;  %v2127_v18 = vld [vmem:[%s4477_s16] sm:$0xff] }
 0x6e9   :  { %v2420_v17 = vcombine.low %v2404_v57, %v2405_v12  ;;  %v2421_v27 = vcombine.low %v2406_v47, %v2407_v25  ;;  %v2471_v15 = vmul.f32 %v4178_v40, %v2367_v42  ;;  %v2472_v16 = vmul.f32 %v4190_v7, %v2371_v22 }
 0x6ea   :  { %v2422_v5 = vcombine.low %v2408_v0, %v2409_v24  ;;  %v2423_v9 = vcombine.low %v2410_v26, %v2411_v10  ;;  %v2473_v46 = vmul.f32 %v4180_v23, %v2375_v49  ;;  %v2474_v1 = vmul.f32 %v4192_v14, %v2379_v55  ;;  %v4566_v14 = vld [vmem:[#allocation75_spill] sm:$0xff] }
 0x6eb   :  { %v2430_v4 = vrot.slane %v2420_v17, %v4018_v53  ;;  %v2437_v29 = vrot.slane %v2421_v27, %v4018_v53  ;;  %v2475_v30 = vmul.f32 %v4242_v50, %v2383_v36  ;;  %v2476_v35 = vmul.f32 %v4250_v19, %v2387_v51  ;;  %v4567_v50 = vld [vmem:[#allocation74_spill] sm:$0xff]  ;;  %v4568_v19 = vld [vmem:[#allocation76_spill] sm:$0xff] }
 0x6ec   :  { %v2444_v20 = vrot.slane %v2422_v5, %v4018_v53  ;;  %v2451_v6 = vrot.slane %v2423_v9, %v4018_v53  ;;  %v2477_v3 = vmul.f32 %v4244_v43, %v2391_v33  ;;  %v2479_v32 = vmul.f32 %v4170_v44, %v2367_v42 }
 0x6ed   :  { %v2452_v63 = vcombine.low %v2430_v4, %v2437_v29  ;;  %v2480_v40 = vmul.f32 %v4182_v31, %v2371_v22  ;;  %v2481_v7 = vmul.f32 %v4172_v13, %v2375_v49  ;;  %v2482_v8 = vmul.f32 %v4184_v41, %v2379_v55 }
 0x6ee   :  { %v2453_v28 = vcombine.low %v2444_v20, %v2451_v6  ;;  %v2483_v23 = vmul.f32 %v4246_v58, %v2383_v36  ;;  %v2484_v21 = vmul.f32 %v4566_v14, %v2387_v51  ;;  %v2485_v59 = vmul.f32 %v4567_v50, %v2391_v33 }
 0x6ef   :  { %v2460_v11 = vrot.slane %v2452_v63, %v4018_v53  ;;  %v2486_v57 = vmul.f32 %v4568_v19, %v2395_v39 }
 0x6f0   :  { %v2467_v2 = vrot.slane %v2453_v28, %v4018_v53  ;;  %v2478_v53 = vmul.f32 %v4252_v48, %v2395_v39 }
 0x6f2   :  { %v2468_v60 = vcombine.low %v2460_v11, %v2467_v2 }
 0x6f4   :  { %v2470_v52 = vsub.f32 %v2127_v18, %v2468_v60 }
 0x6f6   :  { %v2491_v43 = vrot.slane %v2470_v52, %v3999_v54  ;;  %v2495_v48 = vrot.slane %v2470_v52, %v4002_v45  ;;  %v2499_v44 = vrot.slane %v2470_v52, %v4037_v56  ;;  %v2503_v31 = vrot.slane %v2470_v52, %v4043_v34 }
 0x6f7   :  { %v2507_v13 = vrot.slane %v2470_v52, %v4223_v38  ;;  %v2511_v41 = vrot.slane %v2470_v52, %v4229_v62  ;;  %v2515_v58 = vrot.slane %v2470_v52, %v4226_v61  ;;  %v2519_v42 = vrot.slane %v2470_v52, %v4232_v37 }
 0x6f8   :  { %v2528_v22 = vadd.f32 %v2491_v43, %v2471_v15  ;;  %v2529_v49 = vadd.f32 %v2495_v48, %v2472_v16  ;;  %v2530_v55 = vadd.f32 %v2499_v44, %v2473_v46  ;;  %v2531_v36 = vadd.f32 %v2503_v31, %v2474_v1 }
 0x6f9   :  { %v2532_v51 = vadd.f32 %v2507_v13, %v2475_v30  ;;  %v2533_v54 = vadd.f32 %v2511_v41, %v2476_v35  ;;  %v2534_v33 = vadd.f32 %v2515_v58, %v2477_v3  ;;  %v2535_v45 = vadd.f32 %v2519_v42, %v2478_v53 }
 0x6fa   :  { %v2536_v39 = vadd.f32 %v2491_v43, %v2479_v32  ;;  %v2537_v56 = vadd.f32 %v2495_v48, %v2480_v40  ;;  %v2538_v12 = vadd.f32 %v2499_v44, %v2481_v7  ;;  %v2539_v34 = vadd.f32 %v2503_v31, %v2482_v8  ;;  %v4569_v43 = vld [vmem:[#allocation18_spill] sm:$0xff] }
 0x6fb   :  { %v2540_v47 = vadd.f32 %v2507_v13, %v2483_v23  ;;  %v2541_v38 = vadd.f32 %v2511_v41, %v2484_v21  ;;  %v2542_v25 = vadd.f32 %v2515_v58, %v2485_v59  ;;  %v2543_v62 = vadd.f32 %v2519_v42, %v2486_v57  ;;  %2969 = vmatprep.subr.bf16.mxu0 %v4569_v43  ;;  %v4570_v48 = vld [vmem:[#allocation34_spill] sm:$0xff] }
 0x6fc   :  { %vm2544_vm4 = vcmp.gt.f32.partialorder %v2528_v22, 0.0  ;;  %vm2545_vm5 = vcmp.gt.f32.partialorder %v2529_v49, 0.0  ;;  %vm2546_vm6 = vcmp.gt.f32.partialorder %v2530_v55, 0.0  ;;  %vm2547_vm7 = vcmp.gt.f32.partialorder %v2531_v36, 0.0  ;;  %2991 = vmatprep.subr.bf16.mxu1 %v4570_v48 }
 0x6fd   :  { %vm2548_vm8 = vcmp.gt.f32.partialorder %v2532_v51, 0.0  ;;  %vm2549_vm9 = vcmp.gt.f32.partialorder %v2533_v54, 0.0  ;;  %vm2550_vm10 = vcmp.gt.f32.partialorder %v2534_v33, 0.0  ;;  %vm2551_vm11 = vcmp.gt.f32.partialorder %v2535_v45, 0.0 }
 0x6fe   :  { %vm2552_vm12 = vcmp.gt.f32.partialorder %v2536_v39, 0.0  ;;  %vm2553_vm13 = vcmp.gt.f32.partialorder %v2537_v56, 0.0  ;;  %vm2554_vm14 = vcmp.gt.f32.partialorder %v2538_v12, 0.0  ;;  %vm2555_vm15 = vcmp.gt.f32.partialorder %v2539_v34, 0.0 }
 0x6ff   :  { %vm2556_vm0 = vcmp.gt.f32.partialorder %v2540_v47, 0.0  ;;  %vm2557_vm1 = vcmp.gt.f32.partialorder %v2541_v38, 0.0  ;;  %vm2558_vm2 = vcmp.gt.f32.partialorder %v2542_v25, 0.0  ;;  %vm2559_vm3 = vcmp.gt.f32.partialorder %v2543_v62, 0.0 }
 0x700   :  { %v2560_v61 = vmul.f32 0.2, %v2528_v22  ;;  %v2561_v37 = vmul.f32 0.2, %v2529_v49  ;;  %v2562_v0 = vmul.f32 0.2, %v2530_v55 }
 0x701   :  { %v2563_v24 = vmul.f32 0.2, %v2531_v36  ;;  %v2564_v26 = vmul.f32 0.2, %v2532_v51  ;;  %v2565_v10 = vmul.f32 0.2, %v2533_v54 }
 0x702   :  { %v2566_v17 = vmul.f32 0.2, %v2534_v33  ;;  %v2567_v27 = vmul.f32 0.2, %v2535_v45  ;;  %v2568_v5 = vmul.f32 0.2, %v2536_v39  ;;  %v4349_v9 = vsel %vm2544_vm4, %v2528_v22, %v2560_v61 }
 0x703   :  { %v2569_v4 = vmul.f32 0.2, %v2537_v56  ;;  %v2570_v29 = vmul.f32 0.2, %v2538_v12  ;;  %v2571_v20 = vmul.f32 0.2, %v2539_v34  ;;  %v2577_v6 = vsel %vm2545_vm5, %v2529_v49, %v2561_v37 }
 0x704   :  { %v2572_v63 = vmul.f32 0.2, %v2540_v47  ;;  %v2573_v28 = vmul.f32 0.2, %v2541_v38  ;;  %v2574_v11 = vmul.f32 0.2, %v2542_v25  ;;  %v2578_v2 = vsel %vm2546_vm6, %v2530_v55, %v2562_v0 }
 0x705   :  { %v2575_v18 = vmul.f32 0.2, %v2543_v62  ;;  %v2579_v15 = vsel %vm2547_vm7, %v2531_v36, %v2563_v24  ;;  %v4355_v16 = vsel %vm2548_vm8, %v2532_v51, %v2564_v26  ;;  %v4358_v60 = vsel %vm2549_vm9, %v2533_v54, %v2565_v10 }
 0x706   :  { %v4361_v46 = vsel %vm2550_vm10, %v2534_v33, %v2566_v17  ;;  %v2583_v1 = vsel %vm2551_vm11, %v2535_v45, %v2567_v27  ;;  %v2584_v30 = vsel %vm2552_vm12, %v2536_v39, %v2568_v5  ;;  %v2585_v35 = vsel %vm2553_vm13, %v2537_v56, %v2569_v4 }
 0x707   :  { %v2586_v3 = vsel %vm2554_vm14, %v2538_v12, %v2570_v29  ;;  %v2587_v53 = vsel %vm2555_vm15, %v2539_v34, %v2571_v20  ;;  %v4369_v32 = vsel %vm2556_vm0, %v2540_v47, %v2572_v63  ;;  %v2589_v52 = vsel %vm2557_vm1, %v2541_v38, %v2573_v28 }
 0x708   :  { %v4373_v40 = vsel %vm2558_vm2, %v2542_v25, %v2574_v11  ;;  %v2591_v7 = vsel %vm2559_vm3, %v2543_v62, %v2575_v18  ;;  %v2592_v8 = vpack.c.bf16 %v2584_v30, %v4349_v9  ;;  %v2593_v23 = vpack.c.bf16 %v2585_v35, %v2577_v6 }
 0x709   :  { %v2594_v14 = vpack.c.bf16 %v2586_v3, %v2578_v2  ;;  %v2595_v21 = vpack.c.bf16 %v2587_v53, %v2579_v15  ;;  %v2596_v50 = vpack.c.bf16 %v4369_v32, %v4355_v16  ;;  %v2597_v59 = vpack.c.bf16 %v2589_v52, %v4358_v60 }
 0x70a   :  { %v2598_v19 = vpack.c.bf16 %v4373_v40, %v4361_v46  ;;  %v2599_v57 = vpack.c.bf16 %v2591_v7, %v2583_v1 }
 0x70b   :  { %3279 = dma.done.wait [#allocation4 + $0x1], 8192 }
 0x70c   :  { %3280 = vsyncadd [#allocation4 + $0x1], 4294959104  ;;  %v4571_v44 = vld [vmem:[#allocation10_spill] sm:$0xff]  ;;  %v4573_v13 = vld [vmem:[#allocation19_spill] sm:$0xff]  ;;  %2707 = vmatprep.mubr.bf16.mxu0 %v2593_v23  ;;  %2748 = vmatprep.mubr.bf16.mxu1 %v2595_v21  ;;  %vm2841_vm4 = vcmask 523264  }
 0x70d   :  { %2970 = vmatpush3.bf16.msra.mxu0 %v4571_v44  ;;  %v4572_v31 = vld [vmem:[#allocation26_spill] sm:$0xff]  ;;  %v4574_v41 = vld [vmem:[#allocation35_spill] sm:$0xff]  ;;  %v4577_v22 = vld [vmem:[#allocation20_spill] sm:$0xff] }
 0x70e   :  { %2992 = vmatpush3.bf16.msra.mxu1 %v4572_v31  ;;  %2971 = vmatprep.subr.bf16.mxu0 %v4573_v13  ;;  %v4575_v58 = vld [vmem:[#allocation11_spill] sm:$0xff]  ;;  %v4578_v49 = vld [vmem:[#allocation36_spill] sm:$0xff]  ;;  %v4581_v51 = vld [vmem:[#allocation21_spill] sm:$0xff] }
 0x70f   :  { %2993 = vmatprep.subr.bf16.mxu1 %v4574_v41  ;;  %v4576_v42 = vld [vmem:[#allocation27_spill] sm:$0xff]  ;;  %v4579_v55 = vld [vmem:[#allocation12_spill] sm:$0xff]  ;;  %v4582_v54 = vld [vmem:[#allocation37_spill] sm:$0xff] }
 0x710   :  { %v4580_v36 = vld [vmem:[#allocation28_spill] sm:$0xff]  ;;  %v4583_v33 = vld [vmem:[#allocation13_spill] sm:$0xff]  ;;  %v4585_v39 = vld [vmem:[#allocation22_spill] sm:$0xff] }
 0x711   :  { %2972 = vmatpush3.bf16.msra.mxu0 %v4575_v58  ;;  %v4584_v45 = vld [vmem:[#allocation29_spill] sm:$0xff]  ;;  %v4586_v56 = vld [vmem:[#allocation38_spill] sm:$0xff]  ;;  %v4589_v47 = vld [vmem:[#allocation23_spill] sm:$0xff] }
 0x712   :  { %2994 = vmatpush3.bf16.msra.mxu1 %v4576_v42  ;;  %2973 = vmatprep.subr.bf16.mxu0 %v4577_v22  ;;  %v4587_v12 = vld [vmem:[#allocation14_spill] sm:$0xff]  ;;  %v4590_v38 = vld [vmem:[#allocation39_spill] sm:$0xff]  ;;  %v4593_v61 = vld [vmem:[#allocation24_spill] sm:$0xff] }
 0x713   :  { %2995 = vmatprep.subr.bf16.mxu1 %v4578_v49  ;;  %v4588_v34 = vld [vmem:[#allocation30_spill] sm:$0xff]  ;;  %v4591_v25 = vld [vmem:[#allocation15_spill] sm:$0xff]  ;;  %v4594_v37 = vld [vmem:[#allocation40_spill] sm:$0xff] }
 0x714   :  { %v4592_v62 = vld [vmem:[#allocation31_spill] sm:$0xff]  ;;  %v4595_v0 = vld [vmem:[#allocation16_spill] sm:$0xff]  ;;  %v4597_v26 = vld [vmem:[#allocation25_spill] sm:$0xff] }
 0x715   :  { %2974 = vmatpush3.bf16.msra.mxu0 %v4579_v55  ;;  %v4596_v24 = vld [vmem:[#allocation32_spill] sm:$0xff]  ;;  %v4598_v10 = vld [vmem:[#allocation41_spill] sm:$0xff]  ;;  %v4601_v5 = vld [vmem:[#allocation50_spill] sm:$0xff] }
 0x716   :  { %2996 = vmatpush3.bf16.msra.mxu1 %v4580_v36  ;;  %2975 = vmatprep.subr.bf16.mxu0 %v4581_v51  ;;  %v4599_v17 = vld [vmem:[#allocation17_spill] sm:$0xff]  ;;  %v4602_v9 = vld [vmem:[#allocation66_spill] sm:$0xff]  ;;  %v4605_v20 = vld [vmem:[#allocation51_spill] sm:$0xff] }
 0x717   :  { %2997 = vmatprep.subr.bf16.mxu1 %v4582_v54  ;;  %v4600_v27 = vld [vmem:[#allocation33_spill] sm:$0xff]  ;;  %v4603_v4 = vld [vmem:[#allocation42_spill] sm:$0xff]  ;;  %v4606_v6 = vld [vmem:[#allocation67_spill] sm:$0xff] }
 0x718   :  { %v4604_v29 = vld [vmem:[#allocation58_spill] sm:$0xff]  ;;  %v4607_v63 = vld [vmem:[#allocation43_spill] sm:$0xff]  ;;  %v4609_v11 = vld [vmem:[#allocation52_spill] sm:$0xff] }
 0x719   :  { %2976 = vmatpush3.bf16.msra.mxu0 %v4583_v33  ;;  %v4608_v28 = vld [vmem:[#allocation59_spill] sm:$0xff]  ;;  %v4610_v2 = vld [vmem:[#allocation68_spill] sm:$0xff]  ;;  %v4613_v60 = vld [vmem:[#allocation53_spill] sm:$0xff] }
 0x71a   :  { %2998 = vmatpush3.bf16.msra.mxu1 %v4584_v45  ;;  %2977 = vmatprep.subr.bf16.mxu0 %v4585_v39  ;;  %v4611_v18 = vld [vmem:[#allocation44_spill] sm:$0xff]  ;;  %v4614_v1 = vld [vmem:[#allocation69_spill] sm:$0xff]  ;;  %v4617_v3 = vld [vmem:[#allocation54_spill] sm:$0xff] }
 0x71b   :  { %2999 = vmatprep.subr.bf16.mxu1 %v4586_v56  ;;  %v4612_v15 = vld [vmem:[#allocation60_spill] sm:$0xff]  ;;  %v4615_v30 = vld [vmem:[#allocation45_spill] sm:$0xff]  ;;  %v4618_v53 = vld [vmem:[#allocation70_spill] sm:$0xff] }
 0x71c   :  { %v4616_v35 = vld [vmem:[#allocation61_spill] sm:$0xff]  ;;  %v4619_v52 = vld [vmem:[#allocation46_spill] sm:$0xff]  ;;  %v4622_v23 = vld [vmem:[#allocation71_spill] sm:$0xff] }
 0x71d   :  { %2978 = vmatpush3.bf16.msra.mxu0 %v4587_v12  ;;  %v4620_v7 = vld [vmem:[#allocation62_spill] sm:$0xff]  ;;  %v4624_v21 = vld [vmem:[#allocation63_spill] sm:$0xff]  ;;  %v4627_v43 = vld [vmem:[#allocation48_spill] sm:$0xff] }
 0x71e   :  { %3000 = vmatpush3.bf16.msra.mxu1 %v4588_v34  ;;  %2979 = vmatprep.subr.bf16.mxu0 %v4589_v47  ;;  %v4628_v48 = vld [vmem:[#allocation64_spill] sm:$0xff]  ;;  %v4629_v44 = vld [vmem:[#allocation57_spill] sm:$0xff]  ;;  %v2960_v22 = vld [vmem:[%s4478_s17] ss:$0 sm:$0xff] }
 0x71f   :  { %3001 = vmatprep.subr.bf16.mxu1 %v4590_v38  ;;  %v4630_v31 = vld [vmem:[#allocation73_spill] sm:$0xff] }
 0x720   :  { %v4631_v13 = vld [vmem:[#allocation49_spill] sm:$0xff] }
 0x721   :  { %2980 = vmatpush3.bf16.msra.mxu0 %v4591_v25  ;;  %v4632_v41 = vld [vmem:[#allocation65_spill] sm:$0xff] }
 0x722   :  { %3002 = vmatpush3.bf16.msra.mxu1 %v4592_v62  ;;  %2981 = vmatprep.subr.bf16.mxu0 %v4593_v61 }
 0x723   :  { %3003 = vmatprep.subr.bf16.mxu1 %v4594_v37 }
 0x725   :  { %2982 = vmatpush3.bf16.msra.mxu0 %v4595_v0 }
 0x726   :  { %3004 = vmatpush3.bf16.msra.mxu1 %v4596_v24  ;;  %2983 = vmatprep.subr.bf16.mxu0 %v4597_v26 }
 0x727   :  { %3005 = vmatprep.subr.bf16.mxu1 %v4598_v10 }
 0x729   :  { %2984 = vmatpush3.bf16.msra.mxu0 %v4599_v17 }
 0x72a   :  { %3006 = vmatpush3.bf16.msra.mxu1 %v4600_v27  ;;  %3013 = vmatprep.subr.bf16.mxu0 %v4601_v5 }
 0x72b   :  { %3035 = vmatprep.subr.bf16.mxu1 %v4602_v9 }
 0x72c   :  { %2708 = vmatmul.mubr.bf16.vlgmr.msra.gmra.mrb[24].mxu0 %v2592_v8  ;;  %v4621_v8 = vld [vmem:[#allocation55_spill] sm:$0xff] }
 0x72d   :  { %2749 = vmatmul.mubr.bf16.vlgmr.msra.gmra.mrb[16].mxu1 %v2594_v14  ;;  %3014 = vmatpush3.bf16.msra.mxu0 %v4603_v4  ;;  %v4623_v14 = vld [vmem:[#allocation47_spill] sm:$0xff] }
 0x72e   :  { %3036 = vmatpush3.bf16.msra.mxu1 %v4604_v29  ;;  %3015 = vmatprep.subr.bf16.mxu0 %v4605_v20 }
 0x72f   :  { %3037 = vmatprep.subr.bf16.mxu1 %v4606_v6  ;;  %2789 = vmatprep.mubr.bf16.mxu0 %v2597_v59  ;;  %v4625_v59 = vld [vmem:[#allocation56_spill] sm:$0xff] }
 0x730   :  { %2830 = vmatprep.mubr.bf16.mxu1 %v2599_v57  ;;  %v4626_v57 = vld [vmem:[#allocation72_spill] sm:$0xff] }
 0x731   :  { %3016 = vmatpush3.bf16.msra.mxu0 %v4607_v63 }
 0x732   :  { %3038 = vmatpush3.bf16.msra.mxu1 %v4608_v28  ;;  %3017 = vmatprep.subr.bf16.mxu0 %v4609_v11 }
 0x733   :  { %3039 = vmatprep.subr.bf16.mxu1 %v4610_v2 }
 0x735   :  { %3018 = vmatpush3.bf16.msra.mxu0 %v4611_v18 }
 0x736   :  { %3040 = vmatpush3.bf16.msra.mxu1 %v4612_v15  ;;  %3019 = vmatprep.subr.bf16.mxu0 %v4613_v60 }
 0x737   :  { %3041 = vmatprep.subr.bf16.mxu1 %v4614_v1 }
 0x739   :  { %3020 = vmatpush3.bf16.msra.mxu0 %v4615_v30 }
 0x73a   :  { %3042 = vmatpush3.bf16.msra.mxu1 %v4616_v35  ;;  %3021 = vmatprep.subr.bf16.mxu0 %v4617_v3 }
 0x73b   :  { %3043 = vmatprep.subr.bf16.mxu1 %v4618_v53 }
 0x73d   :  { %3022 = vmatpush3.bf16.msra.mxu0 %v4619_v52 }
 0x73e   :  { %3044 = vmatpush3.bf16.msra.mxu1 %v4620_v7  ;;  %3023 = vmatprep.subr.bf16.mxu0 %v4621_v8 }
 0x73f   :  { %3045 = vmatprep.subr.bf16.mxu1 %v4622_v23 }
 0x741   :  { %3024 = vmatpush3.bf16.msra.mxu0 %v4623_v14 }
 0x742   :  { %3046 = vmatpush3.bf16.msra.mxu1 %v4624_v21  ;;  %3025 = vmatprep.subr.bf16.mxu0 %v4625_v59 }
 0x743   :  { %3047 = vmatprep.subr.bf16.mxu1 %v4626_v57 }
 0x745   :  { %3026 = vmatpush3.bf16.msra.mxu0 %v4627_v43 }
 0x746   :  { %3048 = vmatpush3.bf16.msra.mxu1 %v4628_v48  ;;  %3027 = vmatprep.subr.bf16.mxu0 %v4629_v44 }
 0x747   :  { %3049 = vmatprep.subr.bf16.mxu1 %v4630_v31 }
 0x749   :  { %3028 = vmatpush3.bf16.msra.mxu0 %v4631_v13 }
 0x74a   :  { %3050 = vmatpush3.bf16.msra.mxu1 %v4632_v41 }
 0x74c   :  { %2790 = vmatmul.mubr.bf16.vlgmr.msra.gmra.mrb[28].mxu0 %v2596_v50 }
 0x74d   :  { %2831 = vmatmul.mubr.bf16.vlgmr.msra.gmra.mrb[20].mxu1 %v2598_v19 }
 0x7ff   :  { %v2985_v58 = vpop.f32.mrb[24].mxu0 }
 0x800   :  { %v3007_v42 = vpop.f32.mrb[16].mxu1  ;;  %v2986_v49 = vpop.f32.mrb[25].mxu0 }
 0x801   :  { %v3008_v55 = vpop.f32.mrb[17].mxu1  ;;  %v2987_v36 = vadd.f32 %v2986_v49, %v2985_v58  ;;  %v2988_v54 = vpop.f32.mrb[26].mxu0 }
 0x802   :  { %v3009_v51 = vadd.f32 %v3008_v55, %v3007_v42  ;;  %v3010_v33 = vpop.f32.mrb[18].mxu1  ;;  %v2989_v45 = vpop.f32.mrb[27].mxu0 }
 0x803   :  { %v3011_v39 = vpop.f32.mrb[19].mxu1  ;;  %v2710_v16 = vadd.f32 %v2987_v36, %v2960_v22  ;;  %v2990_v32 = vadd.f32 %v2989_v45, %v2988_v54 }
 0x804   :  { %v3012_v50 = vadd.f32 %v3011_v39, %v3010_v33 }
 0x805   :  { %v2751_v56 = vadd.f32 %v3009_v51, %v2710_v16  ;;  %v2713_v46 = vadd.f32 %v2990_v32, %v2960_v22 }
 0x807   :  { %v2754_v40 = vadd.f32 %v3012_v50, %v2713_v46 }
 0x81f   :  { %v3029_v19 = vpop.f32.mrb[28].mxu0 }
 0x820   :  { %v3051_v12 = vpop.f32.mrb[20].mxu1  ;;  %v3030_v34 = vpop.f32.mrb[29].mxu0 }
 0x821   :  { %v3052_v47 = vpop.f32.mrb[21].mxu1  ;;  %v3031_v38 = vadd.f32 %v3030_v34, %v3029_v19  ;;  %v3032_v62 = vpop.f32.mrb[30].mxu0 }
 0x822   :  { %v3053_v25 = vadd.f32 %v3052_v47, %v3051_v12  ;;  %v3054_v61 = vpop.f32.mrb[22].mxu1  ;;  %v3033_v37 = vpop.f32.mrb[31].mxu0 }
 0x823   :  { %v3055_v0 = vpop.f32.mrb[23].mxu1  ;;  %v2792_v24 = vadd.f32 %v3031_v38, %v2751_v56  ;;  %v3034_v26 = vadd.f32 %v3033_v37, %v3032_v62 }
 0x824   :  { %v3056_v10 = vadd.f32 %v3055_v0, %v3054_v61 }
 0x825   :  { %v2833_v17 = vadd.f32 %v3053_v25, %v2792_v24  ;;  %v2795_v27 = vadd.f32 %v3034_v26, %v2754_v40 }
 0x827   :  { %3273 = vtanh.f32 %v2833_v17  ;;  %v2836_v5 = vadd.f32 %v3056_v10, %v2795_v27 }
 0x829   :  { %3275 = vtanh.f32 %v2836_v5 }
 0x831   :  { %v3274_v9 = vpop.eup %3273 }
 0x832   :  { %2842 = vst.msk [vmem:[%s4481_s20] sm:$0xff] %vm2841_vm4, %v3274_v9 }
 0x833   :  { %v3276_v4 = vpop.eup %3275 }
 0x834   :  { %2843 = vst.msk [vmem:[%s4481_s20 + $0x8] sm:$0xff] %vm2841_vm4, %v3276_v4 }
 0x835   :  { %2848 = vsyncmov [#allocation4] }
 0x838   :  { %s2849_s19 = vpop.sfrf %2848 }
 0x839   :  { %p2961_p0 = scmp.ne.s32.totalorder %s2849_s19, 0 }
 0x83b   :  { %2853 = shalt.err (%p2961_p0)  }
 0x83c   :  { %2855 = vsyncmov [#allocation4 + $0x1] }
 0x83f   :  { %s2856_s18 = vpop.sfrf %2855 }
 0x840   :  { %p2962_p1 = scmp.ne.s32.totalorder %s2856_s18, 0 }
 0x842   :  { %2860 = shalt.err (%p2962_p1)  }

</bundles_post_ra>
